<compile_context>
chip_gen: v6e
topology: v6e:2x2x1
jax: 0.10.0
libtpu: 0.0.40
codegen_flags: <defaults>
</compile_context>

<pallas_src>
import jax
import jax.numpy as jnp
from jax.experimental import pallas as pl
from jax.experimental.pallas import tpu as pltpu


# ----------------------------------------------------------------------------
# Model configuration (small, consistent with the module's __init__)
# ----------------------------------------------------------------------------

BATCH = 2
IMG_CHANNELS = 4
IMG_SIZE = 16
PATCH_DIM = 4
EMB_DIM = 32
NUM_HEADS = 2
DIM_HEAD = 16
NUM_LAYERS = 2
MLP_DIM = 64
HEAD_LAYERS = 4

TOKEN_DIM = PATCH_DIM * PATCH_DIM * IMG_CHANNELS                 # 64
NUM_PATCHES = (IMG_SIZE // PATCH_DIM) * (IMG_SIZE // PATCH_DIM)  # 16
SEQ = NUM_PATCHES + 1                                            # 17 (CLS first)
SEQ_PAD = 24                                                     # 8-aligned rows/batch
ROWS = BATCH * SEQ_PAD                                           # 48
INNER_DIM = NUM_HEADS * DIM_HEAD                                 # 32
NEG_BIG = -1e30


# ----------------------------------------------------------------------------
# Fused forward kernel
# ----------------------------------------------------------------------------

def _layernorm(x, g, b, eps=1e-5):
    mean = jnp.mean(x, axis=-1, keepdims=True)
    var = jnp.mean(jnp.square(x - mean), axis=-1, keepdims=True)
    return (x - mean) * jax.lax.rsqrt(var + eps) * g + b


def vit_fused_kernel(
    tokens_ref,     # (ROWS, TOKEN_DIM)  padded patch tokens (CLS row + pad rows zero)
    patch_ref,      # (72, TOKEN_DIM)    patch_w / patch LN g,b / patch bias
    posmask_ref,    # (ROWS, 2*E)        [:, 0:E] pos+cls slab, [:, E:2E] patch-row mask
    lw_ref,         # (L, 160, 96)       per-layer wqkv / wo / w1 / w2
    lb_ref,         # (L, 8, 128)        per-layer LN gains/biases + matmul biases
    head_ref,       # (136, E)           head weights / biases / final projection
    out_ref,        # (16, 1)            logits at rows 0 and 8
):
    E = EMB_DIM
    scale = DIM_HEAD ** -0.5

    # Key-padding mask (columns >= SEQ are padding), shared by all batches/heads.
    col = jax.lax.broadcasted_iota(jnp.int32, (SEQ_PAD, SEQ_PAD), 1)
    kmask = jnp.where(col < SEQ, 0.0, NEG_BIG).astype(jnp.float32)

    # ---- patch embedding params (hoisted) ----
    patch_w = patch_ref[0:TOKEN_DIM, 0:E]                      # (64, 32)
    pln_g = patch_ref[TOKEN_DIM:TOKEN_DIM + 1, :]              # (1, 64)
    pln_b = patch_ref[TOKEN_DIM + 1:TOKEN_DIM + 2, :]          # (1, 64)
    patch_b = patch_ref[TOKEN_DIM + 2:TOKEN_DIM + 3, 0:E]      # (1, 32)

    pos_slab = posmask_ref[:, 0:E]                             # (48, 32)
    pmask = posmask_ref[:, E:2 * E]                            # (48, 32)

    # ---- patch embedding: LayerNorm -> Linear, both batches at once ----
    tok = tokens_ref[...]                                      # (48, 64)
    tok = _layernorm(tok, pln_g, pln_b)
    emb = jnp.dot(tok, patch_w, preferred_element_type=jnp.float32) + patch_b
    # Assemble sequence in registers: patch rows keep emb+pos, CLS rows become
    # cls+pos[0], pad rows become 0 (mask zeroes the garbage from padded rows).
    x = emb * pmask + pos_slab                                 # (48, 32)
    # emb_dropout: identity (eval)

    # ---- transformer encoder (pre-norm blocks, residuals fused) ----
    for l in range(NUM_LAYERS):
        wqkv = lw_ref[l, 0:E, 0:3 * INNER_DIM]                 # (32, 96)
        wo = lw_ref[l, E:2 * E, 0:E]                           # (32, 32)
        w1 = lw_ref[l, 2 * E:3 * E, 0:MLP_DIM]                 # (32, 64)
        w2 = lw_ref[l, 3 * E:3 * E + MLP_DIM, 0:E]             # (64, 32)
        ln1_g = lb_ref[l, 0:1, 0:E]
        ln1_b = lb_ref[l, 1:2, 0:E]
        ln2_g = lb_ref[l, 2:3, 0:E]
        ln2_b = lb_ref[l, 3:4, 0:E]
        bo = lb_ref[l, 4:5, 0:E]
        b2 = lb_ref[l, 5:6, 0:E]
        b1 = lb_ref[l, 6:7, 0:MLP_DIM]
        bqkv = lb_ref[l, 7:8, 0:3 * INNER_DIM]

        # -- multi-head self-attention --
        h = _layernorm(x, ln1_g, ln1_b)                        # (48, 32)
        qkv = jnp.dot(h, wqkv, preferred_element_type=jnp.float32) + bqkv  # (48, 96)
        q = qkv[:, 0:INNER_DIM]
        k = qkv[:, INNER_DIM:2 * INNER_DIM]
        v = qkv[:, 2 * INNER_DIM:3 * INNER_DIM]

        o_heads = []
        for hd in range(NUM_HEADS):
            lo, hi = hd * DIM_HEAD, (hd + 1) * DIM_HEAD
            q_h, k_h, v_h = q[:, lo:hi], k[:, lo:hi], v[:, lo:hi]
            o_batches = []
            for b in range(BATCH):
                r0 = b * SEQ_PAD
                qb = q_h[r0:r0 + SEQ_PAD, :]                   # (24, 16)
                kb = k_h[r0:r0 + SEQ_PAD, :]
                vb = v_h[r0:r0 + SEQ_PAD, :]
                s = jax.lax.dot_general(
                    qb, kb, (((1,), (1,)), ((), ())),
                    preferred_element_type=jnp.float32) * scale + kmask
                s = s - jnp.max(s, axis=-1, keepdims=True)
                p = jnp.exp(s)
                p = p / jnp.sum(p, axis=-1, keepdims=True)     # exact division
                o_batches.append(
                    jnp.dot(p, vb, preferred_element_type=jnp.float32))
            o_heads.append(jnp.concatenate(o_batches, axis=0))  # (48, 16)
        o = jnp.concatenate(o_heads, axis=-1)                   # (48, 32)
        # Head-sum folded into one contraction over INNER_DIM.
        attn = jnp.dot(o, wo, preferred_element_type=jnp.float32) + bo
        x = x + attn                                            # residual

        # -- feed-forward --
        h = _layernorm(x, ln2_g, ln2_b)
        m = jnp.dot(h, w1, preferred_element_type=jnp.float32) + b1
        m = jax.nn.gelu(m, approximate=True)   # TODO(synk): exact erf GELU
        m = jnp.dot(m, w2, preferred_element_type=jnp.float32) + b2
        x = x + m                                               # residual

    # ---- regression head on the CLS rows (rows 0 and 24; both 8-aligned) ----
    cls2 = jnp.concatenate([x[0:8, :], x[SEQ_PAD:SEQ_PAD + 8, :]], axis=0)  # (16,32)
    hfeat = cls2
    for j in range(HEAD_LAYERS):
        hw = head_ref[j * E:(j + 1) * E, :]                    # (32, 32)
        hb = head_ref[HEAD_LAYERS * E + j:HEAD_LAYERS * E + j + 1, :]  # (1, 32)
        y = jnp.dot(hfeat, hw, preferred_element_type=jnp.float32) + hb
        hfeat = hfeat + jnp.maximum(y, 0.0)
    how = head_ref[HEAD_LAYERS * E + HEAD_LAYERS:
                   HEAD_LAYERS * E + HEAD_LAYERS + 1, :]        # (1, 32)
    hob = head_ref[HEAD_LAYERS * E + HEAD_LAYERS + 1:
                   HEAD_LAYERS * E + HEAD_LAYERS + 2, 0:1]      # (1, 1)
    logits = jnp.sum(hfeat * how, axis=-1, keepdims=True) + hob  # (16, 1)
    out_ref[...] = logits                                       # single store


# ----------------------------------------------------------------------------
# Parameters (natural layout) + packing into a handful of slabs
# ----------------------------------------------------------------------------

def init_params(key):
    keys = iter(jax.random.split(key, 32))

    def nrm(shape, scale=0.02):
        return scale * jax.random.normal(next(keys), shape, dtype=jnp.float32)

    L, H, dh = NUM_LAYERS, NUM_HEADS, DIM_HEAD
    return {
        "patch_ln_g": jnp.ones((TOKEN_DIM,), jnp.float32),
        "patch_ln_b": jnp.zeros((TOKEN_DIM,), jnp.float32),
        "patch_w": nrm((TOKEN_DIM, EMB_DIM)),
        "patch_b": jnp.zeros((EMB_DIM,), jnp.float32),
        "cls": nrm((1, 1, EMB_DIM), scale=1.0),
        "pos": nrm((1, SEQ, EMB_DIM), scale=1.0),
        "ln1_g": jnp.ones((L, 1, EMB_DIM), jnp.float32),
        "ln1_b": jnp.zeros((L, 1, EMB_DIM), jnp.float32),
        "wq": nrm((L, H, EMB_DIM, dh)),
        "wk": nrm((L, H, EMB_DIM, dh)),
        "wv": nrm((L, H, EMB_DIM, dh)),
        "bq": jnp.zeros((L, H, 1, dh), jnp.float32),
        "bk": jnp.zeros((L, H, 1, dh), jnp.float32),
        "bv": jnp.zeros((L, H, 1, dh), jnp.float32),
        "wo": nrm((L, H, dh, EMB_DIM)),
        "bo": jnp.zeros((L, 1, EMB_DIM), jnp.float32),
        "ln2_g": jnp.ones((L, 1, EMB_DIM), jnp.float32),
        "ln2_b": jnp.zeros((L, 1, EMB_DIM), jnp.float32),
        "w1": nrm((L, EMB_DIM, MLP_DIM)),
        "b1": jnp.zeros((L, 1, MLP_DIM), jnp.float32),
        "w2": nrm((L, MLP_DIM, EMB_DIM)),
        "b2": jnp.zeros((L, 1, EMB_DIM), jnp.float32),
        "head_w": nrm((HEAD_LAYERS, EMB_DIM, EMB_DIM)),
        "head_b": jnp.zeros((HEAD_LAYERS, 1, EMB_DIM), jnp.float32),
        "head_out_w": nrm((EMB_DIM, 1)),
        "head_out_b": jnp.zeros((1,), jnp.float32),
    }


def pack_params(params):
    """Pack the natural parameter dict into 5 slab arrays (done once, offline)."""
    E, L, H = EMB_DIM, NUM_LAYERS, NUM_HEADS

    # patch slab (72, TOKEN_DIM)
    patch = jnp.zeros((72, TOKEN_DIM), jnp.float32)
    patch = patch.at[0:TOKEN_DIM, 0:E].set(params["patch_w"])
    patch = patch.at[TOKEN_DIM, :].set(params["patch_ln_g"])
    patch = patch.at[TOKEN_DIM + 1, :].set(params["patch_ln_b"])
    patch = patch.at[TOKEN_DIM + 2, 0:E].set(params["patch_b"])

    # positional/cls + mask slab (ROWS, 2*E)
    pos = params["pos"][0]                                     # (SEQ, E)
    cls = params["cls"].reshape(1, E)
    pos_slab = jnp.zeros((ROWS, E), jnp.float32)
    mask = jnp.zeros((ROWS, E), jnp.float32)
    for b in range(BATCH):
        r0 = b * SEQ_PAD
        pos_slab = pos_slab.at[r0, :].set((cls + pos[0:1, :])[0])
        pos_slab = pos_slab.at[r0 + 1:r0 + SEQ, :].set(pos[1:, :])
        mask = mask.at[r0 + 1:r0 + SEQ, :].set(1.0)
    posmask = jnp.concatenate([pos_slab, mask], axis=-1)       # (48, 64)

    # per-layer weight slab (L, 160, 96) and LN/bias slab (L, 8, 128)
    lw = jnp.zeros((L, 3 * E + MLP_DIM, 3 * INNER_DIM), jnp.float32)
    lb = jnp.zeros((L, 8, 128), jnp.float32)
    for l in range(L):
        wq = jnp.concatenate([params["wq"][l, h] for h in range(H)], axis=-1)
        wk = jnp.concatenate([params["wk"][l, h] for h in range(H)], axis=-1)
        wv = jnp.concatenate([params["wv"][l, h] for h in range(H)], axis=-1)
        wqkv = jnp.concatenate([wq, wk, wv], axis=-1)          # (E, 96)
        wo = jnp.concatenate([params["wo"][l, h] for h in range(H)], axis=0)  # (32, E)
        lw = lw.at[l, 0:E, :].set(wqkv)
        lw = lw.at[l, E:2 * E, 0:E].set(wo)
        lw = lw.at[l, 2 * E:3 * E, 0:MLP_DIM].set(params["w1"][l])
        lw = lw.at[l, 3 * E:3 * E + MLP_DIM, 0:E].set(params["w2"][l])

        bq = jnp.concatenate([params["bq"][l, h] for h in range(H)], axis=-1)
        bk = jnp.concatenate([params["bk"][l, h] for h in range(H)], axis=-1)
        bv = jnp.concatenate([params["bv"][l, h] for h in range(H)], axis=-1)
        bqkv = jnp.concatenate([bq, bk, bv], axis=-1)          # (1, 96)
        lb = lb.at[l, 0, 0:E].set(params["ln1_g"][l, 0])
        lb = lb.at[l, 1, 0:E].set(params["ln1_b"][l, 0])
        lb = lb.at[l, 2, 0:E].set(params["ln2_g"][l, 0])
        lb = lb.at[l, 3, 0:E].set(params["ln2_b"][l, 0])
        lb = lb.at[l, 4, 0:E].set(params["bo"][l, 0])
        lb = lb.at[l, 5, 0:E].set(params["b2"][l, 0])
        lb = lb.at[l, 6, 0:MLP_DIM].set(params["b1"][l, 0])
        lb = lb.at[l, 7, 0:3 * INNER_DIM].set(bqkv[0])

    # head slab (136, E)
    head = jnp.zeros((136, E), jnp.float32)
    for j in range(HEAD_LAYERS):
        head = head.at[j * E:(j + 1) * E, :].set(params["head_w"][j])
        head = head.at[HEAD_LAYERS * E + j, :].set(params["head_b"][j, 0])
    head = head.at[HEAD_LAYERS * E + HEAD_LAYERS, :].set(params["head_out_w"][:, 0])
    head = head.at[HEAD_LAYERS * E + HEAD_LAYERS + 1, 0].set(params["head_out_b"][0])

    return {"patch": patch, "posmask": posmask,
            "layer_w": lw, "layer_b": lb, "head": head}


# ----------------------------------------------------------------------------
# Forward pass: image rearrange (XLA glue) + ONE pallas_call
# ----------------------------------------------------------------------------

def vit_forward(packed, imgs):
    B, C, H, W = imgs.shape
    p = PATCH_DIM

    # Rearrange 'b c (h p1) (w p2) -> b (h w) (p1 p2 c)'  (pure layout glue)
    x = imgs.reshape(B, C, H // p, p, W // p, p)
    x = jnp.transpose(x, (0, 2, 4, 3, 5, 1))                   # b h w p1 p2 c
    tokens = x.reshape(B, NUM_PATCHES, TOKEN_DIM)

    # Pad each batch to SEQ_PAD rows: row 0 reserved for CLS, rows 1..16 patches,
    # rows 17..23 padding (all zeros -> masked out inside the kernel).
    tokens_pad = jnp.pad(
        tokens, ((0, 0), (1, SEQ_PAD - NUM_PATCHES - 1), (0, 0)))
    tokens_pad = tokens_pad.reshape(ROWS, TOKEN_DIM)

    raw = pl.pallas_call(
        vit_fused_kernel,
        out_shape=jax.ShapeDtypeStruct((16, 1), jnp.float32),
    )(
        tokens_pad,
        packed["patch"],
        packed["posmask"],
        packed["layer_w"],
        packed["layer_b"],
        packed["head"],
    )
    # rows 0 and 8 hold the two batch logits
    return raw[::8]                                            # (B, 1)


# ----------------------------------------------------------------------------

if __name__ == "__main__":
    key = jax.random.PRNGKey(0)
    k_params, k_img = jax.random.split(key)
    params = init_params(k_params)
    packed = pack_params(params)
    imgs = jax.random.normal(
        k_img, (BATCH, IMG_CHANNELS, IMG_SIZE, IMG_SIZE), dtype=jnp.float32)

    logits = jax.jit(vit_forward)(packed, imgs)
    jax.block_until_ready(logits)
    assert logits.shape == (BATCH, 1)
    print("KERNEL_OK")
</pallas_src>

<mosaic_0001>
module attributes {stable_mosaic.version = 11 : i64} {
  func.func @vit_fused_kernel(%arg0: memref<48x64xf32, #tpu.memory_space<vmem>>, %arg1: memref<72x64xf32, #tpu.memory_space<vmem>>, %arg2: memref<48x64xf32, #tpu.memory_space<vmem>>, %arg3: memref<2x160x96xf32, #tpu.memory_space<vmem>>, %arg4: memref<2x8x128xf32, #tpu.memory_space<vmem>>, %arg5: memref<136x32xf32, #tpu.memory_space<vmem>>, %arg6: memref<16x1xf32, #tpu.memory_space<vmem>>) attributes {dimension_semantics = [], scalar_prefetch = 0 : i64, scratch_operands = 0 : i64, tpu.core_type = #tpu.core_type<tc>} {
    %0 = tpu.iota {dimensions = array<i32: 1>} : vector<24x24xi32>
    %c17_i32 = arith.constant 17 : i32
    %1 = vector.broadcast %c17_i32 : i32 to vector<24x24xi32>
    %2 = arith.cmpi slt, %0, %1 : vector<24x24xi32>
    %cst = arith.constant 0.000000e+00 : f32
    %cst_0 = arith.constant -1.000000e+30 : f32
    %3 = vector.broadcast %cst : f32 to vector<24x24xf32>
    %4 = vector.broadcast %cst_0 : f32 to vector<24x24xf32>
    %5 = arith.select %2, %3, %4 : vector<24x24xi1>, vector<24x24xf32>
    %c0 = arith.constant 0 : index
    %c0_1 = arith.constant 0 : index
    %6 = vector.load %arg1[%c0, %c0_1] : memref<72x64xf32, #tpu.memory_space<vmem>>, vector<64x32xf32>
    %c64 = arith.constant 64 : index
    %c0_2 = arith.constant 0 : index
    %7 = vector.load %arg1[%c64, %c0_2] : memref<72x64xf32, #tpu.memory_space<vmem>>, vector<1x64xf32>
    %c65 = arith.constant 65 : index
    %c0_3 = arith.constant 0 : index
    %8 = vector.load %arg1[%c65, %c0_3] : memref<72x64xf32, #tpu.memory_space<vmem>>, vector<1x64xf32>
    %c66 = arith.constant 66 : index
    %c0_4 = arith.constant 0 : index
    %9 = vector.load %arg1[%c66, %c0_4] : memref<72x64xf32, #tpu.memory_space<vmem>>, vector<1x32xf32>
    %c0_5 = arith.constant 0 : index
    %c0_6 = arith.constant 0 : index
    %10 = vector.load %arg2[%c0_5, %c0_6] : memref<48x64xf32, #tpu.memory_space<vmem>>, vector<48x32xf32>
    %c0_7 = arith.constant 0 : index
    %c32 = arith.constant 32 : index
    %11 = vector.load %arg2[%c0_7, %c32] : memref<48x64xf32, #tpu.memory_space<vmem>>, vector<48x32xf32>
    %c0_8 = arith.constant 0 : index
    %c0_9 = arith.constant 0 : index
    %12 = vector.load %arg0[%c0_8, %c0_9] : memref<48x64xf32, #tpu.memory_space<vmem>>, vector<48x64xf32>
    %cst_10 = arith.constant dense<0.000000e+00> : vector<48xf32>
    %13 = vector.multi_reduction <add>, %12, %cst_10 [1] : vector<48x64xf32> to vector<48xf32>
    %14 = vector.shape_cast %13 : vector<48xf32> to vector<48x1xf32>
    %cst_11 = arith.constant 6.400000e+01 : f32
    %15 = vector.broadcast %cst_11 : f32 to vector<48x1xf32>
    %16 = arith.divf %14, %15 : vector<48x1xf32>
    %17 = vector.broadcast %16 : vector<48x1xf32> to vector<48x64xf32>
    %18 = arith.subf %12, %17 : vector<48x64xf32>
    %19 = arith.mulf %18, %18 : vector<48x64xf32>
    %cst_12 = arith.constant dense<0.000000e+00> : vector<48xf32>
    %20 = vector.multi_reduction <add>, %19, %cst_12 [1] : vector<48x64xf32> to vector<48xf32>
    %21 = vector.shape_cast %20 : vector<48xf32> to vector<48x1xf32>
    %cst_13 = arith.constant 6.400000e+01 : f32
    %22 = vector.broadcast %cst_13 : f32 to vector<48x1xf32>
    %23 = arith.divf %21, %22 : vector<48x1xf32>
    %24 = vector.broadcast %16 : vector<48x1xf32> to vector<48x64xf32>
    %25 = arith.subf %12, %24 : vector<48x64xf32>
    %cst_14 = arith.constant 9.99999974E-6 : f32
    %26 = vector.broadcast %cst_14 : f32 to vector<48x1xf32>
    %27 = arith.addf %23, %26 : vector<48x1xf32>
    %28 = math.rsqrt %27 : vector<48x1xf32>
    %29 = vector.broadcast %28 : vector<48x1xf32> to vector<48x64xf32>
    %30 = arith.mulf %25, %29 : vector<48x64xf32>
    %31 = vector.broadcast %7 : vector<1x64xf32> to vector<48x64xf32>
    %32 = arith.mulf %30, %31 : vector<48x64xf32>
    %33 = vector.broadcast %8 : vector<1x64xf32> to vector<48x64xf32>
    %34 = arith.addf %32, %33 : vector<48x64xf32>
    %cst_15 = arith.constant dense<0.000000e+00> : vector<48x32xf32>
    %35 = tpu.matmul %34, %6, %cst_15 {dimension_numbers = #tpu.dot_dimension_numbers<[1], [0], [0], [1], [0, 0, 1, 1], [], []>} : vector<48x64xf32>, vector<64x32xf32>, vector<48x32xf32> -> vector<48x32xf32>
    %36 = vector.broadcast %9 : vector<1x32xf32> to vector<48x32xf32>
    %37 = arith.addf %35, %36 : vector<48x32xf32>
    %38 = arith.mulf %37, %11 : vector<48x32xf32>
    %39 = arith.addf %38, %10 : vector<48x32xf32>
    %c0_16 = arith.constant 0 : index
    %c0_17 = arith.constant 0 : index
    %c0_18 = arith.constant 0 : index
    %40 = vector.load %arg3[%c0_16, %c0_17, %c0_18] : memref<2x160x96xf32, #tpu.memory_space<vmem>>, vector<1x32x96xf32>
    %41 = vector.shape_cast %40 : vector<1x32x96xf32> to vector<32x96xf32>
    %c0_19 = arith.constant 0 : index
    %c32_20 = arith.constant 32 : index
    %c0_21 = arith.constant 0 : index
    %42 = vector.load %arg3[%c0_19, %c32_20, %c0_21] : memref<2x160x96xf32, #tpu.memory_space<vmem>>, vector<1x32x32xf32>
    %43 = vector.shape_cast %42 : vector<1x32x32xf32> to vector<32x32xf32>
    %c0_22 = arith.constant 0 : index
    %c64_23 = arith.constant 64 : index
    %c0_24 = arith.constant 0 : index
    %44 = vector.load %arg3[%c0_22, %c64_23, %c0_24] : memref<2x160x96xf32, #tpu.memory_space<vmem>>, vector<1x32x64xf32>
    %45 = vector.shape_cast %44 : vector<1x32x64xf32> to vector<32x64xf32>
    %c0_25 = arith.constant 0 : index
    %c96 = arith.constant 96 : index
    %c0_26 = arith.constant 0 : index
    %46 = vector.load %arg3[%c0_25, %c96, %c0_26] : memref<2x160x96xf32, #tpu.memory_space<vmem>>, vector<1x64x32xf32>
    %47 = vector.shape_cast %46 : vector<1x64x32xf32> to vector<64x32xf32>
    %c0_27 = arith.constant 0 : index
    %c0_28 = arith.constant 0 : index
    %c0_29 = arith.constant 0 : index
    %48 = vector.load %arg4[%c0_27, %c0_28, %c0_29] : memref<2x8x128xf32, #tpu.memory_space<vmem>>, vector<1x1x32xf32>
    %49 = vector.shape_cast %48 : vector<1x1x32xf32> to vector<1x32xf32>
    %c0_30 = arith.constant 0 : index
    %c1 = arith.constant 1 : index
    %c0_31 = arith.constant 0 : index
    %50 = vector.load %arg4[%c0_30, %c1, %c0_31] : memref<2x8x128xf32, #tpu.memory_space<vmem>>, vector<1x1x32xf32>
    %51 = vector.shape_cast %50 : vector<1x1x32xf32> to vector<1x32xf32>
    %c0_32 = arith.constant 0 : index
    %c2 = arith.constant 2 : index
    %c0_33 = arith.constant 0 : index
    %52 = vector.load %arg4[%c0_32, %c2, %c0_33] : memref<2x8x128xf32, #tpu.memory_space<vmem>>, vector<1x1x32xf32>
    %53 = vector.shape_cast %52 : vector<1x1x32xf32> to vector<1x32xf32>
    %c0_34 = arith.constant 0 : index
    %c3 = arith.constant 3 : index
    %c0_35 = arith.constant 0 : index
    %54 = vector.load %arg4[%c0_34, %c3, %c0_35] : memref<2x8x128xf32, #tpu.memory_space<vmem>>, vector<1x1x32xf32>
    %55 = vector.shape_cast %54 : vector<1x1x32xf32> to vector<1x32xf32>
    %c0_36 = arith.constant 0 : index
    %c4 = arith.constant 4 : index
    %c0_37 = arith.constant 0 : index
    %56 = vector.load %arg4[%c0_36, %c4, %c0_37] : memref<2x8x128xf32, #tpu.memory_space<vmem>>, vector<1x1x32xf32>
    %57 = vector.shape_cast %56 : vector<1x1x32xf32> to vector<1x32xf32>
    %c0_38 = arith.constant 0 : index
    %c5 = arith.constant 5 : index
    %c0_39 = arith.constant 0 : index
    %58 = vector.load %arg4[%c0_38, %c5, %c0_39] : memref<2x8x128xf32, #tpu.memory_space<vmem>>, vector<1x1x32xf32>
    %59 = vector.shape_cast %58 : vector<1x1x32xf32> to vector<1x32xf32>
    %c0_40 = arith.constant 0 : index
    %c6 = arith.constant 6 : index
    %c0_41 = arith.constant 0 : index
    %60 = vector.load %arg4[%c0_40, %c6, %c0_41] : memref<2x8x128xf32, #tpu.memory_space<vmem>>, vector<1x1x64xf32>
    %61 = vector.shape_cast %60 : vector<1x1x64xf32> to vector<1x64xf32>
    %c0_42 = arith.constant 0 : index
    %c7 = arith.constant 7 : index
    %c0_43 = arith.constant 0 : index
    %62 = vector.load %arg4[%c0_42, %c7, %c0_43] : memref<2x8x128xf32, #tpu.memory_space<vmem>>, vector<1x1x96xf32>
    %63 = vector.shape_cast %62 : vector<1x1x96xf32> to vector<1x96xf32>
    %cst_44 = arith.constant dense<0.000000e+00> : vector<48xf32>
    %64 = vector.multi_reduction <add>, %39, %cst_44 [1] : vector<48x32xf32> to vector<48xf32>
    %65 = vector.shape_cast %64 : vector<48xf32> to vector<48x1xf32>
    %cst_45 = arith.constant 3.200000e+01 : f32
    %66 = vector.broadcast %cst_45 : f32 to vector<48x1xf32>
    %67 = arith.divf %65, %66 : vector<48x1xf32>
    %68 = vector.broadcast %67 : vector<48x1xf32> to vector<48x32xf32>
    %69 = arith.subf %39, %68 : vector<48x32xf32>
    %70 = arith.mulf %69, %69 : vector<48x32xf32>
    %cst_46 = arith.constant dense<0.000000e+00> : vector<48xf32>
    %71 = vector.multi_reduction <add>, %70, %cst_46 [1] : vector<48x32xf32> to vector<48xf32>
    %72 = vector.shape_cast %71 : vector<48xf32> to vector<48x1xf32>
    %cst_47 = arith.constant 3.200000e+01 : f32
    %73 = vector.broadcast %cst_47 : f32 to vector<48x1xf32>
    %74 = arith.divf %72, %73 : vector<48x1xf32>
    %75 = vector.broadcast %67 : vector<48x1xf32> to vector<48x32xf32>
    %76 = arith.subf %39, %75 : vector<48x32xf32>
    %cst_48 = arith.constant 9.99999974E-6 : f32
    %77 = vector.broadcast %cst_48 : f32 to vector<48x1xf32>
    %78 = arith.addf %74, %77 : vector<48x1xf32>
    %79 = math.rsqrt %78 : vector<48x1xf32>
    %80 = vector.broadcast %79 : vector<48x1xf32> to vector<48x32xf32>
    %81 = arith.mulf %76, %80 : vector<48x32xf32>
    %82 = vector.broadcast %49 : vector<1x32xf32> to vector<48x32xf32>
    %83 = arith.mulf %81, %82 : vector<48x32xf32>
    %84 = vector.broadcast %51 : vector<1x32xf32> to vector<48x32xf32>
    %85 = arith.addf %83, %84 : vector<48x32xf32>
    %cst_49 = arith.constant dense<0.000000e+00> : vector<48x96xf32>
    %86 = tpu.matmul %85, %41, %cst_49 {dimension_numbers = #tpu.dot_dimension_numbers<[1], [0], [0], [1], [0, 0, 1, 1], [], []>} : vector<48x32xf32>, vector<32x96xf32>, vector<48x96xf32> -> vector<48x96xf32>
    %87 = vector.broadcast %63 : vector<1x96xf32> to vector<48x96xf32>
    %88 = arith.addf %86, %87 : vector<48x96xf32>
    %89 = vector.extract_strided_slice %88 {offsets = [0, 0], sizes = [48, 32], strides = [1, 1]} : vector<48x96xf32> to vector<48x32xf32>
    %90 = vector.extract_strided_slice %88 {offsets = [0, 32], sizes = [48, 32], strides = [1, 1]} : vector<48x96xf32> to vector<48x32xf32>
    %91 = vector.extract_strided_slice %88 {offsets = [0, 64], sizes = [48, 32], strides = [1, 1]} : vector<48x96xf32> to vector<48x32xf32>
    %92 = vector.extract_strided_slice %89 {offsets = [0, 0], sizes = [48, 16], strides = [1, 1]} : vector<48x32xf32> to vector<48x16xf32>
    %93 = vector.extract_strided_slice %90 {offsets = [0, 0], sizes = [48, 16], strides = [1, 1]} : vector<48x32xf32> to vector<48x16xf32>
    %94 = vector.extract_strided_slice %91 {offsets = [0, 0], sizes = [48, 16], strides = [1, 1]} : vector<48x32xf32> to vector<48x16xf32>
    %95 = vector.extract_strided_slice %92 {offsets = [0, 0], sizes = [24, 16], strides = [1, 1]} : vector<48x16xf32> to vector<24x16xf32>
    %96 = vector.extract_strided_slice %93 {offsets = [0, 0], sizes = [24, 16], strides = [1, 1]} : vector<48x16xf32> to vector<24x16xf32>
    %97 = vector.extract_strided_slice %94 {offsets = [0, 0], sizes = [24, 16], strides = [1, 1]} : vector<48x16xf32> to vector<24x16xf32>
    %cst_50 = arith.constant dense<0.000000e+00> : vector<24x24xf32>
    %98 = tpu.matmul %95, %96, %cst_50 {dimension_numbers = #tpu.dot_dimension_numbers<[1], [1], [0], [0], [0, 0, 1, 0], [], []>} : vector<24x16xf32>, vector<24x16xf32>, vector<24x24xf32> -> vector<24x24xf32>
    %cst_51 = arith.constant 2.500000e-01 : f32
    %99 = vector.broadcast %cst_51 : f32 to vector<24x24xf32>
    %100 = arith.mulf %98, %99 : vector<24x24xf32>
    %101 = arith.addf %100, %5 : vector<24x24xf32>
    %cst_52 = arith.constant dense<0xFF800000> : vector<24xf32>
    %102 = vector.multi_reduction <maximumf>, %101, %cst_52 [1] : vector<24x24xf32> to vector<24xf32>
    %103 = vector.shape_cast %102 : vector<24xf32> to vector<24x1xf32>
    %104 = vector.broadcast %103 : vector<24x1xf32> to vector<24x24xf32>
    %105 = arith.subf %101, %104 : vector<24x24xf32>
    %106 = math.exp %105 : vector<24x24xf32>
    %cst_53 = arith.constant dense<0.000000e+00> : vector<24xf32>
    %107 = vector.multi_reduction <add>, %106, %cst_53 [1] : vector<24x24xf32> to vector<24xf32>
    %108 = vector.shape_cast %107 : vector<24xf32> to vector<24x1xf32>
    %109 = vector.broadcast %108 : vector<24x1xf32> to vector<24x24xf32>
    %110 = arith.divf %106, %109 : vector<24x24xf32>
    %cst_54 = arith.constant dense<0.000000e+00> : vector<24x16xf32>
    %111 = tpu.matmul %110, %97, %cst_54 {dimension_numbers = #tpu.dot_dimension_numbers<[1], [0], [0], [1], [0, 0, 1, 1], [], []>} : vector<24x24xf32>, vector<24x16xf32>, vector<24x16xf32> -> vector<24x16xf32>
    %112 = vector.extract_strided_slice %92 {offsets = [24, 0], sizes = [24, 16], strides = [1, 1]} : vector<48x16xf32> to vector<24x16xf32>
    %113 = vector.extract_strided_slice %93 {offsets = [24, 0], sizes = [24, 16], strides = [1, 1]} : vector<48x16xf32> to vector<24x16xf32>
    %114 = vector.extract_strided_slice %94 {offsets = [24, 0], sizes = [24, 16], strides = [1, 1]} : vector<48x16xf32> to vector<24x16xf32>
    %cst_55 = arith.constant dense<0.000000e+00> : vector<24x24xf32>
    %115 = tpu.matmul %112, %113, %cst_55 {dimension_numbers = #tpu.dot_dimension_numbers<[1], [1], [0], [0], [0, 0, 1, 0], [], []>} : vector<24x16xf32>, vector<24x16xf32>, vector<24x24xf32> -> vector<24x24xf32>
    %cst_56 = arith.constant 2.500000e-01 : f32
    %116 = vector.broadcast %cst_56 : f32 to vector<24x24xf32>
    %117 = arith.mulf %115, %116 : vector<24x24xf32>
    %118 = arith.addf %117, %5 : vector<24x24xf32>
    %cst_57 = arith.constant dense<0xFF800000> : vector<24xf32>
    %119 = vector.multi_reduction <maximumf>, %118, %cst_57 [1] : vector<24x24xf32> to vector<24xf32>
    %120 = vector.shape_cast %119 : vector<24xf32> to vector<24x1xf32>
    %121 = vector.broadcast %120 : vector<24x1xf32> to vector<24x24xf32>
    %122 = arith.subf %118, %121 : vector<24x24xf32>
    %123 = math.exp %122 : vector<24x24xf32>
    %cst_58 = arith.constant dense<0.000000e+00> : vector<24xf32>
    %124 = vector.multi_reduction <add>, %123, %cst_58 [1] : vector<24x24xf32> to vector<24xf32>
    %125 = vector.shape_cast %124 : vector<24xf32> to vector<24x1xf32>
    %126 = vector.broadcast %125 : vector<24x1xf32> to vector<24x24xf32>
    %127 = arith.divf %123, %126 : vector<24x24xf32>
    %cst_59 = arith.constant dense<0.000000e+00> : vector<24x16xf32>
    %128 = tpu.matmul %127, %114, %cst_59 {dimension_numbers = #tpu.dot_dimension_numbers<[1], [0], [0], [1], [0, 0, 1, 1], [], []>} : vector<24x24xf32>, vector<24x16xf32>, vector<24x16xf32> -> vector<24x16xf32>
    %129 = tpu.concatenate %111, %128 in 0 : vector<24x16xf32>, vector<24x16xf32> -> vector<48x16xf32>
    %130 = vector.extract_strided_slice %89 {offsets = [0, 16], sizes = [48, 16], strides = [1, 1]} : vector<48x32xf32> to vector<48x16xf32>
    %131 = vector.extract_strided_slice %90 {offsets = [0, 16], sizes = [48, 16], strides = [1, 1]} : vector<48x32xf32> to vector<48x16xf32>
    %132 = vector.extract_strided_slice %91 {offsets = [0, 16], sizes = [48, 16], strides = [1, 1]} : vector<48x32xf32> to vector<48x16xf32>
    %133 = vector.extract_strided_slice %130 {offsets = [0, 0], sizes = [24, 16], strides = [1, 1]} : vector<48x16xf32> to vector<24x16xf32>
    %134 = vector.extract_strided_slice %131 {offsets = [0, 0], sizes = [24, 16], strides = [1, 1]} : vector<48x16xf32> to vector<24x16xf32>
    %135 = vector.extract_strided_slice %132 {offsets = [0, 0], sizes = [24, 16], strides = [1, 1]} : vector<48x16xf32> to vector<24x16xf32>
    %cst_60 = arith.constant dense<0.000000e+00> : vector<24x24xf32>
    %136 = tpu.matmul %133, %134, %cst_60 {dimension_numbers = #tpu.dot_dimension_numbers<[1], [1], [0], [0], [0, 0, 1, 0], [], []>} : vector<24x16xf32>, vector<24x16xf32>, vector<24x24xf32> -> vector<24x24xf32>
    %cst_61 = arith.constant 2.500000e-01 : f32
    %137 = vector.broadcast %cst_61 : f32 to vector<24x24xf32>
    %138 = arith.mulf %136, %137 : vector<24x24xf32>
    %139 = arith.addf %138, %5 : vector<24x24xf32>
    %cst_62 = arith.constant dense<0xFF800000> : vector<24xf32>
    %140 = vector.multi_reduction <maximumf>, %139, %cst_62 [1] : vector<24x24xf32> to vector<24xf32>
    %141 = vector.shape_cast %140 : vector<24xf32> to vector<24x1xf32>
    %142 = vector.broadcast %141 : vector<24x1xf32> to vector<24x24xf32>
    %143 = arith.subf %139, %142 : vector<24x24xf32>
    %144 = math.exp %143 : vector<24x24xf32>
    %cst_63 = arith.constant dense<0.000000e+00> : vector<24xf32>
    %145 = vector.multi_reduction <add>, %144, %cst_63 [1] : vector<24x24xf32> to vector<24xf32>
    %146 = vector.shape_cast %145 : vector<24xf32> to vector<24x1xf32>
    %147 = vector.broadcast %146 : vector<24x1xf32> to vector<24x24xf32>
    %148 = arith.divf %144, %147 : vector<24x24xf32>
    %cst_64 = arith.constant dense<0.000000e+00> : vector<24x16xf32>
    %149 = tpu.matmul %148, %135, %cst_64 {dimension_numbers = #tpu.dot_dimension_numbers<[1], [0], [0], [1], [0, 0, 1, 1], [], []>} : vector<24x24xf32>, vector<24x16xf32>, vector<24x16xf32> -> vector<24x16xf32>
    %150 = vector.extract_strided_slice %130 {offsets = [24, 0], sizes = [24, 16], strides = [1, 1]} : vector<48x16xf32> to vector<24x16xf32>
    %151 = vector.extract_strided_slice %131 {offsets = [24, 0], sizes = [24, 16], strides = [1, 1]} : vector<48x16xf32> to vector<24x16xf32>
    %152 = vector.extract_strided_slice %132 {offsets = [24, 0], sizes = [24, 16], strides = [1, 1]} : vector<48x16xf32> to vector<24x16xf32>
    %cst_65 = arith.constant dense<0.000000e+00> : vector<24x24xf32>
    %153 = tpu.matmul %150, %151, %cst_65 {dimension_numbers = #tpu.dot_dimension_numbers<[1], [1], [0], [0], [0, 0, 1, 0], [], []>} : vector<24x16xf32>, vector<24x16xf32>, vector<24x24xf32> -> vector<24x24xf32>
    %cst_66 = arith.constant 2.500000e-01 : f32
    %154 = vector.broadcast %cst_66 : f32 to vector<24x24xf32>
    %155 = arith.mulf %153, %154 : vector<24x24xf32>
    %156 = arith.addf %155, %5 : vector<24x24xf32>
    %cst_67 = arith.constant dense<0xFF800000> : vector<24xf32>
    %157 = vector.multi_reduction <maximumf>, %156, %cst_67 [1] : vector<24x24xf32> to vector<24xf32>
    %158 = vector.shape_cast %157 : vector<24xf32> to vector<24x1xf32>
    %159 = vector.broadcast %158 : vector<24x1xf32> to vector<24x24xf32>
    %160 = arith.subf %156, %159 : vector<24x24xf32>
    %161 = math.exp %160 : vector<24x24xf32>
    %cst_68 = arith.constant dense<0.000000e+00> : vector<24xf32>
    %162 = vector.multi_reduction <add>, %161, %cst_68 [1] : vector<24x24xf32> to vector<24xf32>
    %163 = vector.shape_cast %162 : vector<24xf32> to vector<24x1xf32>
    %164 = vector.broadcast %163 : vector<24x1xf32> to vector<24x24xf32>
    %165 = arith.divf %161, %164 : vector<24x24xf32>
    %cst_69 = arith.constant dense<0.000000e+00> : vector<24x16xf32>
    %166 = tpu.matmul %165, %152, %cst_69 {dimension_numbers = #tpu.dot_dimension_numbers<[1], [0], [0], [1], [0, 0, 1, 1], [], []>} : vector<24x24xf32>, vector<24x16xf32>, vector<24x16xf32> -> vector<24x16xf32>
    %167 = tpu.concatenate %149, %166 in 0 : vector<24x16xf32>, vector<24x16xf32> -> vector<48x16xf32>
    %168 = tpu.concatenate %129, %167 in 1 : vector<48x16xf32>, vector<48x16xf32> -> vector<48x32xf32>
    %cst_70 = arith.constant dense<0.000000e+00> : vector<48x32xf32>
    %169 = tpu.matmul %168, %43, %cst_70 {dimension_numbers = #tpu.dot_dimension_numbers<[1], [0], [0], [1], [0, 0, 1, 1], [], []>} : vector<48x32xf32>, vector<32x32xf32>, vector<48x32xf32> -> vector<48x32xf32>
    %170 = vector.broadcast %57 : vector<1x32xf32> to vector<48x32xf32>
    %171 = arith.addf %169, %170 : vector<48x32xf32>
    %172 = arith.addf %39, %171 : vector<48x32xf32>
    %cst_71 = arith.constant dense<0.000000e+00> : vector<48xf32>
    %173 = vector.multi_reduction <add>, %172, %cst_71 [1] : vector<48x32xf32> to vector<48xf32>
    %174 = vector.shape_cast %173 : vector<48xf32> to vector<48x1xf32>
    %cst_72 = arith.constant 3.200000e+01 : f32
    %175 = vector.broadcast %cst_72 : f32 to vector<48x1xf32>
    %176 = arith.divf %174, %175 : vector<48x1xf32>
    %177 = vector.broadcast %176 : vector<48x1xf32> to vector<48x32xf32>
    %178 = arith.subf %172, %177 : vector<48x32xf32>
    %179 = arith.mulf %178, %178 : vector<48x32xf32>
    %cst_73 = arith.constant dense<0.000000e+00> : vector<48xf32>
    %180 = vector.multi_reduction <add>, %179, %cst_73 [1] : vector<48x32xf32> to vector<48xf32>
    %181 = vector.shape_cast %180 : vector<48xf32> to vector<48x1xf32>
    %cst_74 = arith.constant 3.200000e+01 : f32
    %182 = vector.broadcast %cst_74 : f32 to vector<48x1xf32>
    %183 = arith.divf %181, %182 : vector<48x1xf32>
    %184 = vector.broadcast %176 : vector<48x1xf32> to vector<48x32xf32>
    %185 = arith.subf %172, %184 : vector<48x32xf32>
    %cst_75 = arith.constant 9.99999974E-6 : f32
    %186 = vector.broadcast %cst_75 : f32 to vector<48x1xf32>
    %187 = arith.addf %183, %186 : vector<48x1xf32>
    %188 = math.rsqrt %187 : vector<48x1xf32>
    %189 = vector.broadcast %188 : vector<48x1xf32> to vector<48x32xf32>
    %190 = arith.mulf %185, %189 : vector<48x32xf32>
    %191 = vector.broadcast %53 : vector<1x32xf32> to vector<48x32xf32>
    %192 = arith.mulf %190, %191 : vector<48x32xf32>
    %193 = vector.broadcast %55 : vector<1x32xf32> to vector<48x32xf32>
    %194 = arith.addf %192, %193 : vector<48x32xf32>
    %cst_76 = arith.constant dense<0.000000e+00> : vector<48x64xf32>
    %195 = tpu.matmul %194, %45, %cst_76 {dimension_numbers = #tpu.dot_dimension_numbers<[1], [0], [0], [1], [0, 0, 1, 1], [], []>} : vector<48x32xf32>, vector<32x64xf32>, vector<48x64xf32> -> vector<48x64xf32>
    %196 = vector.broadcast %61 : vector<1x64xf32> to vector<48x64xf32>
    %197 = arith.addf %195, %196 : vector<48x64xf32>
    %198 = arith.mulf %197, %197 : vector<48x64xf32>
    %199 = arith.mulf %197, %198 : vector<48x64xf32>
    %cst_77 = arith.constant 4.471500e-02 : f32
    %200 = vector.broadcast %cst_77 : f32 to vector<48x64xf32>
    %201 = arith.mulf %200, %199 : vector<48x64xf32>
    %202 = arith.addf %197, %201 : vector<48x64xf32>
    %cst_78 = arith.constant 0.797884583 : f32
    %203 = vector.broadcast %cst_78 : f32 to vector<48x64xf32>
    %204 = arith.mulf %203, %202 : vector<48x64xf32>
    %205 = math.tanh %204 : vector<48x64xf32>
    %cst_79 = arith.constant 1.000000e+00 : f32
    %206 = vector.broadcast %cst_79 : f32 to vector<48x64xf32>
    %207 = arith.addf %206, %205 : vector<48x64xf32>
    %cst_80 = arith.constant 5.000000e-01 : f32
    %208 = vector.broadcast %cst_80 : f32 to vector<48x64xf32>
    %209 = arith.mulf %208, %207 : vector<48x64xf32>
    %210 = arith.mulf %197, %209 : vector<48x64xf32>
    %cst_81 = arith.constant dense<0.000000e+00> : vector<48x32xf32>
    %211 = tpu.matmul %210, %47, %cst_81 {dimension_numbers = #tpu.dot_dimension_numbers<[1], [0], [0], [1], [0, 0, 1, 1], [], []>} : vector<48x64xf32>, vector<64x32xf32>, vector<48x32xf32> -> vector<48x32xf32>
    %212 = vector.broadcast %59 : vector<1x32xf32> to vector<48x32xf32>
    %213 = arith.addf %211, %212 : vector<48x32xf32>
    %214 = arith.addf %172, %213 : vector<48x32xf32>
    %c1_82 = arith.constant 1 : index
    %c0_83 = arith.constant 0 : index
    %c0_84 = arith.constant 0 : index
    %215 = vector.load %arg3[%c1_82, %c0_83, %c0_84] : memref<2x160x96xf32, #tpu.memory_space<vmem>>, vector<1x32x96xf32>
    %216 = vector.shape_cast %215 : vector<1x32x96xf32> to vector<32x96xf32>
    %c1_85 = arith.constant 1 : index
    %c32_86 = arith.constant 32 : index
    %c0_87 = arith.constant 0 : index
    %217 = vector.load %arg3[%c1_85, %c32_86, %c0_87] : memref<2x160x96xf32, #tpu.memory_space<vmem>>, vector<1x32x32xf32>
    %218 = vector.shape_cast %217 : vector<1x32x32xf32> to vector<32x32xf32>
    %c1_88 = arith.constant 1 : index
    %c64_89 = arith.constant 64 : index
    %c0_90 = arith.constant 0 : index
    %219 = vector.load %arg3[%c1_88, %c64_89, %c0_90] : memref<2x160x96xf32, #tpu.memory_space<vmem>>, vector<1x32x64xf32>
    %220 = vector.shape_cast %219 : vector<1x32x64xf32> to vector<32x64xf32>
    %c1_91 = arith.constant 1 : index
    %c96_92 = arith.constant 96 : index
    %c0_93 = arith.constant 0 : index
    %221 = vector.load %arg3[%c1_91, %c96_92, %c0_93] : memref<2x160x96xf32, #tpu.memory_space<vmem>>, vector<1x64x32xf32>
    %222 = vector.shape_cast %221 : vector<1x64x32xf32> to vector<64x32xf32>
    %c1_94 = arith.constant 1 : index
    %c0_95 = arith.constant 0 : index
    %c0_96 = arith.constant 0 : index
    %223 = vector.load %arg4[%c1_94, %c0_95, %c0_96] : memref<2x8x128xf32, #tpu.memory_space<vmem>>, vector<1x1x32xf32>
    %224 = vector.shape_cast %223 : vector<1x1x32xf32> to vector<1x32xf32>
    %c1_97 = arith.constant 1 : index
    %c1_98 = arith.constant 1 : index
    %c0_99 = arith.constant 0 : index
    %225 = vector.load %arg4[%c1_97, %c1_98, %c0_99] : memref<2x8x128xf32, #tpu.memory_space<vmem>>, vector<1x1x32xf32>
    %226 = vector.shape_cast %225 : vector<1x1x32xf32> to vector<1x32xf32>
    %c1_100 = arith.constant 1 : index
    %c2_101 = arith.constant 2 : index
    %c0_102 = arith.constant 0 : index
    %227 = vector.load %arg4[%c1_100, %c2_101, %c0_102] : memref<2x8x128xf32, #tpu.memory_space<vmem>>, vector<1x1x32xf32>
    %228 = vector.shape_cast %227 : vector<1x1x32xf32> to vector<1x32xf32>
    %c1_103 = arith.constant 1 : index
    %c3_104 = arith.constant 3 : index
    %c0_105 = arith.constant 0 : index
    %229 = vector.load %arg4[%c1_103, %c3_104, %c0_105] : memref<2x8x128xf32, #tpu.memory_space<vmem>>, vector<1x1x32xf32>
    %230 = vector.shape_cast %229 : vector<1x1x32xf32> to vector<1x32xf32>
    %c1_106 = arith.constant 1 : index
    %c4_107 = arith.constant 4 : index
    %c0_108 = arith.constant 0 : index
    %231 = vector.load %arg4[%c1_106, %c4_107, %c0_108] : memref<2x8x128xf32, #tpu.memory_space<vmem>>, vector<1x1x32xf32>
    %232 = vector.shape_cast %231 : vector<1x1x32xf32> to vector<1x32xf32>
    %c1_109 = arith.constant 1 : index
    %c5_110 = arith.constant 5 : index
    %c0_111 = arith.constant 0 : index
    %233 = vector.load %arg4[%c1_109, %c5_110, %c0_111] : memref<2x8x128xf32, #tpu.memory_space<vmem>>, vector<1x1x32xf32>
    %234 = vector.shape_cast %233 : vector<1x1x32xf32> to vector<1x32xf32>
    %c1_112 = arith.constant 1 : index
    %c6_113 = arith.constant 6 : index
    %c0_114 = arith.constant 0 : index
    %235 = vector.load %arg4[%c1_112, %c6_113, %c0_114] : memref<2x8x128xf32, #tpu.memory_space<vmem>>, vector<1x1x64xf32>
    %236 = vector.shape_cast %235 : vector<1x1x64xf32> to vector<1x64xf32>
    %c1_115 = arith.constant 1 : index
    %c7_116 = arith.constant 7 : index
    %c0_117 = arith.constant 0 : index
    %237 = vector.load %arg4[%c1_115, %c7_116, %c0_117] : memref<2x8x128xf32, #tpu.memory_space<vmem>>, vector<1x1x96xf32>
    %238 = vector.shape_cast %237 : vector<1x1x96xf32> to vector<1x96xf32>
    %cst_118 = arith.constant dense<0.000000e+00> : vector<48xf32>
    %239 = vector.multi_reduction <add>, %214, %cst_118 [1] : vector<48x32xf32> to vector<48xf32>
    %240 = vector.shape_cast %239 : vector<48xf32> to vector<48x1xf32>
    %cst_119 = arith.constant 3.200000e+01 : f32
    %241 = vector.broadcast %cst_119 : f32 to vector<48x1xf32>
    %242 = arith.divf %240, %241 : vector<48x1xf32>
    %243 = vector.broadcast %242 : vector<48x1xf32> to vector<48x32xf32>
    %244 = arith.subf %214, %243 : vector<48x32xf32>
    %245 = arith.mulf %244, %244 : vector<48x32xf32>
    %cst_120 = arith.constant dense<0.000000e+00> : vector<48xf32>
    %246 = vector.multi_reduction <add>, %245, %cst_120 [1] : vector<48x32xf32> to vector<48xf32>
    %247 = vector.shape_cast %246 : vector<48xf32> to vector<48x1xf32>
    %cst_121 = arith.constant 3.200000e+01 : f32
    %248 = vector.broadcast %cst_121 : f32 to vector<48x1xf32>
    %249 = arith.divf %247, %248 : vector<48x1xf32>
    %250 = vector.broadcast %242 : vector<48x1xf32> to vector<48x32xf32>
    %251 = arith.subf %214, %250 : vector<48x32xf32>
    %cst_122 = arith.constant 9.99999974E-6 : f32
    %252 = vector.broadcast %cst_122 : f32 to vector<48x1xf32>
    %253 = arith.addf %249, %252 : vector<48x1xf32>
    %254 = math.rsqrt %253 : vector<48x1xf32>
    %255 = vector.broadcast %254 : vector<48x1xf32> to vector<48x32xf32>
    %256 = arith.mulf %251, %255 : vector<48x32xf32>
    %257 = vector.broadcast %224 : vector<1x32xf32> to vector<48x32xf32>
    %258 = arith.mulf %256, %257 : vector<48x32xf32>
    %259 = vector.broadcast %226 : vector<1x32xf32> to vector<48x32xf32>
    %260 = arith.addf %258, %259 : vector<48x32xf32>
    %cst_123 = arith.constant dense<0.000000e+00> : vector<48x96xf32>
    %261 = tpu.matmul %260, %216, %cst_123 {dimension_numbers = #tpu.dot_dimension_numbers<[1], [0], [0], [1], [0, 0, 1, 1], [], []>} : vector<48x32xf32>, vector<32x96xf32>, vector<48x96xf32> -> vector<48x96xf32>
    %262 = vector.broadcast %238 : vector<1x96xf32> to vector<48x96xf32>
    %263 = arith.addf %261, %262 : vector<48x96xf32>
    %264 = vector.extract_strided_slice %263 {offsets = [0, 0], sizes = [48, 32], strides = [1, 1]} : vector<48x96xf32> to vector<48x32xf32>
    %265 = vector.extract_strided_slice %263 {offsets = [0, 32], sizes = [48, 32], strides = [1, 1]} : vector<48x96xf32> to vector<48x32xf32>
    %266 = vector.extract_strided_slice %263 {offsets = [0, 64], sizes = [48, 32], strides = [1, 1]} : vector<48x96xf32> to vector<48x32xf32>
    %267 = vector.extract_strided_slice %264 {offsets = [0, 0], sizes = [48, 16], strides = [1, 1]} : vector<48x32xf32> to vector<48x16xf32>
    %268 = vector.extract_strided_slice %265 {offsets = [0, 0], sizes = [48, 16], strides = [1, 1]} : vector<48x32xf32> to vector<48x16xf32>
    %269 = vector.extract_strided_slice %266 {offsets = [0, 0], sizes = [48, 16], strides = [1, 1]} : vector<48x32xf32> to vector<48x16xf32>
    %270 = vector.extract_strided_slice %267 {offsets = [0, 0], sizes = [24, 16], strides = [1, 1]} : vector<48x16xf32> to vector<24x16xf32>
    %271 = vector.extract_strided_slice %268 {offsets = [0, 0], sizes = [24, 16], strides = [1, 1]} : vector<48x16xf32> to vector<24x16xf32>
    %272 = vector.extract_strided_slice %269 {offsets = [0, 0], sizes = [24, 16], strides = [1, 1]} : vector<48x16xf32> to vector<24x16xf32>
    %cst_124 = arith.constant dense<0.000000e+00> : vector<24x24xf32>
    %273 = tpu.matmul %270, %271, %cst_124 {dimension_numbers = #tpu.dot_dimension_numbers<[1], [1], [0], [0], [0, 0, 1, 0], [], []>} : vector<24x16xf32>, vector<24x16xf32>, vector<24x24xf32> -> vector<24x24xf32>
    %cst_125 = arith.constant 2.500000e-01 : f32
    %274 = vector.broadcast %cst_125 : f32 to vector<24x24xf32>
    %275 = arith.mulf %273, %274 : vector<24x24xf32>
    %276 = arith.addf %275, %5 : vector<24x24xf32>
    %cst_126 = arith.constant dense<0xFF800000> : vector<24xf32>
    %277 = vector.multi_reduction <maximumf>, %276, %cst_126 [1] : vector<24x24xf32> to vector<24xf32>
    %278 = vector.shape_cast %277 : vector<24xf32> to vector<24x1xf32>
    %279 = vector.broadcast %278 : vector<24x1xf32> to vector<24x24xf32>
    %280 = arith.subf %276, %279 : vector<24x24xf32>
    %281 = math.exp %280 : vector<24x24xf32>
    %cst_127 = arith.constant dense<0.000000e+00> : vector<24xf32>
    %282 = vector.multi_reduction <add>, %281, %cst_127 [1] : vector<24x24xf32> to vector<24xf32>
    %283 = vector.shape_cast %282 : vector<24xf32> to vector<24x1xf32>
    %284 = vector.broadcast %283 : vector<24x1xf32> to vector<24x24xf32>
    %285 = arith.divf %281, %284 : vector<24x24xf32>
    %cst_128 = arith.constant dense<0.000000e+00> : vector<24x16xf32>
    %286 = tpu.matmul %285, %272, %cst_128 {dimension_numbers = #tpu.dot_dimension_numbers<[1], [0], [0], [1], [0, 0, 1, 1], [], []>} : vector<24x24xf32>, vector<24x16xf32>, vector<24x16xf32> -> vector<24x16xf32>
    %287 = vector.extract_strided_slice %267 {offsets = [24, 0], sizes = [24, 16], strides = [1, 1]} : vector<48x16xf32> to vector<24x16xf32>
    %288 = vector.extract_strided_slice %268 {offsets = [24, 0], sizes = [24, 16], strides = [1, 1]} : vector<48x16xf32> to vector<24x16xf32>
    %289 = vector.extract_strided_slice %269 {offsets = [24, 0], sizes = [24, 16], strides = [1, 1]} : vector<48x16xf32> to vector<24x16xf32>
    %cst_129 = arith.constant dense<0.000000e+00> : vector<24x24xf32>
    %290 = tpu.matmul %287, %288, %cst_129 {dimension_numbers = #tpu.dot_dimension_numbers<[1], [1], [0], [0], [0, 0, 1, 0], [], []>} : vector<24x16xf32>, vector<24x16xf32>, vector<24x24xf32> -> vector<24x24xf32>
    %cst_130 = arith.constant 2.500000e-01 : f32
    %291 = vector.broadcast %cst_130 : f32 to vector<24x24xf32>
    %292 = arith.mulf %290, %291 : vector<24x24xf32>
    %293 = arith.addf %292, %5 : vector<24x24xf32>
    %cst_131 = arith.constant dense<0xFF800000> : vector<24xf32>
    %294 = vector.multi_reduction <maximumf>, %293, %cst_131 [1] : vector<24x24xf32> to vector<24xf32>
    %295 = vector.shape_cast %294 : vector<24xf32> to vector<24x1xf32>
    %296 = vector.broadcast %295 : vector<24x1xf32> to vector<24x24xf32>
    %297 = arith.subf %293, %296 : vector<24x24xf32>
    %298 = math.exp %297 : vector<24x24xf32>
    %cst_132 = arith.constant dense<0.000000e+00> : vector<24xf32>
    %299 = vector.multi_reduction <add>, %298, %cst_132 [1] : vector<24x24xf32> to vector<24xf32>
    %300 = vector.shape_cast %299 : vector<24xf32> to vector<24x1xf32>
    %301 = vector.broadcast %300 : vector<24x1xf32> to vector<24x24xf32>
    %302 = arith.divf %298, %301 : vector<24x24xf32>
    %cst_133 = arith.constant dense<0.000000e+00> : vector<24x16xf32>
    %303 = tpu.matmul %302, %289, %cst_133 {dimension_numbers = #tpu.dot_dimension_numbers<[1], [0], [0], [1], [0, 0, 1, 1], [], []>} : vector<24x24xf32>, vector<24x16xf32>, vector<24x16xf32> -> vector<24x16xf32>
    %304 = tpu.concatenate %286, %303 in 0 : vector<24x16xf32>, vector<24x16xf32> -> vector<48x16xf32>
    %305 = vector.extract_strided_slice %264 {offsets = [0, 16], sizes = [48, 16], strides = [1, 1]} : vector<48x32xf32> to vector<48x16xf32>
    %306 = vector.extract_strided_slice %265 {offsets = [0, 16], sizes = [48, 16], strides = [1, 1]} : vector<48x32xf32> to vector<48x16xf32>
    %307 = vector.extract_strided_slice %266 {offsets = [0, 16], sizes = [48, 16], strides = [1, 1]} : vector<48x32xf32> to vector<48x16xf32>
    %308 = vector.extract_strided_slice %305 {offsets = [0, 0], sizes = [24, 16], strides = [1, 1]} : vector<48x16xf32> to vector<24x16xf32>
    %309 = vector.extract_strided_slice %306 {offsets = [0, 0], sizes = [24, 16], strides = [1, 1]} : vector<48x16xf32> to vector<24x16xf32>
    %310 = vector.extract_strided_slice %307 {offsets = [0, 0], sizes = [24, 16], strides = [1, 1]} : vector<48x16xf32> to vector<24x16xf32>
    %cst_134 = arith.constant dense<0.000000e+00> : vector<24x24xf32>
    %311 = tpu.matmul %308, %309, %cst_134 {dimension_numbers = #tpu.dot_dimension_numbers<[1], [1], [0], [0], [0, 0, 1, 0], [], []>} : vector<24x16xf32>, vector<24x16xf32>, vector<24x24xf32> -> vector<24x24xf32>
    %cst_135 = arith.constant 2.500000e-01 : f32
    %312 = vector.broadcast %cst_135 : f32 to vector<24x24xf32>
    %313 = arith.mulf %311, %312 : vector<24x24xf32>
    %314 = arith.addf %313, %5 : vector<24x24xf32>
    %cst_136 = arith.constant dense<0xFF800000> : vector<24xf32>
    %315 = vector.multi_reduction <maximumf>, %314, %cst_136 [1] : vector<24x24xf32> to vector<24xf32>
    %316 = vector.shape_cast %315 : vector<24xf32> to vector<24x1xf32>
    %317 = vector.broadcast %316 : vector<24x1xf32> to vector<24x24xf32>
    %318 = arith.subf %314, %317 : vector<24x24xf32>
    %319 = math.exp %318 : vector<24x24xf32>
    %cst_137 = arith.constant dense<0.000000e+00> : vector<24xf32>
    %320 = vector.multi_reduction <add>, %319, %cst_137 [1] : vector<24x24xf32> to vector<24xf32>
    %321 = vector.shape_cast %320 : vector<24xf32> to vector<24x1xf32>
    %322 = vector.broadcast %321 : vector<24x1xf32> to vector<24x24xf32>
    %323 = arith.divf %319, %322 : vector<24x24xf32>
    %cst_138 = arith.constant dense<0.000000e+00> : vector<24x16xf32>
    %324 = tpu.matmul %323, %310, %cst_138 {dimension_numbers = #tpu.dot_dimension_numbers<[1], [0], [0], [1], [0, 0, 1, 1], [], []>} : vector<24x24xf32>, vector<24x16xf32>, vector<24x16xf32> -> vector<24x16xf32>
    %325 = vector.extract_strided_slice %305 {offsets = [24, 0], sizes = [24, 16], strides = [1, 1]} : vector<48x16xf32> to vector<24x16xf32>
    %326 = vector.extract_strided_slice %306 {offsets = [24, 0], sizes = [24, 16], strides = [1, 1]} : vector<48x16xf32> to vector<24x16xf32>
    %327 = vector.extract_strided_slice %307 {offsets = [24, 0], sizes = [24, 16], strides = [1, 1]} : vector<48x16xf32> to vector<24x16xf32>
    %cst_139 = arith.constant dense<0.000000e+00> : vector<24x24xf32>
    %328 = tpu.matmul %325, %326, %cst_139 {dimension_numbers = #tpu.dot_dimension_numbers<[1], [1], [0], [0], [0, 0, 1, 0], [], []>} : vector<24x16xf32>, vector<24x16xf32>, vector<24x24xf32> -> vector<24x24xf32>
    %cst_140 = arith.constant 2.500000e-01 : f32
    %329 = vector.broadcast %cst_140 : f32 to vector<24x24xf32>
    %330 = arith.mulf %328, %329 : vector<24x24xf32>
    %331 = arith.addf %330, %5 : vector<24x24xf32>
    %cst_141 = arith.constant dense<0xFF800000> : vector<24xf32>
    %332 = vector.multi_reduction <maximumf>, %331, %cst_141 [1] : vector<24x24xf32> to vector<24xf32>
    %333 = vector.shape_cast %332 : vector<24xf32> to vector<24x1xf32>
    %334 = vector.broadcast %333 : vector<24x1xf32> to vector<24x24xf32>
    %335 = arith.subf %331, %334 : vector<24x24xf32>
    %336 = math.exp %335 : vector<24x24xf32>
    %cst_142 = arith.constant dense<0.000000e+00> : vector<24xf32>
    %337 = vector.multi_reduction <add>, %336, %cst_142 [1] : vector<24x24xf32> to vector<24xf32>
    %338 = vector.shape_cast %337 : vector<24xf32> to vector<24x1xf32>
    %339 = vector.broadcast %338 : vector<24x1xf32> to vector<24x24xf32>
    %340 = arith.divf %336, %339 : vector<24x24xf32>
    %cst_143 = arith.constant dense<0.000000e+00> : vector<24x16xf32>
    %341 = tpu.matmul %340, %327, %cst_143 {dimension_numbers = #tpu.dot_dimension_numbers<[1], [0], [0], [1], [0, 0, 1, 1], [], []>} : vector<24x24xf32>, vector<24x16xf32>, vector<24x16xf32> -> vector<24x16xf32>
    %342 = tpu.concatenate %324, %341 in 0 : vector<24x16xf32>, vector<24x16xf32> -> vector<48x16xf32>
    %343 = tpu.concatenate %304, %342 in 1 : vector<48x16xf32>, vector<48x16xf32> -> vector<48x32xf32>
    %cst_144 = arith.constant dense<0.000000e+00> : vector<48x32xf32>
    %344 = tpu.matmul %343, %218, %cst_144 {dimension_numbers = #tpu.dot_dimension_numbers<[1], [0], [0], [1], [0, 0, 1, 1], [], []>} : vector<48x32xf32>, vector<32x32xf32>, vector<48x32xf32> -> vector<48x32xf32>
    %345 = vector.broadcast %232 : vector<1x32xf32> to vector<48x32xf32>
    %346 = arith.addf %344, %345 : vector<48x32xf32>
    %347 = arith.addf %214, %346 : vector<48x32xf32>
    %cst_145 = arith.constant dense<0.000000e+00> : vector<48xf32>
    %348 = vector.multi_reduction <add>, %347, %cst_145 [1] : vector<48x32xf32> to vector<48xf32>
    %349 = vector.shape_cast %348 : vector<48xf32> to vector<48x1xf32>
    %cst_146 = arith.constant 3.200000e+01 : f32
    %350 = vector.broadcast %cst_146 : f32 to vector<48x1xf32>
    %351 = arith.divf %349, %350 : vector<48x1xf32>
    %352 = vector.broadcast %351 : vector<48x1xf32> to vector<48x32xf32>
    %353 = arith.subf %347, %352 : vector<48x32xf32>
    %354 = arith.mulf %353, %353 : vector<48x32xf32>
    %cst_147 = arith.constant dense<0.000000e+00> : vector<48xf32>
    %355 = vector.multi_reduction <add>, %354, %cst_147 [1] : vector<48x32xf32> to vector<48xf32>
    %356 = vector.shape_cast %355 : vector<48xf32> to vector<48x1xf32>
    %cst_148 = arith.constant 3.200000e+01 : f32
    %357 = vector.broadcast %cst_148 : f32 to vector<48x1xf32>
    %358 = arith.divf %356, %357 : vector<48x1xf32>
    %359 = vector.broadcast %351 : vector<48x1xf32> to vector<48x32xf32>
    %360 = arith.subf %347, %359 : vector<48x32xf32>
    %cst_149 = arith.constant 9.99999974E-6 : f32
    %361 = vector.broadcast %cst_149 : f32 to vector<48x1xf32>
    %362 = arith.addf %358, %361 : vector<48x1xf32>
    %363 = math.rsqrt %362 : vector<48x1xf32>
    %364 = vector.broadcast %363 : vector<48x1xf32> to vector<48x32xf32>
    %365 = arith.mulf %360, %364 : vector<48x32xf32>
    %366 = vector.broadcast %228 : vector<1x32xf32> to vector<48x32xf32>
    %367 = arith.mulf %365, %366 : vector<48x32xf32>
    %368 = vector.broadcast %230 : vector<1x32xf32> to vector<48x32xf32>
    %369 = arith.addf %367, %368 : vector<48x32xf32>
    %cst_150 = arith.constant dense<0.000000e+00> : vector<48x64xf32>
    %370 = tpu.matmul %369, %220, %cst_150 {dimension_numbers = #tpu.dot_dimension_numbers<[1], [0], [0], [1], [0, 0, 1, 1], [], []>} : vector<48x32xf32>, vector<32x64xf32>, vector<48x64xf32> -> vector<48x64xf32>
    %371 = vector.broadcast %236 : vector<1x64xf32> to vector<48x64xf32>
    %372 = arith.addf %370, %371 : vector<48x64xf32>
    %373 = arith.mulf %372, %372 : vector<48x64xf32>
    %374 = arith.mulf %372, %373 : vector<48x64xf32>
    %cst_151 = arith.constant 4.471500e-02 : f32
    %375 = vector.broadcast %cst_151 : f32 to vector<48x64xf32>
    %376 = arith.mulf %375, %374 : vector<48x64xf32>
    %377 = arith.addf %372, %376 : vector<48x64xf32>
    %cst_152 = arith.constant 0.797884583 : f32
    %378 = vector.broadcast %cst_152 : f32 to vector<48x64xf32>
    %379 = arith.mulf %378, %377 : vector<48x64xf32>
    %380 = math.tanh %379 : vector<48x64xf32>
    %cst_153 = arith.constant 1.000000e+00 : f32
    %381 = vector.broadcast %cst_153 : f32 to vector<48x64xf32>
    %382 = arith.addf %381, %380 : vector<48x64xf32>
    %cst_154 = arith.constant 5.000000e-01 : f32
    %383 = vector.broadcast %cst_154 : f32 to vector<48x64xf32>
    %384 = arith.mulf %383, %382 : vector<48x64xf32>
    %385 = arith.mulf %372, %384 : vector<48x64xf32>
    %cst_155 = arith.constant dense<0.000000e+00> : vector<48x32xf32>
    %386 = tpu.matmul %385, %222, %cst_155 {dimension_numbers = #tpu.dot_dimension_numbers<[1], [0], [0], [1], [0, 0, 1, 1], [], []>} : vector<48x64xf32>, vector<64x32xf32>, vector<48x32xf32> -> vector<48x32xf32>
    %387 = vector.broadcast %234 : vector<1x32xf32> to vector<48x32xf32>
    %388 = arith.addf %386, %387 : vector<48x32xf32>
    %389 = arith.addf %347, %388 : vector<48x32xf32>
    %390 = vector.extract_strided_slice %389 {offsets = [0, 0], sizes = [8, 32], strides = [1, 1]} : vector<48x32xf32> to vector<8x32xf32>
    %391 = vector.extract_strided_slice %389 {offsets = [24, 0], sizes = [8, 32], strides = [1, 1]} : vector<48x32xf32> to vector<8x32xf32>
    %392 = tpu.concatenate %390, %391 in 0 : vector<8x32xf32>, vector<8x32xf32> -> vector<16x32xf32>
    %c0_156 = arith.constant 0 : index
    %c0_157 = arith.constant 0 : index
    %393 = vector.load %arg5[%c0_156, %c0_157] : memref<136x32xf32, #tpu.memory_space<vmem>>, vector<32x32xf32>
    %c128 = arith.constant 128 : index
    %c0_158 = arith.constant 0 : index
    %394 = vector.load %arg5[%c128, %c0_158] : memref<136x32xf32, #tpu.memory_space<vmem>>, vector<1x32xf32>
    %cst_159 = arith.constant dense<0.000000e+00> : vector<16x32xf32>
    %395 = tpu.matmul %392, %393, %cst_159 {dimension_numbers = #tpu.dot_dimension_numbers<[1], [0], [0], [1], [0, 0, 1, 1], [], []>} : vector<16x32xf32>, vector<32x32xf32>, vector<16x32xf32> -> vector<16x32xf32>
    %396 = vector.broadcast %394 : vector<1x32xf32> to vector<16x32xf32>
    %397 = arith.addf %395, %396 : vector<16x32xf32>
    %cst_160 = arith.constant 0.000000e+00 : f32
    %398 = vector.broadcast %cst_160 : f32 to vector<16x32xf32>
    %399 = arith.maximumf %397, %398 : vector<16x32xf32>
    %400 = arith.addf %392, %399 : vector<16x32xf32>
    %c32_161 = arith.constant 32 : index
    %c0_162 = arith.constant 0 : index
    %401 = vector.load %arg5[%c32_161, %c0_162] : memref<136x32xf32, #tpu.memory_space<vmem>>, vector<32x32xf32>
    %c129 = arith.constant 129 : index
    %c0_163 = arith.constant 0 : index
    %402 = vector.load %arg5[%c129, %c0_163] : memref<136x32xf32, #tpu.memory_space<vmem>>, vector<1x32xf32>
    %cst_164 = arith.constant dense<0.000000e+00> : vector<16x32xf32>
    %403 = tpu.matmul %400, %401, %cst_164 {dimension_numbers = #tpu.dot_dimension_numbers<[1], [0], [0], [1], [0, 0, 1, 1], [], []>} : vector<16x32xf32>, vector<32x32xf32>, vector<16x32xf32> -> vector<16x32xf32>
    %404 = vector.broadcast %402 : vector<1x32xf32> to vector<16x32xf32>
    %405 = arith.addf %403, %404 : vector<16x32xf32>
    %cst_165 = arith.constant 0.000000e+00 : f32
    %406 = vector.broadcast %cst_165 : f32 to vector<16x32xf32>
    %407 = arith.maximumf %405, %406 : vector<16x32xf32>
    %408 = arith.addf %400, %407 : vector<16x32xf32>
    %c64_166 = arith.constant 64 : index
    %c0_167 = arith.constant 0 : index
    %409 = vector.load %arg5[%c64_166, %c0_167] : memref<136x32xf32, #tpu.memory_space<vmem>>, vector<32x32xf32>
    %c130 = arith.constant 130 : index
    %c0_168 = arith.constant 0 : index
    %410 = vector.load %arg5[%c130, %c0_168] : memref<136x32xf32, #tpu.memory_space<vmem>>, vector<1x32xf32>
    %cst_169 = arith.constant dense<0.000000e+00> : vector<16x32xf32>
    %411 = tpu.matmul %408, %409, %cst_169 {dimension_numbers = #tpu.dot_dimension_numbers<[1], [0], [0], [1], [0, 0, 1, 1], [], []>} : vector<16x32xf32>, vector<32x32xf32>, vector<16x32xf32> -> vector<16x32xf32>
    %412 = vector.broadcast %410 : vector<1x32xf32> to vector<16x32xf32>
    %413 = arith.addf %411, %412 : vector<16x32xf32>
    %cst_170 = arith.constant 0.000000e+00 : f32
    %414 = vector.broadcast %cst_170 : f32 to vector<16x32xf32>
    %415 = arith.maximumf %413, %414 : vector<16x32xf32>
    %416 = arith.addf %408, %415 : vector<16x32xf32>
    %c96_171 = arith.constant 96 : index
    %c0_172 = arith.constant 0 : index
    %417 = vector.load %arg5[%c96_171, %c0_172] : memref<136x32xf32, #tpu.memory_space<vmem>>, vector<32x32xf32>
    %c131 = arith.constant 131 : index
    %c0_173 = arith.constant 0 : index
    %418 = vector.load %arg5[%c131, %c0_173] : memref<136x32xf32, #tpu.memory_space<vmem>>, vector<1x32xf32>
    %cst_174 = arith.constant dense<0.000000e+00> : vector<16x32xf32>
    %419 = tpu.matmul %416, %417, %cst_174 {dimension_numbers = #tpu.dot_dimension_numbers<[1], [0], [0], [1], [0, 0, 1, 1], [], []>} : vector<16x32xf32>, vector<32x32xf32>, vector<16x32xf32> -> vector<16x32xf32>
    %420 = vector.broadcast %418 : vector<1x32xf32> to vector<16x32xf32>
    %421 = arith.addf %419, %420 : vector<16x32xf32>
    %cst_175 = arith.constant 0.000000e+00 : f32
    %422 = vector.broadcast %cst_175 : f32 to vector<16x32xf32>
    %423 = arith.maximumf %421, %422 : vector<16x32xf32>
    %424 = arith.addf %416, %423 : vector<16x32xf32>
    %c132 = arith.constant 132 : index
    %c0_176 = arith.constant 0 : index
    %425 = vector.load %arg5[%c132, %c0_176] : memref<136x32xf32, #tpu.memory_space<vmem>>, vector<1x32xf32>
    %c133 = arith.constant 133 : index
    %c0_177 = arith.constant 0 : index
    %426 = vector.load %arg5[%c133, %c0_177] : memref<136x32xf32, #tpu.memory_space<vmem>>, vector<1x1xf32>
    %427 = vector.broadcast %425 : vector<1x32xf32> to vector<16x32xf32>
    %428 = arith.mulf %424, %427 : vector<16x32xf32>
    %cst_178 = arith.constant dense<0.000000e+00> : vector<16xf32>
    %429 = vector.multi_reduction <add>, %428, %cst_178 [1] : vector<16x32xf32> to vector<16xf32>
    %430 = vector.shape_cast %429 : vector<16xf32> to vector<16x1xf32>
    %431 = vector.broadcast %426 : vector<1x1xf32> to vector<16x1xf32>
    %432 = arith.addf %430, %431 : vector<16x1xf32>
    %c0_179 = arith.constant 0 : index
    %c0_180 = arith.constant 0 : index
    %433 = vector.load %arg6[%c0_179, %c0_180] : memref<16x1xf32, #tpu.memory_space<vmem>>, vector<16x1xf32>
    tpu.vector_store %arg6[%c0_179, %c0_180], %432 {strides = array<i32>} : memref<16x1xf32, #tpu.memory_space<vmem>>, vector<16x1xf32>,
    return
  }
}

</mosaic_0001>

<bundles_post_ra>
// kernel: vit_forward.1
= control target key start
LH: loop header
LB: loop body
LE: loop exit
PB: predicated region body
PF: predicated region fallthrough
CT: control target
= control target key end

     0   :  { %vm50_vm0 = vcmask 523264   ;;  %s5255_s28 = smov 96   ;;  %vm331_vm1 = vcmask 261120   ;;  %vm5257_vm2 = vmmov 0   ;;  %s5258_s7 = smov 80   ;;  %vm557_vm3 = vcmask 130048   ;;  %s6643_s0 = inlined_call_operand.vmem [shape: f32[48,64], index: 0, kind: input, shape index: {}]   ;;  %s6644_s1 = inlined_call_operand.vmem [shape: f32[72,64], index: 1, kind: input, shape index: {}]   ;;  %s6645_s2 = inlined_call_operand.vmem [shape: f32[48,64], index: 2, kind: input, shape index: {}]   ;;  %s6646_s3 = inlined_call_operand.vmem [shape: f32[2,160,96], index: 3, kind: input, shape index: {}]   ;;  %s6647_s4 = inlined_call_operand.vmem [shape: f32[2,8,128], index: 4, kind: input, shape index: {}]   ;;  %s6648_s5 = inlined_call_operand.vmem [shape: f32[136,32], index: 5, kind: input, shape index: {}]   ;;  %s6649_s6 = inlined_call_operand.vmem [shape: f32[16,1], index: 6, kind: output, shape index: {}]  }
   0x1   :  { %v44_v0 = vld [vmem:[%s6643_s0] sm:$0xff]  ;;  %v46_v1 = vld [vmem:[%s6643_s0 + $0x10] sm:$0xff]  ;;  %v45_v2 = vld [vmem:[%s6643_s0 + $0x8] sm:$0xff]  ;;  %s5259_s8 = smov 112   ;;  %vm656_vm5 = vcmask 195584   ;;  %s5262_s9 = smov 48  }
   0x2   :  { %v51_v3 = vsel %vm50_vm0, %v44_v0, 0.0  ;;  %v57_v4 = vsel %vm50_vm0, %v46_v1, 0.0  ;;  %v47_v5 = vld [vmem:[%s6643_s0 + $0x18] sm:$0xff]  ;;  %v54_v6 = vsel %vm50_vm0, %v45_v2, 0.0  ;;  %v48_v8 = vld [vmem:[%s6643_s0 + $0x20] sm:$0xff]  ;;  %v49_v9 = vld [vmem:[%s6643_s0 + $0x28] sm:$0xff] }
   0x3   :  { %52 = vadd.xlane.f32.xlu0 %v51_v3  ;;  %58 = vadd.xlane.f32.xlu1 %v57_v4  ;;  %v60_v7 = vsel %vm50_vm0, %v47_v5, 0.0  ;;  %v63_v10 = vsel %vm50_vm0, %v48_v8, 0.0  ;;  %v66_v11 = vsel %vm50_vm0, %v49_v9, 0.0  ;;  %v34_v42 = vld [vmem:[%s6644_s1 + $0x38] sm:$0xff]  ;;  %v33_v43 = vld [vmem:[%s6644_s1 + $0x30] sm:$0xff]  ;;  %v32_v44 = vld [vmem:[%s6644_s1 + $0x28] sm:$0xff] }
   0x4   :  { %4605 = vmatprep.subr.mxu0 %v34_v42  ;;  %v31_v45 = vld [vmem:[%s6644_s1 + $0x20] sm:$0xff]  ;;  %v30_v46 = vld [vmem:[%s6644_s1 + $0x18] sm:$0xff]  ;;  %v29_v47 = vld [vmem:[%s6644_s1 + $0x10] sm:$0xff]  ;;  %s5260_s0 = smov 64   ;;  %vm4189_vm6 = vcmask 7168  }
   0x5   :  { %4606 = vmatpush3.msra.mxu0 %v34_v42  ;;  %v28_v48 = vld [vmem:[%s6644_s1 + $0x8] sm:$0xff]  ;;  %v27_v49 = vld [vmem:[%s6644_s1] sm:$0xff]  ;;  %v5394_v52 = vld [vmem:[%s6645_s2 + $0x10] sm:$0xff] }
   0x6   :  { %4607 = vmatprep.subr.mxu0 %v33_v43  ;;  %v5380_v50 = vld [vmem:[%s6645_s2 + $0x8] sm:$0xff]  ;;  %v5385_v51 = vld [vmem:[%s6645_s2] sm:$0xff]  ;;  %v5408_v54 = vld [vmem:[%s6645_s2 + $0x18] sm:$0xff] }
   0x7   :  { %55 = vadd.xlane.f32.xlu0 %v54_v6  ;;  %61 = vadd.xlane.f32.xlu1 %v60_v7  ;;  %v5399_v53 = vld [vmem:[%s6645_s2 + $0x20] sm:$0xff]  ;;  %v5415_v55 = vld [vmem:[%s6645_s2 + $0x28] sm:$0xff] }
   0x8   :  { %4608 = vmatpush3.msra.mxu0 %v33_v43 }
   0x9   :  { %4609 = vmatprep.subr.mxu0 %v32_v44 }
   0xa   :  { %4610 = vmatpush3.msra.mxu0 %v32_v44 }
   0xb   :  { %64 = vadd.xlane.f32.xlu0 %v63_v10  ;;  %67 = vadd.xlane.f32.xlu1 %v66_v11  ;;  %v4196_v11 = vld [vmem:[%s6644_s1 + $0x40] ss:$0 sm:$0xff] }
   0xc   :  { %4611 = vmatprep.subr.mxu0 %v31_v45 }
   0xd   :  { %4612 = vmatpush3.msra.mxu0 %v31_v45 }
   0xe   :  { %4613 = vmatprep.subr.mxu0 %v30_v46 }
   0xf   :  { %4614 = vmatpush3.msra.mxu0 %v30_v46 }
  0x10   :  { %4615 = vmatprep.subr.mxu0 %v29_v47 }
  0x11   :  { %4616 = vmatpush3.msra.mxu0 %v29_v47 }
  0x12   :  { %4617 = vmatprep.subr.mxu0 %v28_v48 }
  0x13   :  { %4618 = vmatpush3.msra.mxu0 %v28_v48 }
  0x14   :  { %4619 = vmatprep.subr.mxu0 %v27_v49 }
  0x15   :  { %4620 = vmatpush3.msra.mxu0 %v27_v49 }
  0x8c   :  { %v53_v12 = vpop.xlane.xlu0 %52  ;;  %v59_v13 = vpop.xlane.xlu1 %58 }
  0x8d   :  { %v70_v14 = vmul.f32 0.015625, %v53_v12  ;;  %v72_v15 = vmul.f32 0.015625, %v59_v13  ;;  %v4197_v13 = vld [vmem:[%s6644_s1 + $0x41] ss:$0 sm:$0xff] }
  0x8f   :  { %v5323_v16 = vsub.f32 %v44_v0, %v70_v14  ;;  %v5325_v17 = vsub.f32 %v46_v1, %v72_v15 }
  0x90   :  { %v56_v18 = vpop.xlane.xlu0 %55  ;;  %v62_v19 = vpop.xlane.xlu1 %61 }
  0x91   :  { %v71_v20 = vmul.f32 0.015625, %v56_v18  ;;  %v73_v21 = vmul.f32 0.015625, %v62_v19  ;;  %v82_v22 = vmul.f32 %v5323_v16, %v5323_v16  ;;  %v84_v23 = vmul.f32 %v5325_v17, %v5325_v17 }
  0x93   :  { %v5331_v24 = vsub.f32 %v45_v2, %v71_v20  ;;  %v5333_v25 = vsub.f32 %v47_v5, %v73_v21  ;;  %v88_v26 = vsel %vm50_vm0, %v82_v22, 0.0  ;;  %v94_v29 = vsel %vm50_vm0, %v84_v23, 0.0 }
  0x94   :  { %89 = vadd.xlane.f32.xlu0 %v88_v26  ;;  %v65_v27 = vpop.xlane.xlu0 %64  ;;  %v68_v28 = vpop.xlane.xlu1 %67 }
  0x95   :  { %v74_v30 = vmul.f32 0.015625, %v65_v27  ;;  %v75_v31 = vmul.f32 0.015625, %v68_v28  ;;  %v83_v32 = vmul.f32 %v5331_v24, %v5331_v24  ;;  %v85_v33 = vmul.f32 %v5333_v25, %v5333_v25 }
  0x97   :  { %v5341_v34 = vsub.f32 %v48_v8, %v74_v30  ;;  %v5343_v35 = vsub.f32 %v49_v9, %v75_v31  ;;  %v91_v36 = vsel %vm50_vm0, %v83_v32, 0.0  ;;  %v97_v37 = vsel %vm50_vm0, %v85_v33, 0.0 }
  0x98   :  { %95 = vadd.xlane.f32.xlu0 %v94_v29  ;;  %92 = vadd.xlane.f32.xlu1 %v91_v36 }
  0x99   :  { %v86_v38 = vmul.f32 %v5341_v34, %v5341_v34  ;;  %v87_v39 = vmul.f32 %v5343_v35, %v5343_v35 }
  0x9b   :  { %v100_v40 = vsel %vm50_vm0, %v86_v38, 0.0  ;;  %v103_v41 = vsel %vm50_vm0, %v87_v39, 0.0  ;;  %v4198_v39 = vld [vmem:[%s6644_s1 + $0x42] ss:$0 sm:$0xff]  ;;  %s5263_s1 = smov 16  }
  0x9c   :  { %98 = vadd.xlane.f32.xlu1 %v97_v37  ;;  %101 = vadd.xlane.f32.xlu0 %v100_v40 }
  0xa0   :  { %104 = vadd.xlane.f32.xlu1 %v103_v41 }
  0xb1   :  { %275 = vrot.lane.b32.xlu1 %v5380_v50, %s5255_s28 }
  0xb2   :  { %273 = vrot.lane.b32.xlu0 %v5385_v51, %s5255_s28 }
  0xb5   :  { %277 = vrot.lane.b32.xlu1 %v5394_v52, %s5255_s28 }
  0xb6   :  { %281 = vrot.lane.b32.xlu0 %v5399_v53, %s5255_s28 }
  0xb9   :  { %279 = vrot.lane.b32.xlu1 %v5408_v54, %s5255_s28 }
  0xbd   :  { %283 = vrot.lane.b32.xlu1 %v5415_v55, %s5255_s28 }
 0x11d   :  { %v90_v56 = vpop.xlane.xlu0 %89 }
 0x11e   :  { %v106_v57 = vmul.f32 0.015625, %v90_v56 }
 0x120   :  { %v112_v58 = vadd.f32 1e-05, %v106_v57 }
 0x121   :  { %v93_v59 = vpop.xlane.xlu1 %92  ;;  %v96_v60 = vpop.xlane.xlu0 %95 }
 0x122   :  { %5075 = vrsqrt.f32 %v112_v58  ;;  %v107_v61 = vmul.f32 0.015625, %v93_v59  ;;  %v108_v62 = vmul.f32 0.015625, %v96_v60 }
 0x124   :  { %v113_v63 = vadd.f32 1e-05, %v107_v61  ;;  %v114_v0 = vadd.f32 1e-05, %v108_v62 }
 0x125   :  { %v99_v1 = vpop.xlane.xlu1 %98  ;;  %v102_v2 = vpop.xlane.xlu0 %101 }
 0x126   :  { %5077 = vrsqrt.f32 %v113_v63  ;;  %v109_v3 = vmul.f32 0.015625, %v99_v1  ;;  %v110_v4 = vmul.f32 0.015625, %v102_v2 }
 0x127   :  { %5079 = vrsqrt.f32 %v114_v0 }
 0x128   :  { %v115_v5 = vadd.f32 1e-05, %v109_v3  ;;  %v116_v6 = vadd.f32 1e-05, %v110_v4 }
 0x129   :  { %v105_v7 = vpop.xlane.xlu1 %104  ;;  %v274_v42 = vpop.permute.xlu0 %273 }
 0x12a   :  { %5081 = vrsqrt.f32 %v115_v5  ;;  %v111_v8 = vmul.f32 0.015625, %v105_v7 }
 0x12b   :  { %5083 = vrsqrt.f32 %v116_v6 }
 0x12c   :  { %v117_v9 = vadd.f32 1e-05, %v111_v8 }
 0x12d   :  { %v282_v2 = vpop.permute.xlu0 %281 }
 0x12e   :  { %5085 = vrsqrt.f32 %v117_v9 }
 0x12f   :  { %v5076_v10 = vpop.eup %5075 }
 0x130   :  { %v124_v12 = vmul.f32 %v5076_v10, %v5323_v16 }
 0x132   :  { %v134_v14 = vmul.f32 %v4196_v11, %v124_v12 }
 0x133   :  { %v5078_v15 = vpop.eup %5077 }
 0x134   :  { %v5080_v18 = vpop.eup %5079  ;;  %v144_v19 = vadd.f32 %v4197_v13, %v134_v14  ;;  %v125_v20 = vmul.f32 %v5078_v15, %v5331_v24 }
 0x135   :  { %v126_v21 = vmul.f32 %v5080_v18, %v5325_v17 }
 0x136   :  { %4621 = vmatprep.mubr.msk.f32.mxu0 %vm50_vm0, %v144_v19  ;;  %v135_v22 = vmul.f32 %v4196_v11, %v125_v20 }
 0x137   :  { %v5082_v23 = vpop.eup %5081  ;;  %v136_v26 = vmul.f32 %v4196_v11, %v126_v21 }
 0x138   :  { %v5084_v27 = vpop.eup %5083  ;;  %v145_v28 = vadd.f32 %v4197_v13, %v135_v22  ;;  %v127_v16 = vmul.f32 %v5082_v23, %v5333_v25 }
 0x139   :  { %v146_v29 = vadd.f32 %v4197_v13, %v136_v26  ;;  %v128_v30 = vmul.f32 %v5084_v27, %v5341_v34  ;;  %v276_v34 = vpop.permute.xlu1 %275 }
 0x13a   :  { %4622 = vmatmul.mubr.msk.f32.vlgmr.msra.gmra.mxu0 %vm50_vm0, %v145_v28  ;;  %v137_v31 = vmul.f32 %v4196_v11, %v127_v16 }
 0x13b   :  { %v5086_v32 = vpop.eup %5085  ;;  %4624 = vmatprep.mubr.msk.f32.mxu0 %vm50_vm0, %v146_v29  ;;  %v138_v24 = vmul.f32 %v4196_v11, %v128_v30 }
 0x13c   :  { %v147_v17 = vadd.f32 %v4197_v13, %v137_v31  ;;  %v129_v33 = vmul.f32 %v5086_v32, %v5343_v35 }
 0x13d   :  { %v148_v36 = vadd.f32 %v4197_v13, %v138_v24  ;;  %v278_v38 = vpop.permute.xlu1 %277 }
 0x13e   :  { %4625 = vmatmul.mubr.msk.f32.gmra.mxu0 %vm50_vm0, %v147_v17  ;;  %v139_v37 = vmul.f32 %v4196_v11, %v129_v33 }
 0x13f   :  { %4627 = vmatprep.mubr.msk.f32.mxu0 %vm50_vm0, %v148_v36 }
 0x140   :  { %v149_v25 = vadd.f32 %v4197_v13, %v139_v37 }
 0x141   :  { %v280_v35 = vpop.permute.xlu1 %279 }
 0x142   :  { %4628 = vmatmul.mubr.msk.f32.gmra.mxu0 %vm50_vm0, %v149_v25 }
 0x145   :  { %v284_v61 = vpop.permute.xlu1 %283 }
 0x1fa   :  { %v4623_v40 = vpop.f32.mrf.mxu0 }
 0x1fb   :  { %v244_v41 = vadd.f32 %v4623_v40, %v4198_v39  ;;  %v306_v40 = vld [vmem:[%s6646_s3 + $0x18] sm:$0xff] }
 0x1fc   :  { %v238_v43 = vpop.f32.mrf.mxu0  ;;  %4630 = vmatprep.subr.mxu1 %v306_v40 }
 0x1fd   :  { %v292_v44 = vmul.f32 %v276_v34, %v244_v41  ;;  %v239_v45 = vadd.f32 %v4198_v39, %v238_v43  ;;  %v305_v41 = vld [vmem:[%s6646_s3 + $0x10] sm:$0xff]  ;;  %4631 = vmatpush3.msra.mxu1 %v306_v40  ;;  %v303_v43 = vld [vmem:[%s6646_s3] sm:$0xff] }
 0x1fe   :  { %v4626_v46 = vpop.f32.mrf.mxu0  ;;  %4632 = vmatprep.subr.mxu1 %v305_v41 }
 0x1ff   :  { %v5441_v47 = vadd.f32 %v292_v44, %v5380_v50  ;;  %v254_v48 = vadd.f32 %v4626_v46, %v4198_v39  ;;  %v291_v49 = vmul.f32 %v274_v42, %v239_v45  ;;  %v304_v42 = vld [vmem:[%s6646_s3 + $0x8] sm:$0xff]  ;;  %4633 = vmatpush3.msra.mxu1 %v305_v41 }
 0x200   :  { %v248_v56 = vpop.f32.mrf.mxu0  ;;  %4634 = vmatprep.subr.mxu1 %v304_v42 }
 0x201   :  { %v5444_v57 = vadd.f32 %v291_v49, %v5385_v51  ;;  %v249_v58 = vadd.f32 %v4198_v39, %v248_v56  ;;  %v335_v59 = vsel %vm331_vm1, %v5441_v47, 0.0  ;;  %v294_v62 = vmul.f32 %v280_v35, %v254_v48  ;;  %4635 = vmatpush3.msra.mxu1 %v304_v42 }
 0x202   :  { %336 = vadd.xlane.f32.xlu1 %v335_v59  ;;  %v4629_v60 = vpop.f32.mrf.mxu0  ;;  %4636 = vmatprep.subr.mxu1 %v303_v43 }
 0x203   :  { %v293_v63 = vmul.f32 %v278_v38, %v249_v58  ;;  %v264_v0 = vadd.f32 %v4629_v60, %v4198_v39  ;;  %v332_v50 = vsel %vm331_vm1, %v5444_v57, 0.0  ;;  %v5454_v5 = vadd.f32 %v294_v62, %v5408_v54  ;;  %4637 = vmatpush3.msra.mxu1 %v303_v43 }
 0x204   :  { %v258_v1 = vpop.f32.mrf.mxu0  ;;  %333 = vadd.xlane.f32.xlu0 %v332_v50 }
 0x205   :  { %v5451_v3 = vadd.f32 %v293_v63, %v5394_v52  ;;  %v296_v51 = vmul.f32 %v284_v61, %v264_v0  ;;  %v259_v4 = vadd.f32 %v4198_v39, %v258_v1  ;;  %v341_v10 = vsel %vm331_vm1, %v5454_v5, 0.0 }
 0x207   :  { %v5457_v6 = vadd.f32 %v296_v51, %v5415_v55  ;;  %v295_v7 = vmul.f32 %v282_v2, %v259_v4  ;;  %v338_v8 = vsel %vm331_vm1, %v5451_v3, 0.0 }
 0x208   :  { %339 = vadd.xlane.f32.xlu0 %v338_v8 }
 0x209   :  { %v347_v9 = vsel %vm331_vm1, %v5457_v6, 0.0  ;;  %v5464_v52 = vadd.f32 %v295_v7, %v5399_v53  ;;  %v4205_v7 = vld [vmem:[%s6647_s4] ss:$0 sm:$0xff] }
 0x20a   :  { %348 = vadd.xlane.f32.xlu1 %v347_v9 }
 0x20b   :  { %v344_v54 = vsel %vm331_vm1, %v5464_v52, 0.0 }
 0x20c   :  { %342 = vadd.xlane.f32.xlu0 %v341_v10 }
 0x210   :  { %345 = vadd.xlane.f32.xlu0 %v344_v54 }
 0x28b   :  { %v337_v55 = vpop.xlane.xlu1 %336 }
 0x28c   :  { %v352_v11 = vmul.f32 0.03125, %v337_v55  ;;  %v4206_v55 = vld [vmem:[%s6647_s4 + $0x1] ss:$0 sm:$0xff] }
 0x28d   :  { %v334_v12 = vpop.xlane.xlu0 %333 }
 0x28e   :  { %v5471_v13 = vsub.f32 %v5441_v47, %v352_v11  ;;  %v351_v14 = vmul.f32 0.03125, %v334_v12 }
 0x290   :  { %v5474_v15 = vsub.f32 %v5444_v57, %v351_v14  ;;  %v364_v53 = vmul.f32 %v5471_v13, %v5471_v13 }
 0x291   :  { %v340_v18 = vpop.xlane.xlu0 %339 }
 0x292   :  { %v353_v19 = vmul.f32 0.03125, %v340_v18  ;;  %v372_v20 = vsel %vm331_vm1, %v364_v53, 0.0  ;;  %v363_v21 = vmul.f32 %v5474_v15, %v5474_v15 }
 0x293   :  { %373 = vadd.xlane.f32.xlu1 %v372_v20  ;;  %v349_v22 = vpop.xlane.xlu1 %348 }
 0x294   :  { %v5482_v23 = vsub.f32 %v5451_v3, %v353_v19  ;;  %v356_v26 = vmul.f32 0.03125, %v349_v22  ;;  %v369_v27 = vsel %vm331_vm1, %v363_v21, 0.0 }
 0x295   :  { %370 = vadd.xlane.f32.xlu0 %v369_v27  ;;  %v343_v28 = vpop.xlane.xlu0 %342 }
 0x296   :  { %v354_v16 = vmul.f32 0.03125, %v343_v28  ;;  %v365_v29 = vmul.f32 %v5482_v23, %v5482_v23  ;;  %v5488_v30 = vsub.f32 %v5457_v6, %v356_v26 }
 0x298   :  { %v5491_v31 = vsub.f32 %v5454_v5, %v354_v16  ;;  %v375_v32 = vsel %vm331_vm1, %v365_v29, 0.0  ;;  %v368_v25 = vmul.f32 %v5488_v30, %v5488_v30 }
 0x299   :  { %376 = vadd.xlane.f32.xlu0 %v375_v32  ;;  %v346_v24 = vpop.xlane.xlu0 %345 }
 0x29a   :  { %v355_v17 = vmul.f32 0.03125, %v346_v24  ;;  %v366_v33 = vmul.f32 %v5491_v31, %v5491_v31  ;;  %v384_v38 = vsel %vm331_vm1, %v368_v25, 0.0 }
 0x29c   :  { %v5497_v36 = vsub.f32 %v5464_v52, %v355_v17  ;;  %v378_v37 = vsel %vm331_vm1, %v366_v33, 0.0 }
 0x29d   :  { %379 = vadd.xlane.f32.xlu1 %v378_v37 }
 0x29e   :  { %v367_v34 = vmul.f32 %v5497_v36, %v5497_v36 }
 0x2a0   :  { %v381_v39 = vsel %vm331_vm1, %v367_v34, 0.0 }
 0x2a1   :  { %385 = vadd.xlane.f32.xlu1 %v384_v38  ;;  %382 = vadd.xlane.f32.xlu0 %v381_v39 }
 0x31c   :  { %v374_v35 = vpop.xlane.xlu1 %373 }
 0x31d   :  { %v388_v44 = vmul.f32 0.03125, %v374_v35 }
 0x31e   :  { %v371_v45 = vpop.xlane.xlu0 %370 }
 0x31f   :  { %v394_v46 = vadd.f32 1e-05, %v388_v44  ;;  %v387_v48 = vmul.f32 0.03125, %v371_v45 }
 0x321   :  { %5087 = vrsqrt.f32 %v394_v46  ;;  %v393_v49 = vadd.f32 1e-05, %v387_v48 }
 0x322   :  { %v377_v56 = vpop.xlane.xlu0 %376 }
 0x323   :  { %5089 = vrsqrt.f32 %v393_v49  ;;  %v389_v58 = vmul.f32 0.03125, %v377_v56 }
 0x325   :  { %v395_v59 = vadd.f32 1e-05, %v389_v58 }
 0x326   :  { %v380_v60 = vpop.xlane.xlu1 %379 }
 0x327   :  { %5091 = vrsqrt.f32 %v395_v59  ;;  %v390_v61 = vmul.f32 0.03125, %v380_v60 }
 0x329   :  { %v396_v62 = vadd.f32 1e-05, %v390_v61 }
 0x32a   :  { %v386_v63 = vpop.xlane.xlu1 %385  ;;  %v383_v0 = vpop.xlane.xlu0 %382 }
 0x32b   :  { %5093 = vrsqrt.f32 %v396_v62  ;;  %v392_v50 = vmul.f32 0.03125, %v386_v63  ;;  %v391_v1 = vmul.f32 0.03125, %v383_v0 }
 0x32d   :  { %v398_v2 = vadd.f32 1e-05, %v392_v50  ;;  %v397_v51 = vadd.f32 1e-05, %v391_v1 }
 0x32e   :  { %v5088_v4 = vpop.eup %5087 }
 0x32f   :  { %5095 = vrsqrt.f32 %v398_v2  ;;  %v406_v8 = vmul.f32 %v5088_v4, %v5471_v13 }
 0x330   :  { %v5090_v9 = vpop.eup %5089  ;;  %5097 = vrsqrt.f32 %v397_v51 }
 0x331   :  { %v405_v10 = vmul.f32 %v5090_v9, %v5474_v15  ;;  %v416_v54 = vmul.f32 %v4205_v7, %v406_v8  ;;  %v23_v9 = vlaneseq }
 0x333   :  { %v415_v11 = vmul.f32 %v4205_v7, %v405_v10  ;;  %v426_v18 = vadd.f32 %v4206_v55, %v416_v54  ;;  %v24_v10 = vand.u32 127, %v23_v9 }
 0x334   :  { %v5092_v12 = vpop.eup %5091 }
 0x335   :  { %v425_v14 = vadd.f32 %v4206_v55, %v415_v11  ;;  %v407_v53 = vmul.f32 %v5092_v12, %v5482_v23  ;;  %vm25_vm4 = vcmp.lt.s32.totalorder %v24_v10, 17 }
 0x337   :  { %4638 = vmatprep.mubr.msk.f32.mxu1 %vm331_vm1, %v425_v14  ;;  %v417_v19 = vmul.f32 %v4205_v7, %v407_v53 }
 0x338   :  { %v5094_v20 = vpop.eup %5093  ;;  %4639 = vmatmul.mubr.msk.f32.vlgmr.msra.gmra.mxu1 %vm331_vm1, %v426_v18 }
 0x339   :  { %v427_v13 = vadd.f32 %v4206_v55, %v417_v19  ;;  %v408_v15 = vmul.f32 %v5094_v20, %v5491_v31  ;;  %v5256_v31 = vmov 0.0  }
 0x33a   :  { %4647 = vmatprep.subr.mxu1 %v5256_v31  ;;  %4662 = vmatprep.subr.mxu0 %v5256_v31 }
 0x33b   :  { %4641 = vmatprep.mubr.msk.f32.mxu1 %vm331_vm1, %v427_v13  ;;  %v418_v21 = vmul.f32 %v4205_v7, %v408_v15  ;;  %4668 = vmatprep.mubr.msk.f32.mxu0 %vm5257_vm2, %v5256_v31 }
 0x33c   :  { %v5096_v22 = vpop.eup %5095 }
 0x33d   :  { %v5098_v26 = vpop.eup %5097  ;;  %v428_v27 = vadd.f32 %v4206_v55, %v418_v21  ;;  %v410_v28 = vmul.f32 %v5096_v22, %v5488_v30  ;;  %v4207_v30 = vld [vmem:[%s6647_s4 + $0x7] ss:$0 sm:$0xff] }
 0x33e   :  { %v409_v23 = vmul.f32 %v5098_v26, %v5497_v36 }
 0x33f   :  { %4642 = vmatmul.mubr.msk.f32.gmra.mxu1 %vm331_vm1, %v428_v27  ;;  %v420_v16 = vmul.f32 %v4205_v7, %v410_v28 }
 0x340   :  { %v419_v29 = vmul.f32 %v4205_v7, %v409_v23 }
 0x341   :  { %v430_v32 = vadd.f32 %v4206_v55, %v420_v16 }
 0x342   :  { %v429_v24 = vadd.f32 %v4206_v55, %v419_v29  ;;  %v5261_v55 = vmov -1e+30  }
 0x343   :  { %v5669_v11 = vsel %vm25_vm4, 0.0, %v5261_v55 }
 0x344   :  { %4644 = vmatprep.mubr.msk.f32.mxu1 %vm331_vm1, %v429_v24 }
 0x345   :  { %4645 = vmatmul.mubr.msk.f32.gmra.mxu1 %vm331_vm1, %v430_v32 }
 0x346   :  { %4653 = vmatprep.mubr.msk.f32.mxu1 %vm5257_vm2, %v5256_v31 }
 0x3f8   :  { %v4640_v17 = vpop.f32.mrf.mxu1 }
 0x3f9   :  { %v5541_v33 = vadd.f32 %v4640_v17, %v4207_v30 }
 0x3fa   :  { %v519_v36 = vpop.f32.mrf.mxu1 }
 0x3fb   :  { %553 = vrot.lane.b32.xlu1 %v5541_v33, %s5255_s28  ;;  %v5545_v37 = vadd.f32 %v4207_v30, %v519_v36 }
 0x3ff   :  { %551 = vrot.lane.b32.xlu1 %v5545_v37, %s5255_s28  ;;  %v4643_v25 = vpop.f32.mrf.mxu1 }
 0x400   :  { %v5563_v43 = vadd.f32 %v4643_v25, %v4207_v30 }
 0x401   :  { %v529_v34 = vpop.f32.mrf.mxu1 }
 0x402   :  { %v5553_v38 = vadd.f32 %v4207_v30, %v529_v34 }
 0x404   :  { %555 = vrot.lane.b32.xlu0 %v5553_v38, %s5255_s28 }
 0x405   :  { %v4646_v39 = vpop.f32.mrf.mxu1 }
 0x406   :  { %v5557_v40 = vadd.f32 %v4646_v39, %v4207_v30 }
 0x407   :  { %v539_v41 = vpop.f32.mrf.mxu1 }
 0x408   :  { %v5559_v42 = vadd.f32 %v4207_v30, %v539_v41  ;;  %795 = vrot.lane.b32.xlu1 %v5557_v40, %s5255_s28 }
 0x40a   :  { %793 = vrot.lane.b32.xlu0 %v5559_v42, %s5255_s28 }
 0x40c   :  { %791 = vrot.lane.b32.xlu1 %v5563_v43, %s5255_s28 }
 0x40e   :  { %1036 = vrot.lane.b32.xlu0 %v5553_v38, %s5258_s7 }
 0x410   :  { %1034 = vrot.lane.b32.xlu1 %v5541_v33, %s5258_s7 }
 0x412   :  { %1032 = vrot.lane.b32.xlu0 %v5545_v37, %s5258_s7 }
 0x414   :  { %1026 = vrot.lane.b32.xlu1 %v5545_v37, %s5259_s8 }
 0x416   :  { %1277 = vrot.lane.b32.xlu0 %v5557_v40, %s5258_s7 }
 0x418   :  { %1028 = vrot.lane.b32.xlu1 %v5541_v33, %s5259_s8 }
 0x41a   :  { %1275 = vrot.lane.b32.xlu0 %v5559_v42, %s5258_s7 }
 0x41c   :  { %1030 = vrot.lane.b32.xlu1 %v5553_v38, %s5259_s8 }
 0x41e   :  { %1273 = vrot.lane.b32.xlu0 %v5563_v43, %s5258_s7 }
 0x420   :  { %1267 = vrot.lane.b32.xlu1 %v5563_v43, %s5259_s8 }
 0x422   :  { %1269 = vrot.lane.b32.xlu0 %v5559_v42, %s5259_s8 }
 0x424   :  { %1271 = vrot.lane.b32.xlu1 %v5557_v40, %s5259_s8 }
 0x426   :  { %694 = vrot.lane.b32.xlu0 %v5553_v38, %s5260_s0 }
 0x428   :  { %692 = vrot.lane.b32.xlu1 %v5541_v33, %s5260_s0 }
 0x42a   :  { %932 = vrot.lane.b32.xlu0 %v5557_v40, %s5260_s0 }
 0x42c   :  { %690 = vrot.lane.b32.xlu1 %v5545_v37, %s5260_s0 }
 0x430   :  { %930 = vrot.lane.b32.xlu1 %v5559_v42, %s5260_s0 }
 0x46d   :  { %v554_v35 = vpop.permute.xlu1 %553 }
 0x471   :  { %v552_v44 = vpop.permute.xlu1 %551 }
 0x476   :  { %v556_v45 = vpop.permute.xlu0 %555 }
 0x477   :  { %4648 = vmatpush3.xpose.msk.msra.mxu1 %vm557_vm3, %v556_v45 }
 0x478   :  { %4649 = vmatprep.subr.mxu1 %v5256_v31 }
 0x47a   :  { %v796_v46 = vpop.permute.xlu1 %795 }
 0x47b   :  { %4650 = vmatpush3.xpose.msk.msra.mxu1 %vm557_vm3, %v554_v35 }
 0x47c   :  { %v794_v48 = vpop.permute.xlu0 %793  ;;  %4651 = vmatprep.subr.mxu1 %v5256_v31 }
 0x47e   :  { %v792_v49 = vpop.permute.xlu1 %791 }
 0x47f   :  { %4652 = vmatpush3.xpose.msk.msra.mxu1 %vm557_vm3, %v552_v44 }
 0x480   :  { %v1037_v56 = vpop.permute.xlu0 %1036  ;;  %4677 = vmatprep.subr.mxu1 %v5256_v31 }
 0x482   :  { %v1035_v58 = vpop.permute.xlu1 %1034  ;;  %4654 = vmatmul.mubr.msk.f32.vlgmr.msra.gmra.mxu1 %vm557_vm3, %v5545_v37 }
 0x483   :  { %4678 = vmatpush3.xpose.msk.msra.mxu1 %vm557_vm3, %v796_v46  ;;  %4656 = vmatprep.mubr.msk.f32.mxu1 %vm5257_vm2, %v5256_v31 }
 0x484   :  { %v1033_v59 = vpop.permute.xlu0 %1032  ;;  %4679 = vmatprep.subr.mxu1 %v5256_v31 }
 0x486   :  { %v1027_v60 = vpop.permute.xlu1 %1026  ;;  %4657 = vmatmul.mubr.msk.f32.gmra.mxu1 %vm557_vm3, %v5541_v33 }
 0x487   :  { %4680 = vmatpush3.xpose.msk.msra.mxu1 %vm557_vm3, %v794_v48  ;;  %4659 = vmatprep.mubr.msk.f32.mxu1 %vm5257_vm2, %v5256_v31 }
 0x488   :  { %v1278_v61 = vpop.permute.xlu0 %1277  ;;  %4681 = vmatprep.subr.mxu1 %v5256_v31 }
 0x48a   :  { %v1029_v62 = vpop.permute.xlu1 %1028  ;;  %4660 = vmatmul.mubr.msk.f32.gmra.mxu1 %vm557_vm3, %v5553_v38 }
 0x48b   :  { %4682 = vmatpush3.xpose.msk.msra.mxu1 %vm557_vm3, %v792_v49  ;;  %4683 = vmatprep.mubr.msk.f32.mxu1 %vm5257_vm2, %v5256_v31 }
 0x48c   :  { %v1276_v63 = vpop.permute.xlu0 %1275  ;;  %4707 = vmatprep.subr.mxu1 %v5256_v31 }
 0x48e   :  { %v1031_v0 = vpop.permute.xlu1 %1030  ;;  %4684 = vmatmul.mubr.msk.f32.vlgmr.msra.gmra.mxu1 %vm557_vm3, %v5563_v43 }
 0x48f   :  { %4708 = vmatpush3.xpose.msk.msra.mxu1 %vm557_vm3, %v1037_v56  ;;  %4686 = vmatprep.mubr.msk.f32.mxu1 %vm5257_vm2, %v5256_v31 }
 0x490   :  { %v1274_v50 = vpop.permute.xlu0 %1273  ;;  %4709 = vmatprep.subr.mxu1 %v5256_v31 }
 0x492   :  { %v1268_v1 = vpop.permute.xlu1 %1267  ;;  %4687 = vmatmul.mubr.msk.f32.gmra.mxu1 %vm557_vm3, %v5559_v42 }
 0x493   :  { %4710 = vmatpush3.xpose.msk.msra.mxu1 %vm557_vm3, %v1035_v58  ;;  %4689 = vmatprep.mubr.msk.f32.mxu1 %vm5257_vm2, %v5256_v31 }
 0x494   :  { %v1270_v2 = vpop.permute.xlu0 %1269  ;;  %4711 = vmatprep.subr.mxu1 %v5256_v31 }
 0x496   :  { %v1272_v51 = vpop.permute.xlu1 %1271  ;;  %4690 = vmatmul.mubr.msk.f32.gmra.mxu1 %vm557_vm3, %v5557_v40 }
 0x497   :  { %4712 = vmatpush3.xpose.msk.msra.mxu1 %vm557_vm3, %v1033_v59  ;;  %4713 = vmatprep.mubr.msk.f32.mxu1 %vm5257_vm2, %v5256_v31 }
 0x498   :  { %v695_v4 = vpop.permute.xlu0 %694  ;;  %4737 = vmatprep.subr.mxu1 %v5256_v31 }
 0x499   :  { %4663 = vmatpush3.msra.mxu0 %v695_v4 }
 0x49a   :  { %v693_v7 = vpop.permute.xlu1 %692  ;;  %4664 = vmatprep.subr.mxu0 %v5256_v31  ;;  %4714 = vmatmul.mubr.msk.f32.vlgmr.msra.gmra.mxu1 %vm557_vm3, %v1027_v60 }
 0x49b   :  { %4665 = vmatpush3.msra.mxu0 %v693_v7  ;;  %4738 = vmatpush3.xpose.msk.msra.mxu1 %vm557_vm3, %v1278_v61 }
 0x49c   :  { %4666 = vmatprep.subr.mxu0 %v5256_v31  ;;  %4716 = vmatprep.mubr.msk.f32.mxu1 %vm5257_vm2, %v5256_v31 }
 0x49d   :  { %4739 = vmatprep.subr.mxu1 %v5256_v31 }
 0x49e   :  { %v691_v8 = vpop.permute.xlu1 %690  ;;  %4717 = vmatmul.mubr.msk.f32.gmra.mxu1 %vm557_vm3, %v1029_v62 }
 0x49f   :  { %4667 = vmatpush3.msra.mxu0 %v691_v8  ;;  %4740 = vmatpush3.xpose.msk.msra.mxu1 %vm557_vm3, %v1276_v63 }
 0x4a0   :  { %4719 = vmatprep.mubr.msk.f32.mxu1 %vm5257_vm2, %v5256_v31  ;;  %4741 = vmatprep.subr.mxu1 %v5256_v31 }
 0x4a1   :  { %4692 = vmatprep.subr.mxu0 %v5256_v31 }
 0x4a2   :  { %4720 = vmatmul.mubr.msk.f32.gmra.mxu1 %vm557_vm3, %v1031_v0 }
 0x4a3   :  { %4742 = vmatpush3.xpose.msk.msra.mxu1 %vm557_vm3, %v1274_v50  ;;  %4743 = vmatprep.mubr.msk.f32.mxu1 %vm5257_vm2, %v5256_v31 }
 0x4a6   :  { %4744 = vmatmul.mubr.msk.f32.vlgmr.msra.gmra.mxu1 %vm557_vm3, %v1268_v1 }
 0x4a7   :  { %4746 = vmatprep.mubr.msk.f32.mxu1 %vm5257_vm2, %v5256_v31 }
 0x4aa   :  { %4747 = vmatmul.mubr.msk.f32.gmra.mxu1 %vm557_vm3, %v1270_v2 }
 0x4ab   :  { %4749 = vmatprep.mubr.msk.f32.mxu1 %vm5257_vm2, %v5256_v31 }
 0x4ae   :  { %4750 = vmatmul.mubr.msk.f32.gmra.mxu1 %vm557_vm3, %v1272_v51 }
 0x542   :  { %v636_v54 = vpop.f32.mrf.mxu1 }
 0x543   :  { %v650_v12 = vmul.f32 0.25, %v636_v54 }
 0x544   :  { %v4655_v14 = vpop.f32.mrf.mxu1 }
 0x545   :  { %v5672_v53 = vadd.f32 %v650_v12, %v5669_v11 }
 0x546   :  { %v641_v18 = vpop.f32.mrf.mxu1 }
 0x547   :  { %v651_v19 = vmul.f32 0.25, %v641_v18  ;;  %v657_v20 = vsel %vm656_vm5, %v5672_v53, -inf }
 0x548   :  { %658 = vmax.xlane.f32.xlu0 %v657_v20  ;;  %v4658_v13 = vpop.f32.mrf.mxu1 }
 0x549   :  { %v5677_v15 = vadd.f32 %v651_v19, %v5669_v11 }
 0x54a   :  { %v646_v21 = vpop.f32.mrf.mxu1 }
 0x54b   :  { %v652_v22 = vmul.f32 0.25, %v646_v21  ;;  %v660_v26 = vsel %vm656_vm5, %v5677_v15, -inf }
 0x54c   :  { %661 = vmax.xlane.f32.xlu1 %v660_v26  ;;  %v4661_v27 = vpop.f32.mrf.mxu1 }
 0x54d   :  { %v5682_v28 = vadd.f32 %v652_v22, %v5669_v11  ;;  %v5737_v27 = vpop.permute.xlu0 %932 }
 0x54e   :  { %v875_v23 = vpop.f32.mrf.mxu1 }
 0x54f   :  { %v889_v16 = vmul.f32 0.25, %v875_v23  ;;  %v663_v29 = vsel %vm656_vm5, %v5682_v28, -inf  ;;  %v5739_v23 = vpop.permute.xlu1 %930 }
 0x550   :  { %664 = vmax.xlane.f32.xlu0 %v663_v29  ;;  %v4685_v32 = vpop.f32.mrf.mxu1 }
 0x551   :  { %v5687_v24 = vadd.f32 %v889_v16, %v5669_v11 }
 0x552   :  { %v880_v30 = vpop.f32.mrf.mxu1 }
 0x553   :  { %v890_v17 = vmul.f32 0.25, %v880_v30  ;;  %v895_v36 = vsel %vm656_vm5, %v5687_v24, -inf }
 0x554   :  { %896 = vmax.xlane.f32.xlu0 %v895_v36  ;;  %v4688_v25 = vpop.f32.mrf.mxu1 }
 0x555   :  { %v5692_v34 = vadd.f32 %v890_v17, %v5669_v11 }
 0x556   :  { %v885_v39 = vpop.f32.mrf.mxu1 }
 0x557   :  { %v891_v41 = vmul.f32 0.25, %v885_v39  ;;  %v898_v35 = vsel %vm656_vm5, %v5692_v34, -inf }
 0x558   :  { %899 = vmax.xlane.f32.xlu0 %v898_v35  ;;  %v4691_v44 = vpop.f32.mrf.mxu1 }
 0x559   :  { %v5697_v45 = vadd.f32 %v891_v41, %v5669_v11 }
 0x55a   :  { %v1116_v46 = vpop.f32.mrf.mxu1 }
 0x55b   :  { %v1130_v48 = vmul.f32 0.25, %v1116_v46  ;;  %v901_v49 = vsel %vm656_vm5, %v5697_v45, -inf }
 0x55c   :  { %902 = vmax.xlane.f32.xlu1 %v901_v49  ;;  %v4715_v56 = vpop.f32.mrf.mxu1 }
 0x55d   :  { %v5702_v58 = vadd.f32 %v1130_v48, %v5669_v11 }
 0x55e   :  { %v1121_v59 = vpop.f32.mrf.mxu1 }
 0x55f   :  { %v1131_v60 = vmul.f32 0.25, %v1121_v59  ;;  %v1136_v61 = vsel %vm656_vm5, %v5702_v58, -inf }
 0x560   :  { %1137 = vmax.xlane.f32.xlu0 %v1136_v61  ;;  %v4718_v62 = vpop.f32.mrf.mxu1 }
 0x561   :  { %v5707_v63 = vadd.f32 %v1131_v60, %v5669_v11 }
 0x562   :  { %v1126_v0 = vpop.f32.mrf.mxu1 }
 0x563   :  { %v1132_v50 = vmul.f32 0.25, %v1126_v0  ;;  %v1139_v1 = vsel %vm656_vm5, %v5707_v63, -inf }
 0x564   :  { %1140 = vmax.xlane.f32.xlu1 %v1139_v1  ;;  %v4721_v2 = vpop.f32.mrf.mxu1 }
 0x565   :  { %v5712_v51 = vadd.f32 %v1132_v50, %v5669_v11 }
 0x566   :  { %v1357_v4 = vpop.f32.mrf.mxu1 }
 0x567   :  { %v1371_v7 = vmul.f32 0.25, %v1357_v4  ;;  %v1142_v8 = vsel %vm656_vm5, %v5712_v51, -inf }
 0x568   :  { %1143 = vmax.xlane.f32.xlu0 %v1142_v8  ;;  %v4745_v9 = vpop.f32.mrf.mxu1 }
 0x569   :  { %v5717_v10 = vadd.f32 %v1371_v7, %v5669_v11 }
 0x56a   :  { %v1362_v54 = vpop.f32.mrf.mxu1 }
 0x56b   :  { %v1372_v55 = vmul.f32 0.25, %v1362_v54  ;;  %v1377_v12 = vsel %vm656_vm5, %v5717_v10, -inf }
 0x56c   :  { %1378 = vmax.xlane.f32.xlu1 %v1377_v12  ;;  %v4748_v14 = vpop.f32.mrf.mxu1 }
 0x56d   :  { %v5722_v18 = vadd.f32 %v1372_v55, %v5669_v11 }
 0x56e   :  { %v1367_v19 = vpop.f32.mrf.mxu1 }
 0x56f   :  { %v1380_v20 = vsel %vm656_vm5, %v5722_v18, -inf  ;;  %v1373_v21 = vmul.f32 0.25, %v1367_v19 }
 0x570   :  { %1381 = vmax.xlane.f32.xlu0 %v1380_v20  ;;  %v4751_v13 = vpop.f32.mrf.mxu1 }
 0x571   :  { %v5731_v22 = vadd.f32 %v1373_v21, %v5669_v11 }
 0x573   :  { %v1383_v26 = vsel %vm656_vm5, %v5731_v22, -inf }
 0x57d   :  { %1173 = vrot.lane.b32.xlu1 %v5553_v38, %s5262_s9 }
 0x586   :  { %928 = vrot.lane.b32.xlu0 %v5563_v43, %s5260_s0 }
 0x5a1   :  { %1384 = vmax.xlane.f32.xlu1 %v1383_v26 }
 0x5b2   :  { %1171 = vrot.lane.b32.xlu1 %v5541_v33, %s5262_s9 }
 0x5d1   :  { %v659_v16 = vpop.xlane.xlu0 %658 }
 0x5d2   :  { %v666_v38 = vsub.f32 %v5672_v53, %v659_v16 }
 0x5d4   :  { %v669_v29 = vmul.f32 1.442695, %v666_v38 }
 0x5d5   :  { %v662_v32 = vpop.xlane.xlu1 %661 }
 0x5d6   :  { %5099 = vpow2.f32 %v669_v29  ;;  %v667_v30 = vsub.f32 %v5677_v15, %v662_v32 }
 0x5d8   :  { %v671_v17 = vmul.f32 1.442695, %v667_v30 }
 0x5d9   :  { %v665_v36 = vpop.xlane.xlu0 %664 }
 0x5da   :  { %5101 = vpow2.f32 %v671_v17  ;;  %v668_v25 = vsub.f32 %v5682_v28, %v665_v36 }
 0x5dc   :  { %v673_v39 = vmul.f32 1.442695, %v668_v25 }
 0x5dd   :  { %v897_v41 = vpop.xlane.xlu0 %896 }
 0x5de   :  { %5103 = vpow2.f32 %v673_v39  ;;  %v904_v33 = vsub.f32 %v5687_v24, %v897_v41 }
 0x5e0   :  { %v907_v35 = vmul.f32 1.442695, %v904_v33 }
 0x5e1   :  { %v900_v44 = vpop.xlane.xlu0 %899 }
 0x5e2   :  { %5105 = vpow2.f32 %v907_v35  ;;  %v905_v53 = vsub.f32 %v5692_v34, %v900_v44 }
 0x5e3   :  { %v5746_v46 = vpop.eup %5099 }
 0x5e4   :  { %v909_v48 = vmul.f32 1.442695, %v905_v53  ;;  %v675_v15 = vsel %vm656_vm5, %v5746_v46, 0.0 }
 0x5e5   :  { %v903_v49 = vpop.xlane.xlu1 %902  ;;  %676 = vadd.xlane.f32.xlu0 %v675_v15 }
 0x5e6   :  { %5107 = vpow2.f32 %v909_v48  ;;  %v906_v28 = vsub.f32 %v5697_v45, %v903_v49 }
 0x5e7   :  { %v5751_v56 = vpop.eup %5101 }
 0x5e8   :  { %v911_v59 = vmul.f32 1.442695, %v906_v28  ;;  %v678_v24 = vsel %vm656_vm5, %v5751_v56, 0.0 }
 0x5e9   :  { %679 = vadd.xlane.f32.xlu1 %v678_v24  ;;  %v1138_v60 = vpop.xlane.xlu0 %1137 }
 0x5ea   :  { %5109 = vpow2.f32 %v911_v59  ;;  %v1145_v34 = vsub.f32 %v5702_v58, %v1138_v60 }
 0x5eb   :  { %v5756_v61 = vpop.eup %5103 }
 0x5ec   :  { %v1148_v62 = vmul.f32 1.442695, %v1145_v34  ;;  %v681_v0 = vsel %vm656_vm5, %v5756_v61, 0.0 }
 0x5ed   :  { %682 = vadd.xlane.f32.xlu0 %v681_v0  ;;  %v1141_v1 = vpop.xlane.xlu1 %1140 }
 0x5ee   :  { %5111 = vpow2.f32 %v1148_v62  ;;  %v1146_v26 = vsub.f32 %v5707_v63, %v1141_v1 }
 0x5ef   :  { %v5760_v45 = vpop.eup %5105 }
 0x5f0   :  { %v913_v50 = vsel %vm656_vm5, %v5760_v45, 0.0  ;;  %v1150_v38 = vmul.f32 1.442695, %v1146_v26 }
 0x5f1   :  { %914 = vadd.xlane.f32.xlu1 %v913_v50  ;;  %v1144_v2 = vpop.xlane.xlu0 %1143 }
 0x5f2   :  { %v1147_v4 = vsub.f32 %v5712_v51, %v1144_v2 }
 0x5f3   :  { %v5765_v7 = vpop.eup %5107 }
 0x5f4   :  { %v1152_v58 = vmul.f32 1.442695, %v1147_v4  ;;  %v916_v8 = vsel %vm656_vm5, %v5765_v7, 0.0 }
 0x5f5   :  { %v1379_v9 = vpop.xlane.xlu1 %1378  ;;  %917 = vadd.xlane.f32.xlu0 %v916_v8 }
 0x5f6   :  { %5113 = vpow2.f32 %v1152_v58  ;;  %v1386_v54 = vsub.f32 %v5717_v10, %v1379_v9 }
 0x5f7   :  { %v5770_v55 = vpop.eup %5109 }
 0x5f8   :  { %v1389_v12 = vmul.f32 1.442695, %v1386_v54  ;;  %v919_v14 = vsel %vm656_vm5, %v5770_v55, 0.0 }
 0x5f9   :  { %920 = vadd.xlane.f32.xlu1 %v919_v14  ;;  %v1382_v16 = vpop.xlane.xlu0 %1381  ;;  %v1174_v17 = vpop.permute.xlu1 %1173 }
 0x5fa   :  { %5115 = vpow2.f32 %v1389_v12  ;;  %v1387_v29 = vsub.f32 %v5722_v18, %v1382_v16 }
 0x5fb   :  { %v5774_v51 = vpop.eup %5111  ;;  %5117 = vpow2.f32 %v1150_v38 }
 0x5fc   :  { %v1154_v19 = vsel %vm656_vm5, %v5774_v51, 0.0  ;;  %v1391_v32 = vmul.f32 1.442695, %v1387_v29 }
 0x5fd   :  { %1155 = vadd.xlane.f32.xlu1 %v1154_v19 }
 0x5fe   :  { %5119 = vpow2.f32 %v1391_v32 }
 0x603   :  { %v5778_v20 = vpop.eup %5113 }
 0x604   :  { %v1160_v13 = vsel %vm656_vm5, %v5778_v20, 0.0 }
 0x605   :  { %1161 = vadd.xlane.f32.xlu1 %v1160_v13 }
 0x607   :  { %v5782_v10 = vpop.eup %5115 }
 0x608   :  { %v1395_v21 = vsel %vm656_vm5, %v5782_v10, 0.0  ;;  %v5790_v30 = vpop.eup %5117 }
 0x609   :  { %1396 = vadd.xlane.f32.xlu1 %v1395_v21  ;;  %v1157_v36 = vsel %vm656_vm5, %v5790_v30, 0.0 }
 0x60b   :  { %1169 = vrot.lane.b32.xlu0 %v5545_v37, %s5262_s9  ;;  %v5794_v25 = vpop.eup %5119 }
 0x60c   :  { %v1398_v41 = vsel %vm656_vm5, %v5794_v25, 0.0 }
 0x62a   :  { %v1385_v39 = vpop.xlane.xlu1 %1384  ;;  %1158 = vadd.xlane.f32.xlu0 %v1157_v36 }
 0x62b   :  { %v1388_v37 = vsub.f32 %v5731_v22, %v1385_v39  ;;  %v929_v22 = vpop.permute.xlu0 %928  ;;  %v309_v39 = vld [vmem:[%s6646_s3 + $0x30] sm:$0xff] }
 0x62d   :  { %v1393_v63 = vmul.f32 1.442695, %v1388_v37 }
 0x62e   :  { %1399 = vadd.xlane.f32.xlu0 %v1398_v41  ;;  %v1172_v35 = vpop.permute.xlu1 %1171 }
 0x62f   :  { %5121 = vpow2.f32 %v1393_v63  ;;  %v308_v63 = vld [vmem:[%s6646_s3 + $0x28] sm:$0xff] }
 0x63c   :  { %v5799_v18 = vpop.eup %5121 }
 0x63d   :  { %v1401_v33 = vsel %vm656_vm5, %v5799_v18, 0.0 }
 0x63e   :  { %1402 = vadd.xlane.f32.xlu1 %v1401_v33 }
 0x644   :  { %1412 = vrot.lane.b32.xlu0 %v5559_v42, %s5262_s9 }
 0x648   :  { %1410 = vrot.lane.b32.xlu0 %v5563_v43, %s5262_s9 }
 0x64f   :  { %1414 = vrot.lane.b32.xlu1 %v5557_v40, %s5262_s9 }
 0x66e   :  { %v677_v44 = vpop.xlane.xlu0 %676 }
 0x66f   :  { %5123 = vrcp.f32 %v677_v44 }
 0x672   :  { %v680_v53 = vpop.xlane.xlu1 %679 }
 0x673   :  { %5125 = vrcp.f32 %v680_v53 }
 0x676   :  { %v683_v48 = vpop.xlane.xlu0 %682 }
 0x677   :  { %5127 = vrcp.f32 %v683_v48 }
 0x67a   :  { %v915_v15 = vpop.xlane.xlu1 %914 }
 0x67b   :  { %5129 = vrcp.f32 %v915_v15 }
 0x67c   :  { %v5124_v49 = vpop.eup %5123 }
 0x67d   :  { %v685_v28 = vmul.f32 %v5124_v49, %v5746_v46 }
 0x67e   :  { %v918_v42 = vpop.xlane.xlu0 %917 }
 0x67f   :  { %5131 = vrcp.f32 %v918_v42  ;;  %4669 = vmatmul.mubr.msk.f32.vlgmr.msra.gmra.mxu0 %vm656_vm5, %v685_v28 }
 0x680   :  { %v5126_v43 = vpop.eup %5125  ;;  %4693 = vmatpush3.msra.mxu0 %v5737_v27  ;;  %4671 = vmatprep.mubr.msk.f32.mxu0 %vm5257_vm2, %v5256_v31 }
 0x681   :  { %4694 = vmatprep.subr.mxu0 %v5256_v31  ;;  %v687_v40 = vmul.f32 %v5126_v43, %v5751_v56 }
 0x682   :  { %4695 = vmatpush3.msra.mxu0 %v5739_v23  ;;  %v921_v59 = vpop.xlane.xlu1 %920 }
 0x683   :  { %5133 = vrcp.f32 %v921_v59  ;;  %4696 = vmatprep.subr.mxu0 %v5256_v31  ;;  %4672 = vmatmul.mubr.msk.f32.gmra.mxu0 %vm656_vm5, %v687_v40 }
 0x684   :  { %v5128_v46 = vpop.eup %5127  ;;  %4697 = vmatpush3.msra.mxu0 %v929_v22  ;;  %4674 = vmatprep.mubr.msk.f32.mxu0 %vm5257_vm2, %v5256_v31 }
 0x685   :  { %v689_v27 = vmul.f32 %v5128_v46, %v5756_v61  ;;  %4722 = vmatprep.subr.mxu0 %v5256_v31  ;;  %v1170_v61 = vpop.permute.xlu0 %1169 }
 0x686   :  { %v1156_v24 = vpop.xlane.xlu1 %1155 }
 0x687   :  { %5135 = vrcp.f32 %v1156_v24  ;;  %4675 = vmatmul.mubr.msk.f32.gmra.mxu0 %vm656_vm5, %v689_v27 }
 0x688   :  { %v5130_v23 = vpop.eup %5129  ;;  %4698 = vmatprep.mubr.msk.f32.mxu0 %vm5257_vm2, %v5256_v31 }
 0x689   :  { %v923_v56 = vmul.f32 %v5130_v23, %v5760_v45 }
 0x68b   :  { %4699 = vmatmul.mubr.msk.f32.vlgmr.msra.gmra.mxu0 %vm656_vm5, %v923_v56 }
 0x68c   :  { %v5132_v60 = vpop.eup %5131  ;;  %4723 = vmatpush3.msra.mxu0 %v1174_v17  ;;  %4701 = vmatprep.mubr.msk.f32.mxu0 %vm5257_vm2, %v5256_v31 }
 0x68d   :  { %4724 = vmatprep.subr.mxu0 %v5256_v31  ;;  %v925_v34 = vmul.f32 %v5132_v60, %v5765_v7 }
 0x68e   :  { %4725 = vmatpush3.msra.mxu0 %v1172_v35  ;;  %v1162_v1 = vpop.xlane.xlu1 %1161 }
 0x68f   :  { %4726 = vmatprep.subr.mxu0 %v5256_v31  ;;  %4702 = vmatmul.mubr.msk.f32.gmra.mxu0 %vm656_vm5, %v925_v34 }
 0x690   :  { %v5134_v62 = vpop.eup %5133  ;;  %4727 = vmatpush3.msra.mxu0 %v1170_v61  ;;  %4704 = vmatprep.mubr.msk.f32.mxu0 %vm5257_vm2, %v5256_v31 }
 0x691   :  { %v927_v0 = vmul.f32 %v5134_v62, %v5770_v55  ;;  %4752 = vmatprep.subr.mxu0 %v5256_v31 }
 0x692   :  { %v1397_v4 = vpop.xlane.xlu1 %1396 }
 0x693   :  { %4705 = vmatmul.mubr.msk.f32.gmra.mxu0 %vm656_vm5, %v927_v0 }
 0x694   :  { %v5136_v45 = vpop.eup %5135  ;;  %4728 = vmatprep.mubr.msk.f32.mxu0 %vm5257_vm2, %v5256_v31 }
 0x695   :  { %v1164_v50 = vmul.f32 %v5136_v45, %v5774_v51 }
 0x697   :  { %4729 = vmatmul.mubr.msk.f32.vlgmr.msra.gmra.mxu0 %vm656_vm5, %v1164_v50 }
 0x698   :  { %4731 = vmatprep.mubr.msk.f32.mxu0 %vm5257_vm2, %v5256_v31 }
 0x6b3   :  { %v1159_v2 = vpop.xlane.xlu0 %1158 }
 0x6b4   :  { %5137 = vrcp.f32 %v1159_v2 }
 0x6b5   :  { %5139 = vrcp.f32 %v1162_v1 }
 0x6b6   :  { %5141 = vrcp.f32 %v1397_v4  ;;  %v4250_v4 = vld [vmem:[%s6647_s4 + $0x4] ss:$0 sm:$0xff] }
 0x6b7   :  { %v1400_v7 = vpop.xlane.xlu0 %1399 }
 0x6b8   :  { %5143 = vrcp.f32 %v1400_v7 }
 0x6bb   :  { %v1413_v12 = vpop.permute.xlu0 %1412 }
 0x6bf   :  { %v1411_v13 = vpop.permute.xlu0 %1410 }
 0x6c1   :  { %v5138_v58 = vpop.eup %5137 }
 0x6c2   :  { %v1166_v8 = vmul.f32 %v5138_v58, %v5790_v30  ;;  %v5140_v9 = vpop.eup %5139 }
 0x6c3   :  { %v1168_v54 = vmul.f32 %v5140_v9, %v5778_v20  ;;  %v5142_v51 = vpop.eup %5141 }
 0x6c4   :  { %4732 = vmatmul.mubr.msk.f32.gmra.mxu0 %vm656_vm5, %v1166_v8  ;;  %v1405_v19 = vmul.f32 %v5142_v51, %v5782_v10 }
 0x6c5   :  { %4734 = vmatprep.mubr.msk.f32.mxu0 %vm5257_vm2, %v5256_v31  ;;  %v5144_v20 = vpop.eup %5143 }
 0x6c6   :  { %v1407_v21 = vmul.f32 %v5144_v20, %v5794_v25  ;;  %v310_v25 = vld [vmem:[%s6646_s3 + $0x38] sm:$0xff] }
 0x6c7   :  { %v1403_v55 = vpop.xlane.xlu1 %1402  ;;  %4767 = vmatprep.subr.mxu1 %v310_v25 }
 0x6c8   :  { %5145 = vrcp.f32 %v1403_v55  ;;  %4735 = vmatmul.mubr.msk.f32.gmra.mxu0 %vm656_vm5, %v1168_v54  ;;  %4768 = vmatpush3.msra.mxu1 %v310_v25 }
 0x6c9   :  { %4758 = vmatprep.mubr.msk.f32.mxu0 %vm5257_vm2, %v5256_v31  ;;  %4769 = vmatprep.subr.mxu1 %v309_v39 }
 0x6ca   :  { %4770 = vmatpush3.msra.mxu1 %v309_v39 }
 0x6cb   :  { %v1415_v14 = vpop.permute.xlu1 %1414  ;;  %4771 = vmatprep.subr.mxu1 %v308_v63 }
 0x6cc   :  { %4753 = vmatpush3.msra.mxu0 %v1415_v14  ;;  %4772 = vmatpush3.msra.mxu1 %v308_v63 }
 0x6cd   :  { %4754 = vmatprep.subr.mxu0 %v5256_v31 }
 0x6ce   :  { %4755 = vmatpush3.msra.mxu0 %v1413_v12 }
 0x6cf   :  { %4756 = vmatprep.subr.mxu0 %v5256_v31 }
 0x6d0   :  { %4757 = vmatpush3.msra.mxu0 %v1411_v13 }
 0x6d1   :  { %4759 = vmatmul.mubr.msk.f32.vlgmr.msra.gmra.mxu0 %vm656_vm5, %v1405_v19 }
 0x6d2   :  { %4761 = vmatprep.mubr.msk.f32.mxu0 %vm5257_vm2, %v5256_v31 }
 0x6d5   :  { %v5146_v26 = vpop.eup %5145  ;;  %4762 = vmatmul.mubr.msk.f32.gmra.mxu0 %vm656_vm5, %v1407_v21 }
 0x6d6   :  { %4764 = vmatprep.mubr.msk.f32.mxu0 %vm5257_vm2, %v5256_v31  ;;  %v1409_v10 = vmul.f32 %v5146_v26, %v5799_v18  ;;  %v307_v18 = vld [vmem:[%s6646_s3 + $0x20] sm:$0xff] }
 0x6d7   :  { %4773 = vmatprep.subr.mxu1 %v307_v18 }
 0x6d8   :  { %4774 = vmatpush3.msra.mxu1 %v307_v18 }
 0x6d9   :  { %4765 = vmatmul.mubr.msk.f32.gmra.mxu0 %vm656_vm5, %v1409_v10 }
 0x73f   :  { %v774_v16 = vpop.f32.mrf.mxu0 }
 0x741   :  { %v4670_v38 = vpop.f32.mrf.mxu0 }
 0x743   :  { %v779_v29 = vpop.f32.mrf.mxu0 }
 0x745   :  { %v4673_v32 = vpop.f32.mrf.mxu0 }
 0x747   :  { %v784_v30 = vpop.f32.mrf.mxu0 }
 0x749   :  { %v4676_v17 = vpop.f32.mrf.mxu0 }
 0x74b   :  { %v1012_v36 = vpop.f32.mrf.mxu0 }
 0x74d   :  { %v4700_v37 = vpop.f32.mrf.mxu0 }
 0x74f   :  { %v1017_v41 = vpop.f32.mrf.mxu0 }
 0x751   :  { %v4703_v33 = vpop.f32.mrf.mxu0 }
 0x753   :  { %v1022_v22 = vpop.f32.mrf.mxu0 }
 0x755   :  { %v4706_v35 = vpop.f32.mrf.mxu0 }
 0x757   :  { %v1253_v44 = vpop.f32.mrf.mxu0 }
 0x758   :  { %1514 = vrot.lane.b32.xlu0 %v1253_v44, %s5263_s1 }
 0x759   :  { %v4730_v53 = vpop.f32.mrf.mxu0 }
 0x784   :  { %v1258_v48 = vpop.f32.mrf.mxu0 }
 0x785   :  { %1516 = vrot.lane.b32.xlu1 %v1258_v48, %s5263_s1 }
 0x786   :  { %v4733_v15 = vpop.f32.mrf.mxu0 }
 0x788   :  { %v1263_v49 = vpop.f32.mrf.mxu0 }
 0x789   :  { %1518 = vrot.lane.b32.xlu0 %v1263_v49, %s5263_s1 }
 0x78a   :  { %v4736_v28 = vpop.f32.mrf.mxu0 }
 0x791   :  { %v1494_v42 = vpop.f32.mrf.mxu0 }
 0x792   :  { %1520 = vrot.lane.b32.xlu1 %v1494_v42, %s5263_s1 }
 0x793   :  { %v4760_v43 = vpop.f32.mrf.mxu0 }
 0x795   :  { %v1499_v40 = vpop.f32.mrf.mxu0 }
 0x796   :  { %1522 = vrot.lane.b32.xlu0 %v1499_v40, %s5263_s1 }
 0x797   :  { %v4763_v59 = vpop.f32.mrf.mxu0 }
 0x799   :  { %v1504_v46 = vpop.f32.mrf.mxu0 }
 0x79a   :  { %1524 = vrot.lane.b32.xlu1 %v1504_v46, %s5263_s1 }
 0x79b   :  { %v4766_v27 = vpop.f32.mrf.mxu0 }
 0x7ca   :  { %v1515_v24 = vpop.permute.xlu0 %1514 }
 0x7cb   :  { %v1532_v23 = vsel %vm557_vm3, %v774_v16, %v1515_v24 }
 0x7cc   :  { %4775 = vmatprep.mubr.msk.f32.mxu1 %vm331_vm1, %v1532_v23 }
 0x7f7   :  { %v1517_v56 = vpop.permute.xlu1 %1516 }
 0x7f8   :  { %v1533_v60 = vsel %vm557_vm3, %v779_v29, %v1517_v56 }
 0x7f9   :  { %4776 = vmatmul.mubr.msk.f32.vlgmr.msra.gmra.mxu1 %vm331_vm1, %v1533_v60 }
 0x7fb   :  { %v1519_v34 = vpop.permute.xlu0 %1518 }
 0x7fc   :  { %v1534_v61 = vsel %vm557_vm3, %v784_v30, %v1519_v34 }
 0x7fd   :  { %4778 = vmatprep.mubr.msk.f32.mxu1 %vm331_vm1, %v1534_v61  ;;  %v314_v61 = vld [vmem:[%s6646_s3 + $0x58] sm:$0xff] }
 0x7fe   :  { %4784 = vmatprep.subr.mxu0 %v314_v61 }
 0x7ff   :  { %4785 = vmatpush3.msra.mxu0 %v314_v61  ;;  %v4259_v61 = vld [vmem:[%s6647_s4 + $0x6] ss:$0 sm:$0xff] }
 0x804   :  { %v1521_v62 = vpop.permute.xlu1 %1520 }
 0x805   :  { %v1535_v0 = vsel %vm557_vm3, %v1012_v36, %v1521_v62  ;;  %v313_v62 = vld [vmem:[%s6646_s3 + $0x50] sm:$0xff] }
 0x806   :  { %4779 = vmatmul.mubr.msk.f32.gmra.mxu1 %vm331_vm1, %v1535_v0  ;;  %4786 = vmatprep.subr.mxu0 %v313_v62  ;;  %v312_v0 = vld [vmem:[%s6646_s3 + $0x48] sm:$0xff] }
 0x807   :  { %4787 = vmatpush3.msra.mxu0 %v313_v62 }
 0x808   :  { %v1523_v45 = vpop.permute.xlu0 %1522  ;;  %4788 = vmatprep.subr.mxu0 %v312_v0 }
 0x809   :  { %v1536_v50 = vsel %vm557_vm3, %v1017_v41, %v1523_v45  ;;  %4789 = vmatpush3.msra.mxu0 %v312_v0  ;;  %v311_v45 = vld [vmem:[%s6646_s3 + $0x40] sm:$0xff] }
 0x80a   :  { %4781 = vmatprep.mubr.msk.f32.mxu1 %vm331_vm1, %v1536_v50  ;;  %4790 = vmatprep.subr.mxu0 %v311_v45 }
 0x80b   :  { %4791 = vmatpush3.msra.mxu0 %v311_v45 }
 0x80c   :  { %v1525_v1 = vpop.permute.xlu1 %1524 }
 0x80d   :  { %v1537_v2 = vsel %vm557_vm3, %v1022_v22, %v1525_v1 }
 0x80e   :  { %4782 = vmatmul.mubr.msk.f32.gmra.mxu1 %vm331_vm1, %v1537_v2 }
 0x8b9   :  { %v4777_v7 = vpop.f32.mrf.mxu1 }
 0x8ba   :  { %v1632_v58 = vadd.f32 %v4777_v7, %v4250_v4 }
 0x8bb   :  { %v1626_v8 = vpop.f32.mrf.mxu1 }
 0x8bc   :  { %v5899_v9 = vadd.f32 %v1632_v58, %v5441_v47  ;;  %v1627_v54 = vadd.f32 %v4250_v4, %v1626_v8 }
 0x8be   :  { %v5902_v55 = vadd.f32 %v1627_v54, %v5444_v57  ;;  %v1664_v12 = vsel %vm331_vm1, %v5899_v9, 0.0 }
 0x8bf   :  { %1665 = vadd.xlane.f32.xlu1 %v1664_v12 }
 0x8c0   :  { %v1661_v14 = vsel %vm331_vm1, %v5902_v55, 0.0 }
 0x8c1   :  { %1662 = vadd.xlane.f32.xlu0 %v1661_v14 }
 0x8c6   :  { %v4780_v51 = vpop.f32.mrf.mxu1 }
 0x8c7   :  { %v1642_v13 = vadd.f32 %v4780_v51, %v4250_v4  ;;  %v4257_v51 = vld [vmem:[%s6647_s4 + $0x2] ss:$0 sm:$0xff] }
 0x8c8   :  { %v1636_v19 = vpop.f32.mrf.mxu1 }
 0x8c9   :  { %v1637_v20 = vadd.f32 %v4250_v4, %v1636_v19  ;;  %v5912_v47 = vadd.f32 %v1642_v13, %v5454_v5 }
 0x8cb   :  { %v5909_v21 = vadd.f32 %v1637_v20, %v5451_v3  ;;  %v1670_v32 = vsel %vm331_vm1, %v5912_v47, 0.0 }
 0x8cd   :  { %v1667_v57 = vsel %vm331_vm1, %v5909_v21, 0.0 }
 0x8ce   :  { %1668 = vadd.xlane.f32.xlu0 %v1667_v57  ;;  %v4783_v26 = vpop.f32.mrf.mxu1 }
 0x8cf   :  { %v1652_v10 = vadd.f32 %v4783_v26, %v4250_v4 }
 0x8d0   :  { %v1646_v16 = vpop.f32.mrf.mxu1 }
 0x8d1   :  { %v5917_v38 = vadd.f32 %v1652_v10, %v5457_v6  ;;  %v1647_v29 = vadd.f32 %v4250_v4, %v1646_v16 }
 0x8d2   :  { %1671 = vadd.xlane.f32.xlu0 %v1670_v32 }
 0x8d3   :  { %v5922_v3 = vadd.f32 %v1647_v29, %v5464_v52  ;;  %v1676_v5 = vsel %vm331_vm1, %v5917_v38, 0.0 }
 0x8d4   :  { %1677 = vadd.xlane.f32.xlu1 %v1676_v5  ;;  %v4258_v5 = vld [vmem:[%s6647_s4 + $0x3] ss:$0 sm:$0xff] }
 0x8d5   :  { %v1673_v30 = vsel %vm331_vm1, %v5922_v3, 0.0 }
 0x8d6   :  { %1674 = vadd.xlane.f32.xlu0 %v1673_v30 }
 0x948   :  { %v1666_v17 = vpop.xlane.xlu1 %1665 }
 0x949   :  { %v1680_v36 = vmul.f32 0.03125, %v1666_v17 }
 0x94a   :  { %v1663_v6 = vpop.xlane.xlu0 %1662 }
 0x94b   :  { %v1686_v25 = vsub.f32 %v5899_v9, %v1680_v36  ;;  %v1679_v39 = vmul.f32 0.03125, %v1663_v6 }
 0x94d   :  { %v1685_v37 = vsub.f32 %v5902_v55, %v1679_v39  ;;  %v1692_v63 = vmul.f32 %v1686_v25, %v1686_v25 }
 0x94f   :  { %v1700_v52 = vsel %vm331_vm1, %v1692_v63, 0.0  ;;  %v1691_v41 = vmul.f32 %v1685_v37, %v1685_v37 }
 0x950   :  { %1701 = vadd.xlane.f32.xlu1 %v1700_v52 }
 0x951   :  { %v1697_v18 = vsel %vm331_vm1, %v1691_v41, 0.0 }
 0x952   :  { %1698 = vadd.xlane.f32.xlu0 %v1697_v18 }
 0x957   :  { %v1669_v33 = vpop.xlane.xlu0 %1668 }
 0x958   :  { %v1681_v22 = vmul.f32 0.03125, %v1669_v33 }
 0x95a   :  { %v5933_v35 = vsub.f32 %v5909_v21, %v1681_v22 }
 0x95b   :  { %v1672_v44 = vpop.xlane.xlu0 %1671 }
 0x95c   :  { %v1682_v53 = vmul.f32 0.03125, %v1672_v44  ;;  %v1693_v48 = vmul.f32 %v5933_v35, %v5933_v35 }
 0x95d   :  { %v1678_v15 = vpop.xlane.xlu1 %1677 }
 0x95e   :  { %v5938_v49 = vsub.f32 %v5912_v47, %v1682_v53  ;;  %v1684_v28 = vmul.f32 0.03125, %v1678_v15  ;;  %v1703_v42 = vsel %vm331_vm1, %v1693_v48, 0.0 }
 0x95f   :  { %1704 = vadd.xlane.f32.xlu0 %v1703_v42  ;;  %v1675_v43 = vpop.xlane.xlu0 %1674 }
 0x960   :  { %v5942_v40 = vsub.f32 %v5917_v38, %v1684_v28  ;;  %v1683_v59 = vmul.f32 0.03125, %v1675_v43  ;;  %v1694_v46 = vmul.f32 %v5938_v49, %v5938_v49 }
 0x962   :  { %v5947_v27 = vsub.f32 %v5922_v3, %v1683_v59  ;;  %v1706_v24 = vsel %vm331_vm1, %v1694_v46, 0.0  ;;  %v1696_v23 = vmul.f32 %v5942_v40, %v5942_v40 }
 0x963   :  { %1707 = vadd.xlane.f32.xlu1 %v1706_v24  ;;  %v319_v24 = vld [vmem:[%s6646_s3 + $0x80] sm:$0xff] }
 0x964   :  { %v1695_v56 = vmul.f32 %v5947_v27, %v5947_v27  ;;  %v1712_v60 = vsel %vm331_vm1, %v1696_v23, 0.0  ;;  %v318_v23 = vld [vmem:[%s6646_s3 + $0x78] sm:$0xff] }
 0x966   :  { %v1709_v34 = vsel %vm331_vm1, %v1695_v56, 0.0  ;;  %v317_v56 = vld [vmem:[%s6646_s3 + $0x70] sm:$0xff] }
 0x967   :  { %1713 = vadd.xlane.f32.xlu1 %v1712_v60  ;;  %1710 = vadd.xlane.f32.xlu0 %v1709_v34  ;;  %v316_v60 = vld [vmem:[%s6646_s3 + $0x68] sm:$0xff]  ;;  %v315_v34 = vld [vmem:[%s6646_s3 + $0x60] sm:$0xff] }
 0x9d9   :  { %v1702_v50 = vpop.xlane.xlu1 %1701 }
 0x9da   :  { %v1716_v1 = vmul.f32 0.03125, %v1702_v50 }
 0x9db   :  { %v1699_v2 = vpop.xlane.xlu0 %1698 }
 0x9dc   :  { %v1722_v4 = vadd.f32 1e-05, %v1716_v1  ;;  %v1715_v7 = vmul.f32 0.03125, %v1699_v2 }
 0x9de   :  { %5147 = vrsqrt.f32 %v1722_v4  ;;  %v1721_v58 = vadd.f32 1e-05, %v1715_v7 }
 0x9e0   :  { %5149 = vrsqrt.f32 %v1721_v58 }
 0x9e8   :  { %v1705_v8 = vpop.xlane.xlu0 %1704 }
 0x9e9   :  { %v1717_v54 = vmul.f32 0.03125, %v1705_v8 }
 0x9eb   :  { %v5148_v12 = vpop.eup %5147  ;;  %v1723_v14 = vadd.f32 1e-05, %v1717_v54 }
 0x9ec   :  { %v1734_v19 = vmul.f32 %v5148_v12, %v1686_v25  ;;  %v1708_v13 = vpop.xlane.xlu1 %1707 }
 0x9ed   :  { %v5150_v20 = vpop.eup %5149  ;;  %5151 = vrsqrt.f32 %v1723_v14  ;;  %v1718_v57 = vmul.f32 0.03125, %v1708_v13 }
 0x9ee   :  { %v1733_v26 = vmul.f32 %v5150_v20, %v1685_v37  ;;  %v1744_v10 = vmul.f32 %v4257_v51, %v1734_v19 }
 0x9ef   :  { %v1724_v16 = vadd.f32 1e-05, %v1718_v57 }
 0x9f0   :  { %v1714_v29 = vpop.xlane.xlu1 %1713  ;;  %v1711_v32 = vpop.xlane.xlu0 %1710  ;;  %v1743_v30 = vmul.f32 %v4257_v51, %v1733_v26  ;;  %v1754_v63 = vadd.f32 %v4258_v5, %v1744_v10 }
 0x9f1   :  { %5153 = vrsqrt.f32 %v1724_v16  ;;  %v1720_v17 = vmul.f32 0.03125, %v1714_v29  ;;  %v1719_v36 = vmul.f32 0.03125, %v1711_v32 }
 0x9f2   :  { %v1753_v6 = vadd.f32 %v4258_v5, %v1743_v30 }
 0x9f3   :  { %v1726_v39 = vadd.f32 1e-05, %v1720_v17  ;;  %v1725_v25 = vadd.f32 1e-05, %v1719_v36 }
 0x9f4   :  { %4792 = vmatprep.mubr.msk.f32.mxu0 %vm331_vm1, %v1753_v6 }
 0x9f5   :  { %5155 = vrsqrt.f32 %v1726_v39  ;;  %4793 = vmatmul.mubr.msk.f32.vlgmr.msra.gmra.mxu0 %vm331_vm1, %v1754_v63 }
 0x9f6   :  { %5157 = vrsqrt.f32 %v1725_v25 }
 0x9fa   :  { %v5152_v37 = vpop.eup %5151 }
 0x9fb   :  { %v1735_v52 = vmul.f32 %v5152_v37, %v5933_v35 }
 0x9fd   :  { %v1745_v41 = vmul.f32 %v4257_v51, %v1735_v52 }
 0x9fe   :  { %v5154_v18 = vpop.eup %5153 }
 0x9ff   :  { %v1755_v33 = vadd.f32 %v4258_v5, %v1745_v41  ;;  %v1736_v22 = vmul.f32 %v5154_v18, %v5938_v49  ;;  %v322_v49 = vld [vmem:[%s6646_s3 + $0x98] sm:$0xff] }
 0xa00   :  { %4801 = vmatprep.subr.mxu1 %v322_v49 }
 0xa01   :  { %4795 = vmatprep.mubr.msk.f32.mxu0 %vm331_vm1, %v1755_v33  ;;  %v1746_v44 = vmul.f32 %v4257_v51, %v1736_v22  ;;  %4802 = vmatpush3.msra.mxu1 %v322_v49 }
 0xa02   :  { %v5156_v53 = vpop.eup %5155 }
 0xa03   :  { %v5158_v48 = vpop.eup %5157  ;;  %v1756_v15 = vadd.f32 %v4258_v5, %v1746_v44  ;;  %v1738_v28 = vmul.f32 %v5156_v53, %v5942_v40  ;;  %v321_v40 = vld [vmem:[%s6646_s3 + $0x90] sm:$0xff] }
 0xa04   :  { %v1737_v42 = vmul.f32 %v5158_v48, %v5947_v27  ;;  %4803 = vmatprep.subr.mxu1 %v321_v40  ;;  %v320_v27 = vld [vmem:[%s6646_s3 + $0x88] sm:$0xff] }
 0xa05   :  { %4796 = vmatmul.mubr.msk.f32.gmra.mxu0 %vm331_vm1, %v1756_v15  ;;  %v1748_v43 = vmul.f32 %v4257_v51, %v1738_v28  ;;  %4804 = vmatpush3.msra.mxu1 %v321_v40 }
 0xa06   :  { %v1747_v59 = vmul.f32 %v4257_v51, %v1737_v42  ;;  %4805 = vmatprep.subr.mxu1 %v320_v27 }
 0xa07   :  { %v1758_v35 = vadd.f32 %v4258_v5, %v1748_v43  ;;  %4806 = vmatpush3.msra.mxu1 %v320_v27 }
 0xa08   :  { %v1757_v46 = vadd.f32 %v4258_v5, %v1747_v59  ;;  %4807 = vmatprep.subr.mxu1 %v319_v24 }
 0xa09   :  { %4808 = vmatpush3.msra.mxu1 %v319_v24 }
 0xa0a   :  { %4798 = vmatprep.mubr.msk.f32.mxu0 %vm331_vm1, %v1757_v46  ;;  %4809 = vmatprep.subr.mxu1 %v318_v23 }
 0xa0b   :  { %4799 = vmatmul.mubr.msk.f32.gmra.mxu0 %vm331_vm1, %v1758_v35  ;;  %4810 = vmatpush3.msra.mxu1 %v318_v23 }
 0xa0c   :  { %4811 = vmatprep.subr.mxu1 %v317_v56 }
 0xa0d   :  { %4812 = vmatpush3.msra.mxu1 %v317_v56 }
 0xa0e   :  { %4813 = vmatprep.subr.mxu1 %v316_v60 }
 0xa0f   :  { %4814 = vmatpush3.msra.mxu1 %v316_v60 }
 0xa10   :  { %4815 = vmatprep.subr.mxu1 %v315_v34 }
 0xa11   :  { %4816 = vmatpush3.msra.mxu1 %v315_v34 }
 0xa12   :  { %4843 = vmatprep.subr.mxu1 %v5256_v31 }
 0xab5   :  { %v4794_v62 = vpop.f32.mrf.mxu0 }
 0xab6   :  { %v1853_v0 = vadd.f32 %v4794_v62, %v4259_v61 }
 0xab7   :  { %v1847_v45 = vpop.f32.mrf.mxu0 }
 0xab8   :  { %v1877_v50 = vmul.f32 %v1853_v0, %v1853_v0  ;;  %v1848_v1 = vadd.f32 %v4259_v61, %v1847_v45 }
 0xaba   :  { %v1883_v2 = vmul.f32 %v1877_v50, %v1853_v0  ;;  %v1876_v4 = vmul.f32 %v1848_v1, %v1848_v1 }
 0xabc   :  { %v1889_v7 = vmul.f32 0.044715, %v1883_v2  ;;  %v1882_v58 = vmul.f32 %v1876_v4, %v1848_v1 }
 0xabe   :  { %v1895_v8 = vadd.f32 %v1889_v7, %v1853_v0  ;;  %v1888_v54 = vmul.f32 0.044715, %v1882_v58 }
 0xac0   :  { %v1901_v12 = vmul.f32 0.7978846, %v1895_v8  ;;  %v1894_v14 = vadd.f32 %v1888_v54, %v1848_v1  ;;  %v4266_v54 = vld [vmem:[%s6647_s4 + $0x5] ss:$0 sm:$0xff] }
 0xac2   :  { %5159 = vtanh.f32 %v1901_v12  ;;  %v1900_v51 = vmul.f32 0.7978846, %v1894_v14 }
 0xac4   :  { %5161 = vtanh.f32 %v1900_v51 }
 0xac5   :  { %v4797_v19 = vpop.f32.mrf.mxu0 }
 0xac6   :  { %v1863_v13 = vadd.f32 %v4797_v19, %v4259_v61 }
 0xac7   :  { %v1857_v20 = vpop.f32.mrf.mxu0 }
 0xac8   :  { %v1879_v57 = vmul.f32 %v1863_v13, %v1863_v13  ;;  %v1858_v26 = vadd.f32 %v4259_v61, %v1857_v20 }
 0xaca   :  { %v1885_v10 = vmul.f32 %v1879_v57, %v1863_v13  ;;  %v1878_v16 = vmul.f32 %v1858_v26, %v1858_v26 }
 0xacb   :  { %v4800_v29 = vpop.f32.mrf.mxu0 }
 0xacc   :  { %v1891_v32 = vmul.f32 0.044715, %v1885_v10  ;;  %v1884_v5 = vmul.f32 %v1878_v16, %v1858_v26  ;;  %v1873_v30 = vadd.f32 %v4800_v29, %v4259_v61 }
 0xacd   :  { %v1867_v17 = vpop.f32.mrf.mxu0 }
 0xace   :  { %v1897_v36 = vadd.f32 %v1891_v32, %v1863_v13  ;;  %v1890_v6 = vmul.f32 0.044715, %v1884_v5  ;;  %v1881_v39 = vmul.f32 %v1873_v30, %v1873_v30  ;;  %v1868_v25 = vadd.f32 %v4259_v61, %v1867_v17 }
 0xacf   :  { %v5160_v63 = vpop.eup %5159 }
 0xad0   :  { %v1913_v37 = vadd.f32 1.0, %v5160_v63  ;;  %v1903_v52 = vmul.f32 0.7978846, %v1897_v36  ;;  %v1896_v41 = vadd.f32 %v1890_v6, %v1858_v26  ;;  %v1887_v18 = vmul.f32 %v1881_v39, %v1873_v30 }
 0xad1   :  { %v5162_v33 = vpop.eup %5161  ;;  %v1880_v22 = vmul.f32 %v1868_v25, %v1868_v25 }
 0xad2   :  { %5163 = vtanh.f32 %v1903_v52  ;;  %v1902_v44 = vmul.f32 0.7978846, %v1896_v41  ;;  %v1893_v53 = vmul.f32 0.044715, %v1887_v18  ;;  %v1912_v15 = vadd.f32 1.0, %v5162_v33 }
 0xad3   :  { %v1886_v48 = vmul.f32 %v1880_v22, %v1868_v25  ;;  %v1919_v28 = vmul.f32 0.5, %v1913_v37 }
 0xad4   :  { %5165 = vtanh.f32 %v1902_v44  ;;  %v1899_v42 = vadd.f32 %v1893_v53, %v1873_v30  ;;  %v1918_v59 = vmul.f32 0.5, %v1912_v15 }
 0xad5   :  { %v1892_v43 = vmul.f32 0.044715, %v1886_v48  ;;  %v1925_v40 = vmul.f32 %v1919_v28, %v1853_v0 }
 0xad6   :  { %v1905_v35 = vmul.f32 0.7978846, %v1899_v42  ;;  %v1924_v49 = vmul.f32 %v1918_v59, %v1848_v1 }
 0xad7   :  { %v1898_v46 = vadd.f32 %v1892_v43, %v1868_v25 }
 0xad8   :  { %5167 = vtanh.f32 %v1905_v35  ;;  %4817 = vmatprep.mubr.msk.f32.mxu1 %vm50_vm0, %v1924_v49 }
 0xad9   :  { %v1904_v27 = vmul.f32 0.7978846, %v1898_v46  ;;  %4818 = vmatmul.mubr.msk.f32.vlgmr.msra.gmra.mxu1 %vm50_vm0, %v1925_v40 }
 0xadb   :  { %5169 = vtanh.f32 %v1904_v27 }
 0xadf   :  { %v5164_v24 = vpop.eup %5163 }
 0xae0   :  { %v1915_v23 = vadd.f32 1.0, %v5164_v24 }
 0xae1   :  { %v5166_v56 = vpop.eup %5165 }
 0xae2   :  { %v1914_v60 = vadd.f32 1.0, %v5166_v56  ;;  %v1921_v34 = vmul.f32 0.5, %v1915_v23 }
 0xae4   :  { %v1920_v61 = vmul.f32 0.5, %v1914_v60  ;;  %v1927_v2 = vmul.f32 %v1921_v34, %v1863_v13 }
 0xae5   :  { %v5168_v62 = vpop.eup %5167 }
 0xae6   :  { %v1926_v45 = vmul.f32 %v1920_v61, %v1858_v26  ;;  %v1917_v50 = vadd.f32 1.0, %v5168_v62 }
 0xae8   :  { %v5170_v4 = vpop.eup %5169  ;;  %4820 = vmatprep.mubr.msk.f32.mxu1 %vm50_vm0, %v1926_v45  ;;  %v1923_v1 = vmul.f32 0.5, %v1917_v50 }
 0xae9   :  { %4821 = vmatmul.mubr.msk.f32.gmra.mxu1 %vm50_vm0, %v1927_v2  ;;  %v1916_v0 = vadd.f32 1.0, %v5170_v4  ;;  %v4276_v2 = vld [vmem:[%s6646_s3 + $0xb8] sm:$0xff]  ;;  %v4275_v4 = vld [vmem:[%s6646_s3 + $0xb0] sm:$0xff] }
 0xaea   :  { %v1929_v8 = vmul.f32 %v1923_v1, %v1873_v30  ;;  %4826 = vmatprep.subr.mxu0 %v4276_v2  ;;  %v4273_v1 = vld [vmem:[%s6646_s3 + $0xa0] sm:$0xff] }
 0xaeb   :  { %v1922_v7 = vmul.f32 0.5, %v1916_v0  ;;  %4827 = vmatpush3.msra.mxu0 %v4276_v2  ;;  %v4274_v0 = vld [vmem:[%s6646_s3 + $0xa8] sm:$0xff] }
 0xaec   :  { %4828 = vmatprep.subr.mxu0 %v4275_v4 }
 0xaed   :  { %v1928_v58 = vmul.f32 %v1922_v7, %v1868_v25  ;;  %4829 = vmatpush3.msra.mxu0 %v4275_v4 }
 0xaee   :  { %4830 = vmatprep.subr.mxu0 %v4274_v0 }
 0xaef   :  { %4823 = vmatprep.mubr.msk.f32.mxu1 %vm50_vm0, %v1928_v58  ;;  %4831 = vmatpush3.msra.mxu0 %v4274_v0 }
 0xaf0   :  { %4824 = vmatmul.mubr.msk.f32.gmra.mxu1 %vm50_vm0, %v1929_v8  ;;  %4832 = vmatprep.subr.mxu0 %v4273_v1 }
 0xaf1   :  { %4849 = vmatprep.mubr.msk.f32.mxu1 %vm5257_vm2, %v5256_v31  ;;  %4833 = vmatpush3.msra.mxu0 %v4273_v1 }
 0xaf2   :  { %4858 = vmatprep.subr.mxu0 %v5256_v31 }
 0xb99   :  { %v4819_v12 = vpop.f32.mrf.mxu1 }
 0xb9a   :  { %v2024_v14 = vadd.f32 %v4819_v12, %v4266_v54 }
 0xb9b   :  { %v2018_v51 = vpop.f32.mrf.mxu1 }
 0xb9c   :  { %v6024_v19 = vadd.f32 %v2024_v14, %v5899_v9  ;;  %v2019_v13 = vadd.f32 %v4266_v54, %v2018_v51 }
 0xb9e   :  { %v6027_v20 = vadd.f32 %v2019_v13, %v5902_v55  ;;  %v2086_v57 = vsel %vm331_vm1, %v6024_v19, 0.0 }
 0xb9f   :  { %2087 = vadd.xlane.f32.xlu1 %v2086_v57 }
 0xba0   :  { %v2083_v26 = vsel %vm331_vm1, %v6027_v20, 0.0 }
 0xba1   :  { %2084 = vadd.xlane.f32.xlu0 %v2083_v26 }
 0xba9   :  { %v4822_v10 = vpop.f32.mrf.mxu1 }
 0xbaa   :  { %v2034_v16 = vadd.f32 %v4822_v10, %v4266_v54 }
 0xbab   :  { %v2028_v29 = vpop.f32.mrf.mxu1 }
 0xbac   :  { %v6034_v32 = vadd.f32 %v2034_v16, %v5912_v47  ;;  %v2029_v9 = vadd.f32 %v4266_v54, %v2028_v29  ;;  %v4301_v29 = vld [vmem:[%s6647_s4 + $0x8] ss:$0 sm:$0xff] }
 0xbae   :  { %v6037_v5 = vadd.f32 %v2029_v9, %v5909_v21  ;;  %v2092_v55 = vsel %vm331_vm1, %v6034_v32, 0.0 }
 0xbaf   :  { %2093 = vadd.xlane.f32.xlu1 %v2092_v55 }
 0xbb0   :  { %v4825_v30 = vpop.f32.mrf.mxu1  ;;  %v2089_v17 = vsel %vm331_vm1, %v6037_v5, 0.0 }
 0xbb1   :  { %v2044_v36 = vadd.f32 %v4825_v30, %v4266_v54  ;;  %2090 = vadd.xlane.f32.xlu0 %v2089_v17 }
 0xbb2   :  { %v2038_v6 = vpop.f32.mrf.mxu1 }
 0xbb3   :  { %v6044_v39 = vadd.f32 %v2044_v36, %v5917_v38  ;;  %v2039_v47 = vadd.f32 %v4266_v54, %v2038_v6 }
 0xbb5   :  { %v6047_v25 = vadd.f32 %v2039_v47, %v5922_v3  ;;  %v2098_v21 = vsel %vm331_vm1, %v6044_v39, 0.0 }
 0xbb6   :  { %2099 = vadd.xlane.f32.xlu1 %v2098_v21  ;;  %v4302_v21 = vld [vmem:[%s6647_s4 + $0x9] ss:$0 sm:$0xff] }
 0xbb7   :  { %v2095_v63 = vsel %vm331_vm1, %v6047_v25, 0.0 }
 0xbb8   :  { %2096 = vadd.xlane.f32.xlu0 %v2095_v63 }
 0xc28   :  { %v2088_v37 = vpop.xlane.xlu1 %2087 }
 0xc29   :  { %v2102_v52 = vmul.f32 0.03125, %v2088_v37 }
 0xc2a   :  { %v2085_v41 = vpop.xlane.xlu0 %2084 }
 0xc2b   :  { %v2108_v18 = vsub.f32 %v6024_v19, %v2102_v52  ;;  %v2101_v33 = vmul.f32 0.03125, %v2085_v41 }
 0xc2d   :  { %v6055_v38 = vsub.f32 %v6027_v20, %v2101_v33  ;;  %v2114_v22 = vmul.f32 %v2108_v18, %v2108_v18 }
 0xc2f   :  { %v2122_v3 = vsel %vm331_vm1, %v2114_v22, 0.0  ;;  %v2113_v44 = vmul.f32 %v6055_v38, %v6055_v38 }
 0xc30   :  { %2123 = vadd.xlane.f32.xlu1 %v2122_v3 }
 0xc31   :  { %v2119_v53 = vsel %vm331_vm1, %v2113_v44, 0.0 }
 0xc32   :  { %2120 = vadd.xlane.f32.xlu0 %v2119_v53 }
 0xc38   :  { %v2094_v48 = vpop.xlane.xlu1 %2093 }
 0xc39   :  { %v2104_v15 = vmul.f32 0.03125, %v2094_v48 }
 0xc3a   :  { %v2091_v28 = vpop.xlane.xlu0 %2090 }
 0xc3b   :  { %v6062_v42 = vsub.f32 %v6034_v32, %v2104_v15  ;;  %v2103_v43 = vmul.f32 0.03125, %v2091_v28 }
 0xc3d   :  { %v6065_v59 = vsub.f32 %v6037_v5, %v2103_v43  ;;  %v2116_v35 = vmul.f32 %v6062_v42, %v6062_v42 }
 0xc3f   :  { %v2100_v46 = vpop.xlane.xlu1 %2099  ;;  %v2128_v49 = vsel %vm331_vm1, %v2116_v35, 0.0  ;;  %v2115_v40 = vmul.f32 %v6065_v59, %v6065_v59 }
 0xc40   :  { %v2106_v27 = vmul.f32 0.03125, %v2100_v46  ;;  %2129 = vadd.xlane.f32.xlu1 %v2128_v49 }
 0xc41   :  { %v2097_v24 = vpop.xlane.xlu0 %2096  ;;  %v2125_v23 = vsel %vm331_vm1, %v2115_v40, 0.0 }
 0xc42   :  { %v6074_v56 = vsub.f32 %v6044_v39, %v2106_v27  ;;  %v2105_v60 = vmul.f32 0.03125, %v2097_v24  ;;  %2126 = vadd.xlane.f32.xlu0 %v2125_v23 }
 0xc44   :  { %v6077_v34 = vsub.f32 %v6047_v25, %v2105_v60  ;;  %v2118_v61 = vmul.f32 %v6074_v56, %v6074_v56 }
 0xc46   :  { %v2134_v62 = vsel %vm331_vm1, %v2118_v61, 0.0  ;;  %v2117_v45 = vmul.f32 %v6077_v34, %v6077_v34 }
 0xc47   :  { %2135 = vadd.xlane.f32.xlu1 %v2134_v62 }
 0xc48   :  { %v2131_v50 = vsel %vm331_vm1, %v2117_v45, 0.0 }
 0xc49   :  { %2132 = vadd.xlane.f32.xlu0 %v2131_v50 }
 0xcb9   :  { %v2124_v7 = vpop.xlane.xlu1 %2123 }
 0xcba   :  { %v2138_v58 = vmul.f32 0.03125, %v2124_v7 }
 0xcbb   :  { %v2121_v8 = vpop.xlane.xlu0 %2120 }
 0xcbc   :  { %v2144_v54 = vadd.f32 1e-05, %v2138_v58  ;;  %v2137_v12 = vmul.f32 0.03125, %v2121_v8 }
 0xcbe   :  { %5171 = vrsqrt.f32 %v2144_v54  ;;  %v2143_v14 = vadd.f32 1e-05, %v2137_v12 }
 0xcc0   :  { %5173 = vrsqrt.f32 %v2143_v14 }
 0xcc9   :  { %v2130_v51 = vpop.xlane.xlu1 %2129 }
 0xcca   :  { %v2140_v13 = vmul.f32 0.03125, %v2130_v51 }
 0xccb   :  { %v2127_v57 = vpop.xlane.xlu0 %2126  ;;  %v5172_v26 = vpop.eup %5171 }
 0xccc   :  { %v2146_v10 = vadd.f32 1e-05, %v2140_v13  ;;  %v2139_v16 = vmul.f32 0.03125, %v2127_v57  ;;  %v2156_v9 = vmul.f32 %v5172_v26, %v2108_v18 }
 0xccd   :  { %v5174_v55 = vpop.eup %5173 }
 0xcce   :  { %5175 = vrsqrt.f32 %v2146_v10  ;;  %v2145_v30 = vadd.f32 1e-05, %v2139_v16  ;;  %v2155_v17 = vmul.f32 %v5174_v55, %v6055_v38  ;;  %v2166_v36 = vmul.f32 %v4301_v29, %v2156_v9 }
 0xcd0   :  { %5177 = vrsqrt.f32 %v2145_v30  ;;  %v2136_v6 = vpop.xlane.xlu1 %2135  ;;  %v2165_v63 = vmul.f32 %v4301_v29, %v2155_v17  ;;  %v2176_v22 = vadd.f32 %v4302_v21, %v2166_v36 }
 0xcd1   :  { %v2142_v47 = vmul.f32 0.03125, %v2136_v6 }
 0xcd2   :  { %v2133_v37 = vpop.xlane.xlu0 %2132  ;;  %v2175_v33 = vadd.f32 %v4302_v21, %v2165_v63 }
 0xcd3   :  { %v2148_v52 = vadd.f32 1e-05, %v2142_v47  ;;  %v2141_v41 = vmul.f32 0.03125, %v2133_v37 }
 0xcd4   :  { %4834 = vmatprep.mubr.msk.f32.mxu0 %vm331_vm1, %v2175_v33 }
 0xcd5   :  { %5179 = vrsqrt.f32 %v2148_v52  ;;  %v2147_v18 = vadd.f32 1e-05, %v2141_v41  ;;  %4835 = vmatmul.mubr.msk.f32.vlgmr.msra.gmra.mxu0 %vm331_vm1, %v2176_v22 }
 0xcd7   :  { %5181 = vrsqrt.f32 %v2147_v18 }
 0xcdb   :  { %v5176_v38 = vpop.eup %5175 }
 0xcdc   :  { %v2158_v3 = vmul.f32 %v5176_v38, %v6062_v42 }
 0xcdd   :  { %v5178_v44 = vpop.eup %5177 }
 0xcde   :  { %v2157_v53 = vmul.f32 %v5178_v44, %v6065_v59  ;;  %v2168_v48 = vmul.f32 %v4301_v29, %v2158_v3  ;;  %v4303_v59 = vld [vmem:[%s6647_s4 + $0xf] ss:$0 sm:$0xff] }
 0xce0   :  { %v2167_v15 = vmul.f32 %v4301_v29, %v2157_v53  ;;  %v2178_v35 = vadd.f32 %v4302_v21, %v2168_v48 }
 0xce2   :  { %v5180_v28 = vpop.eup %5179  ;;  %v2177_v43 = vadd.f32 %v4302_v21, %v2167_v15 }
 0xce3   :  { %v2160_v46 = vmul.f32 %v5180_v28, %v6074_v56 }
 0xce4   :  { %v5182_v49 = vpop.eup %5181  ;;  %4837 = vmatprep.mubr.msk.f32.mxu0 %vm331_vm1, %v2177_v43 }
 0xce5   :  { %4838 = vmatmul.mubr.msk.f32.gmra.mxu0 %vm331_vm1, %v2178_v35  ;;  %v2159_v40 = vmul.f32 %v5182_v49, %v6077_v34  ;;  %v2170_v27 = vmul.f32 %v4301_v29, %v2160_v46 }
 0xce7   :  { %v2169_v24 = vmul.f32 %v4301_v29, %v2159_v40  ;;  %v2180_v23 = vadd.f32 %v4302_v21, %v2170_v27 }
 0xce9   :  { %v2179_v42 = vadd.f32 %v4302_v21, %v2169_v24 }
 0xceb   :  { %4840 = vmatprep.mubr.msk.f32.mxu0 %vm331_vm1, %v2179_v42 }
 0xcec   :  { %4841 = vmatmul.mubr.msk.f32.gmra.mxu0 %vm331_vm1, %v2180_v23 }
 0xced   :  { %4864 = vmatprep.mubr.msk.f32.mxu0 %vm5257_vm2, %v5256_v31 }
 0xd95   :  { %v4836_v56 = vpop.f32.mrf.mxu0 }
 0xd96   :  { %v6120_v60 = vadd.f32 %v4836_v56, %v4303_v59 }
 0xd97   :  { %v2269_v61 = vpop.f32.mrf.mxu0 }
 0xd98   :  { %2303 = vrot.lane.b32.xlu1 %v6120_v60, %s5255_s28  ;;  %v6124_v34 = vadd.f32 %v4303_v59, %v2269_v61 }
 0xd9c   :  { %2301 = vrot.lane.b32.xlu1 %v6124_v34, %s5255_s28 }
 0xda5   :  { %v4839_v62 = vpop.f32.mrf.mxu0 }
 0xda6   :  { %v6138_v7 = vadd.f32 %v4839_v62, %v4303_v59 }
 0xda7   :  { %v2279_v45 = vpop.f32.mrf.mxu0 }
 0xda8   :  { %v6128_v50 = vadd.f32 %v4303_v59, %v2279_v45 }
 0xdaa   :  { %2305 = vrot.lane.b32.xlu0 %v6128_v50, %s5255_s28 }
 0xdac   :  { %v4842_v2 = vpop.f32.mrf.mxu0 }
 0xdad   :  { %v6132_v4 = vadd.f32 %v4842_v2, %v4303_v59 }
 0xdae   :  { %v2289_v0 = vpop.f32.mrf.mxu0 }
 0xdaf   :  { %v6134_v1 = vadd.f32 %v4303_v59, %v2289_v0  ;;  %2543 = vrot.lane.b32.xlu1 %v6132_v4, %s5255_s28 }
 0xdb1   :  { %2541 = vrot.lane.b32.xlu0 %v6134_v1, %s5255_s28 }
 0xdb3   :  { %2539 = vrot.lane.b32.xlu1 %v6138_v7, %s5255_s28 }
 0xdb5   :  { %2784 = vrot.lane.b32.xlu0 %v6128_v50, %s5258_s7 }
 0xdb7   :  { %2782 = vrot.lane.b32.xlu1 %v6120_v60, %s5258_s7 }
 0xdb9   :  { %2780 = vrot.lane.b32.xlu0 %v6124_v34, %s5258_s7 }
 0xdbb   :  { %2774 = vrot.lane.b32.xlu1 %v6124_v34, %s5259_s8 }
 0xdbd   :  { %3025 = vrot.lane.b32.xlu0 %v6132_v4, %s5258_s7 }
 0xdbf   :  { %2776 = vrot.lane.b32.xlu1 %v6120_v60, %s5259_s8 }
 0xdc1   :  { %3023 = vrot.lane.b32.xlu0 %v6134_v1, %s5258_s7 }
 0xdc3   :  { %2778 = vrot.lane.b32.xlu1 %v6128_v50, %s5259_s8 }
 0xdc5   :  { %3021 = vrot.lane.b32.xlu0 %v6138_v7, %s5258_s7 }
 0xdc7   :  { %3015 = vrot.lane.b32.xlu1 %v6138_v7, %s5259_s8 }
 0xdc9   :  { %2442 = vrot.lane.b32.xlu0 %v6128_v50, %s5260_s0 }
 0xdcb   :  { %2440 = vrot.lane.b32.xlu1 %v6120_v60, %s5260_s0 }
 0xdcd   :  { %2680 = vrot.lane.b32.xlu0 %v6132_v4, %s5260_s0 }
 0xdcf   :  { %2438 = vrot.lane.b32.xlu1 %v6124_v34, %s5260_s0 }
 0xdd3   :  { %2678 = vrot.lane.b32.xlu1 %v6134_v1, %s5260_s0 }
 0xe0a   :  { %v2304_v58 = vpop.permute.xlu1 %2303 }
 0xe0e   :  { %v2302_v54 = vpop.permute.xlu1 %2301 }
 0xe1c   :  { %v2306_v8 = vpop.permute.xlu0 %2305 }
 0xe1d   :  { %4844 = vmatpush3.xpose.msk.msra.mxu1 %vm557_vm3, %v2306_v8 }
 0xe1e   :  { %4845 = vmatprep.subr.mxu1 %v5256_v31 }
 0xe21   :  { %v2544_v12 = vpop.permute.xlu1 %2543  ;;  %4846 = vmatpush3.xpose.msk.msra.mxu1 %vm557_vm3, %v2304_v58 }
 0xe22   :  { %4847 = vmatprep.subr.mxu1 %v5256_v31 }
 0xe23   :  { %v2542_v14 = vpop.permute.xlu0 %2541 }
 0xe25   :  { %v2540_v51 = vpop.permute.xlu1 %2539  ;;  %4848 = vmatpush3.xpose.msk.msra.mxu1 %vm557_vm3, %v2302_v54 }
 0xe26   :  { %4873 = vmatprep.subr.mxu1 %v5256_v31 }
 0xe27   :  { %v2785_v13 = vpop.permute.xlu0 %2784 }
 0xe28   :  { %4850 = vmatmul.mubr.msk.f32.vlgmr.msra.gmra.mxu1 %vm557_vm3, %v6124_v34 }
 0xe29   :  { %v2783_v57 = vpop.permute.xlu1 %2782  ;;  %4874 = vmatpush3.xpose.msk.msra.mxu1 %vm557_vm3, %v2544_v12  ;;  %4852 = vmatprep.mubr.msk.f32.mxu1 %vm5257_vm2, %v5256_v31 }
 0xe2a   :  { %4875 = vmatprep.subr.mxu1 %v5256_v31 }
 0xe2b   :  { %v2781_v26 = vpop.permute.xlu0 %2780 }
 0xe2c   :  { %4853 = vmatmul.mubr.msk.f32.gmra.mxu1 %vm557_vm3, %v6120_v60 }
 0xe2d   :  { %v2775_v10 = vpop.permute.xlu1 %2774  ;;  %4876 = vmatpush3.xpose.msk.msra.mxu1 %vm557_vm3, %v2542_v14  ;;  %4855 = vmatprep.mubr.msk.f32.mxu1 %vm5257_vm2, %v5256_v31 }
 0xe2e   :  { %4877 = vmatprep.subr.mxu1 %v5256_v31 }
 0xe2f   :  { %v3026_v16 = vpop.permute.xlu0 %3025 }
 0xe30   :  { %4856 = vmatmul.mubr.msk.f32.gmra.mxu1 %vm557_vm3, %v6128_v50 }
 0xe31   :  { %v2777_v29 = vpop.permute.xlu1 %2776  ;;  %4878 = vmatpush3.xpose.msk.msra.mxu1 %vm557_vm3, %v2540_v51  ;;  %4879 = vmatprep.mubr.msk.f32.mxu1 %vm5257_vm2, %v5256_v31 }
 0xe32   :  { %4903 = vmatprep.subr.mxu1 %v5256_v31 }
 0xe33   :  { %v3024_v9 = vpop.permute.xlu0 %3023 }
 0xe34   :  { %4880 = vmatmul.mubr.msk.f32.vlgmr.msra.gmra.mxu1 %vm557_vm3, %v6138_v7 }
 0xe35   :  { %v2779_v55 = vpop.permute.xlu1 %2778  ;;  %4904 = vmatpush3.xpose.msk.msra.mxu1 %vm557_vm3, %v2785_v13  ;;  %4882 = vmatprep.mubr.msk.f32.mxu1 %vm5257_vm2, %v5256_v31 }
 0xe36   :  { %4905 = vmatprep.subr.mxu1 %v5256_v31 }
 0xe37   :  { %v3022_v30 = vpop.permute.xlu0 %3021 }
 0xe38   :  { %4883 = vmatmul.mubr.msk.f32.gmra.mxu1 %vm557_vm3, %v6134_v1 }
 0xe39   :  { %v3016_v17 = vpop.permute.xlu1 %3015  ;;  %4906 = vmatpush3.xpose.msk.msra.mxu1 %vm557_vm3, %v2783_v57  ;;  %4885 = vmatprep.mubr.msk.f32.mxu1 %vm5257_vm2, %v5256_v31 }
 0xe3a   :  { %4907 = vmatprep.subr.mxu1 %v5256_v31 }
 0xe3b   :  { %v2443_v36 = vpop.permute.xlu0 %2442 }
 0xe3c   :  { %4859 = vmatpush3.msra.mxu0 %v2443_v36  ;;  %4886 = vmatmul.mubr.msk.f32.gmra.mxu1 %vm557_vm3, %v6132_v4 }
 0xe3d   :  { %v2441_v6 = vpop.permute.xlu1 %2440  ;;  %4860 = vmatprep.subr.mxu0 %v5256_v31  ;;  %4908 = vmatpush3.xpose.msk.msra.mxu1 %vm557_vm3, %v2781_v26 }
 0xe3e   :  { %4861 = vmatpush3.msra.mxu0 %v2441_v6  ;;  %4909 = vmatprep.mubr.msk.f32.mxu1 %vm5257_vm2, %v5256_v31 }
 0xe3f   :  { %4862 = vmatprep.subr.mxu0 %v5256_v31  ;;  %4933 = vmatprep.subr.mxu1 %v5256_v31 }
 0xe40   :  { %4910 = vmatmul.mubr.msk.f32.vlgmr.msra.gmra.mxu1 %vm557_vm3, %v2775_v10 }
 0xe41   :  { %v2439_v47 = vpop.permute.xlu1 %2438  ;;  %4934 = vmatpush3.xpose.msk.msra.mxu1 %vm557_vm3, %v3026_v16  ;;  %4912 = vmatprep.mubr.msk.f32.mxu1 %vm5257_vm2, %v5256_v31 }
 0xe42   :  { %4863 = vmatpush3.msra.mxu0 %v2439_v47  ;;  %4935 = vmatprep.subr.mxu1 %v5256_v31 }
 0xe43   :  { %4888 = vmatprep.subr.mxu0 %v5256_v31 }
 0xe44   :  { %4913 = vmatmul.mubr.msk.f32.gmra.mxu1 %vm557_vm3, %v2777_v29 }
 0xe45   :  { %4936 = vmatpush3.xpose.msk.msra.mxu1 %vm557_vm3, %v3024_v9  ;;  %4915 = vmatprep.mubr.msk.f32.mxu1 %vm5257_vm2, %v5256_v31 }
 0xe46   :  { %4937 = vmatprep.subr.mxu1 %v5256_v31 }
 0xe48   :  { %4916 = vmatmul.mubr.msk.f32.gmra.mxu1 %vm557_vm3, %v2779_v55 }
 0xe49   :  { %4938 = vmatpush3.xpose.msk.msra.mxu1 %vm557_vm3, %v3022_v30  ;;  %4939 = vmatprep.mubr.msk.f32.mxu1 %vm5257_vm2, %v5256_v31 }
 0xe4c   :  { %4940 = vmatmul.mubr.msk.f32.vlgmr.msra.gmra.mxu1 %vm557_vm3, %v3016_v17 }
 0xe4d   :  { %4942 = vmatprep.mubr.msk.f32.mxu1 %vm5257_vm2, %v5256_v31 }
 0xee8   :  { %v2385_v21 = vpop.f32.mrf.mxu1 }
 0xee9   :  { %v2399_v63 = vmul.f32 0.25, %v2385_v21  ;;  %v6273_v21 = vpop.permute.xlu0 %2680 }
 0xeea   :  { %v4851_v37 = vpop.f32.mrf.mxu1 }
 0xeeb   :  { %v2402_v52 = vadd.f32 %v2399_v63, %v5669_v11  ;;  %v6275_v63 = vpop.permute.xlu1 %2678 }
 0xeec   :  { %v2390_v41 = vpop.f32.mrf.mxu1 }
 0xeed   :  { %v2400_v33 = vmul.f32 0.25, %v2390_v41  ;;  %v2405_v22 = vsel %vm656_vm5, %v2402_v52, -inf }
 0xeee   :  { %2406 = vmax.xlane.f32.xlu0 %v2405_v22  ;;  %v4854_v18 = vpop.f32.mrf.mxu1 }
 0xeef   :  { %v2403_v38 = vadd.f32 %v2400_v33, %v5669_v11 }
 0xef0   :  { %v2395_v3 = vpop.f32.mrf.mxu1 }
 0xef1   :  { %v2401_v44 = vmul.f32 0.25, %v2395_v3  ;;  %v2408_v53 = vsel %vm656_vm5, %v2403_v38, -inf }
 0xef2   :  { %2409 = vmax.xlane.f32.xlu1 %v2408_v53  ;;  %v4857_v48 = vpop.f32.mrf.mxu1 }
 0xef3   :  { %v2404_v15 = vadd.f32 %v2401_v44, %v5669_v11 }
 0xef4   :  { %v2623_v28 = vpop.f32.mrf.mxu1 }
 0xef5   :  { %v2637_v43 = vmul.f32 0.25, %v2623_v28  ;;  %v2411_v35 = vsel %vm656_vm5, %v2404_v15, -inf }
 0xef6   :  { %2412 = vmax.xlane.f32.xlu0 %v2411_v35  ;;  %v4881_v46 = vpop.f32.mrf.mxu1 }
 0xef7   :  { %v6243_v49 = vadd.f32 %v2637_v43, %v5669_v11 }
 0xef8   :  { %v2628_v40 = vpop.f32.mrf.mxu1 }
 0xef9   :  { %v2638_v27 = vmul.f32 0.25, %v2628_v40  ;;  %v2643_v24 = vsel %vm656_vm5, %v6243_v49, -inf }
 0xefa   :  { %2644 = vmax.xlane.f32.xlu0 %v2643_v24  ;;  %v4884_v42 = vpop.f32.mrf.mxu1 }
 0xefb   :  { %v6248_v23 = vadd.f32 %v2638_v27, %v5669_v11 }
 0xefc   :  { %v2633_v59 = vpop.f32.mrf.mxu1 }
 0xefd   :  { %v2639_v56 = vmul.f32 0.25, %v2633_v59  ;;  %v2646_v61 = vsel %vm656_vm5, %v6248_v23, -inf }
 0xefe   :  { %2647 = vmax.xlane.f32.xlu0 %v2646_v61  ;;  %v4887_v62 = vpop.f32.mrf.mxu1 }
 0xeff   :  { %v6253_v45 = vadd.f32 %v2639_v56, %v5669_v11 }
 0xf00   :  { %v2864_v2 = vpop.f32.mrf.mxu1 }
 0xf01   :  { %v2878_v0 = vmul.f32 0.25, %v2864_v2  ;;  %v2649_v58 = vsel %vm656_vm5, %v6253_v45, -inf }
 0xf02   :  { %2650 = vmax.xlane.f32.xlu1 %v2649_v58  ;;  %v4911_v8 = vpop.f32.mrf.mxu1 }
 0xf03   :  { %v2881_v54 = vadd.f32 %v2878_v0, %v5669_v11 }
 0xf04   :  { %v2869_v12 = vpop.f32.mrf.mxu1 }
 0xf05   :  { %v2879_v14 = vmul.f32 0.25, %v2869_v12  ;;  %v2884_v51 = vsel %vm656_vm5, %v2881_v54, -inf }
 0xf06   :  { %2885 = vmax.xlane.f32.xlu0 %v2884_v51  ;;  %v4914_v13 = vpop.f32.mrf.mxu1 }
 0xf07   :  { %v2882_v57 = vadd.f32 %v2879_v14, %v5669_v11 }
 0xf08   :  { %v2874_v26 = vpop.f32.mrf.mxu1 }
 0xf09   :  { %v2880_v10 = vmul.f32 0.25, %v2874_v26  ;;  %v2887_v16 = vsel %vm656_vm5, %v2882_v57, -inf }
 0xf0a   :  { %2888 = vmax.xlane.f32.xlu1 %v2887_v16  ;;  %v4917_v29 = vpop.f32.mrf.mxu1 }
 0xf0b   :  { %v6262_v9 = vadd.f32 %v2880_v10, %v5669_v11 }
 0xf0c   :  { %v3105_v55 = vpop.f32.mrf.mxu1 }
 0xf0d   :  { %v3119_v30 = vmul.f32 0.25, %v3105_v55  ;;  %v2890_v17 = vsel %vm656_vm5, %v6262_v9, -inf }
 0xf0e   :  { %2891 = vmax.xlane.f32.xlu0 %v2890_v17  ;;  %v4941_v36 = vpop.f32.mrf.mxu1 }
 0xf0f   :  { %v6267_v6 = vadd.f32 %v3119_v30, %v5669_v11 }
 0xf11   :  { %v3125_v47 = vsel %vm656_vm5, %v6267_v6, -inf }
 0xf12   :  { %3126 = vmax.xlane.f32.xlu1 %v3125_v47 }
 0xf24   :  { %2676 = vrot.lane.b32.xlu0 %v6138_v7, %s5260_s0 }
 0xf77   :  { %v2407_v37 = vpop.xlane.xlu0 %2406 }
 0xf78   :  { %v2414_v41 = vsub.f32 %v2402_v52, %v2407_v37 }
 0xf7a   :  { %v2417_v33 = vmul.f32 1.442695, %v2414_v41 }
 0xf7b   :  { %v2410_v22 = vpop.xlane.xlu1 %2409 }
 0xf7c   :  { %5183 = vpow2.f32 %v2417_v33  ;;  %v2415_v18 = vsub.f32 %v2403_v38, %v2410_v22 }
 0xf7e   :  { %v2419_v3 = vmul.f32 1.442695, %v2415_v18 }
 0xf7f   :  { %v2413_v44 = vpop.xlane.xlu0 %2412 }
 0xf80   :  { %5185 = vpow2.f32 %v2419_v3  ;;  %v2416_v53 = vsub.f32 %v2404_v15, %v2413_v44 }
 0xf82   :  { %v2421_v48 = vmul.f32 1.442695, %v2416_v53 }
 0xf83   :  { %v2645_v15 = vpop.xlane.xlu0 %2644 }
 0xf84   :  { %5187 = vpow2.f32 %v2421_v48  ;;  %v2652_v40 = vsub.f32 %v6243_v49, %v2645_v15 }
 0xf86   :  { %v2655_v59 = vmul.f32 1.442695, %v2652_v40 }
 0xf87   :  { %v2648_v27 = vpop.xlane.xlu0 %2647 }
 0xf88   :  { %v2653_v42 = vsub.f32 %v6248_v23, %v2648_v27  ;;  %5189 = vpow2.f32 %v2655_v59 }
 0xf89   :  { %v6277_v28 = vpop.eup %5183 }
 0xf8a   :  { %v2423_v43 = vsel %vm656_vm5, %v6277_v28, 0.0  ;;  %v2657_v2 = vmul.f32 1.442695, %v2653_v42 }
 0xf8b   :  { %2424 = vadd.xlane.f32.xlu0 %v2423_v43  ;;  %v2651_v24 = vpop.xlane.xlu1 %2650 }
 0xf8c   :  { %v2654_v56 = vsub.f32 %v6253_v45, %v2651_v24  ;;  %5191 = vpow2.f32 %v2657_v2 }
 0xf8d   :  { %v6281_v35 = vpop.eup %5185 }
 0xf8e   :  { %v2426_v52 = vsel %vm656_vm5, %v6281_v35, 0.0  ;;  %v2659_v58 = vmul.f32 1.442695, %v2654_v56 }
 0xf8f   :  { %2427 = vadd.xlane.f32.xlu1 %v2426_v52  ;;  %v2886_v61 = vpop.xlane.xlu0 %2885 }
 0xf90   :  { %v2893_v0 = vsub.f32 %v2881_v54, %v2886_v61  ;;  %5193 = vpow2.f32 %v2659_v58 }
 0xf91   :  { %v6285_v46 = vpop.eup %5187 }
 0xf92   :  { %v2429_v38 = vsel %vm656_vm5, %v6285_v46, 0.0  ;;  %v2896_v8 = vmul.f32 1.442695, %v2893_v0 }
 0xf93   :  { %2430 = vadd.xlane.f32.xlu0 %v2429_v38  ;;  %v2889_v62 = vpop.xlane.xlu1 %2888 }
 0xf94   :  { %5195 = vpow2.f32 %v2896_v8 }
 0xf95   :  { %v6296_v49 = vpop.eup %5189 }
 0xf96   :  { %v2661_v23 = vsel %vm656_vm5, %v6296_v49, 0.0 }
 0xf97   :  { %v2892_v10 = vpop.xlane.xlu0 %2891 }
 0xf98   :  { %v2895_v16 = vsub.f32 %v6262_v9, %v2892_v10  ;;  %v4279_v10 = vld [vmem:[%s6646_s3 + $0xd0] sm:$0xff] }
 0xf99   :  { %v6298_v12 = vpop.eup %5191 }
 0xf9a   :  { %v2664_v51 = vsel %vm656_vm5, %v6298_v12, 0.0  ;;  %v2900_v55 = vmul.f32 1.442695, %v2895_v16 }
 0xf9b   :  { %v3127_v29 = vpop.xlane.xlu1 %3126  ;;  %v2677_v37 = vpop.permute.xlu0 %2676 }
 0xf9c   :  { %v3134_v30 = vsub.f32 %v6267_v6, %v3127_v29  ;;  %v4278_v29 = vld [vmem:[%s6646_s3 + $0xc8] sm:$0xff] }
 0xf9d   :  { %v6302_v45 = vpop.eup %5193 }
 0xf9e   :  { %v2667_v14 = vsel %vm656_vm5, %v6302_v45, 0.0  ;;  %v3137_v17 = vmul.f32 1.442695, %v3134_v30  ;;  %v4277_v30 = vld [vmem:[%s6646_s3 + $0xc0] sm:$0xff] }
 0xfa0   :  { %2919 = vrot.lane.b32.xlu1 %v6120_v60, %s5262_s9  ;;  %v2894_v60 = vsub.f32 %v2882_v57, %v2889_v62 }
 0xfa1   :  { %v6304_v54 = vpop.eup %5195 }
 0xfa2   :  { %v2902_v26 = vsel %vm656_vm5, %v6304_v54, 0.0 }
 0xfa9   :  { %2921 = vrot.lane.b32.xlu0 %v6128_v50, %s5262_s9  ;;  %v2898_v50 = vmul.f32 1.442695, %v2894_v60 }
 0xfab   :  { %5197 = vpow2.f32 %v2898_v50 }
 0xfac   :  { %5199 = vpow2.f32 %v2900_v55 }
 0xfad   :  { %5201 = vpow2.f32 %v3137_v17 }
 0xfb8   :  { %v6310_v13 = vpop.eup %5197 }
 0xfb9   :  { %v2905_v57 = vsel %vm656_vm5, %v6310_v13, 0.0  ;;  %v6326_v36 = vpop.eup %5199 }
 0xfba   :  { %v6330_v47 = vpop.eup %5201 }
 0xfbb   :  { %v3143_v9 = vsel %vm656_vm5, %v6330_v47, 0.0 }
 0xfc4   :  { %2662 = vadd.xlane.f32.xlu1 %v2661_v23 }
 0xfc8   :  { %2668 = vadd.xlane.f32.xlu1 %v2667_v14  ;;  %2665 = vadd.xlane.f32.xlu0 %v2664_v51 }
 0xfcc   :  { %2906 = vadd.xlane.f32.xlu0 %v2905_v57  ;;  %2903 = vadd.xlane.f32.xlu1 %v2902_v26  ;;  %v4280_v26 = vld [vmem:[%s6646_s3 + $0xd8] sm:$0xff] }
 0xfcd   :  { %4963 = vmatprep.subr.mxu1 %v4280_v26 }
 0xfce   :  { %4964 = vmatpush3.msra.mxu1 %v4280_v26 }
 0xfcf   :  { %4965 = vmatprep.subr.mxu1 %v4279_v10 }
 0xfd0   :  { %4966 = vmatpush3.msra.mxu1 %v4279_v10 }
 0xfd1   :  { %4967 = vmatprep.subr.mxu1 %v4278_v29 }
 0xfd2   :  { %4968 = vmatpush3.msra.mxu1 %v4278_v29 }
 0xfd3   :  { %4969 = vmatprep.subr.mxu1 %v4277_v30 }
 0xfd4   :  { %4970 = vmatpush3.msra.mxu1 %v4277_v30 }
 0xfdd   :  { %3162 = vrot.lane.b32.xlu1 %v6132_v4, %s5262_s9 }
 0xfe2   :  { %2917 = vrot.lane.b32.xlu0 %v6124_v34, %s5262_s9  ;;  %v2908_v34 = vsel %vm656_vm5, %v6326_v36, 0.0 }
 0xfe6   :  { %3160 = vrot.lane.b32.xlu0 %v6134_v1, %s5262_s9 }
 0xfea   :  { %3017 = vrot.lane.b32.xlu0 %v6134_v1, %s5259_s8 }
0x1001   :  { %2909 = vadd.xlane.f32.xlu1 %v2908_v34 }
0x1005   :  { %3144 = vadd.xlane.f32.xlu1 %v3143_v9 }
0x1014   :  { %v2425_v1 = vpop.xlane.xlu0 %2424 }
0x1015   :  { %5203 = vrcp.f32 %v2425_v1 }
0x1016   :  { %3158 = vrot.lane.b32.xlu1 %v6138_v7, %s5262_s9 }
0x1018   :  { %v2428_v6 = vpop.xlane.xlu1 %2427 }
0x1019   :  { %5205 = vrcp.f32 %v2428_v6 }
0x101a   :  { %3019 = vrot.lane.b32.xlu1 %v6132_v4, %s5259_s8 }
0x101c   :  { %v2431_v41 = vpop.xlane.xlu0 %2430  ;;  %v2920_v3 = vpop.permute.xlu1 %2919 }
0x101d   :  { %5207 = vrcp.f32 %v2431_v41 }
0x1022   :  { %v5204_v33 = vpop.eup %5203 }
0x1023   :  { %v2433_v22 = vmul.f32 %v5204_v33, %v6277_v28 }
0x1025   :  { %4865 = vmatmul.mubr.msk.f32.vlgmr.msra.gmra.mxu0 %vm656_vm5, %v2433_v22 }
0x1026   :  { %v5206_v18 = vpop.eup %5205  ;;  %4889 = vmatpush3.msra.mxu0 %v6273_v21  ;;  %4867 = vmatprep.mubr.msk.f32.mxu0 %vm5257_vm2, %v5256_v31 }
0x1027   :  { %4890 = vmatprep.subr.mxu0 %v5256_v31  ;;  %v2435_v7 = vmul.f32 %v5206_v18, %v6281_v35 }
0x1028   :  { %4891 = vmatpush3.msra.mxu0 %v6275_v63  ;;  %v2922_v63 = vpop.permute.xlu0 %2921 }
0x1029   :  { %4892 = vmatprep.subr.mxu0 %v5256_v31  ;;  %4868 = vmatmul.mubr.msk.f32.gmra.mxu0 %vm656_vm5, %v2435_v7 }
0x102a   :  { %v5208_v4 = vpop.eup %5207  ;;  %4893 = vmatpush3.msra.mxu0 %v2677_v37  ;;  %4870 = vmatprep.mubr.msk.f32.mxu0 %vm5257_vm2, %v5256_v31 }
0x102b   :  { %v2437_v21 = vmul.f32 %v5208_v4, %v6285_v46  ;;  %4918 = vmatprep.subr.mxu0 %v5256_v31 }
0x102d   :  { %4871 = vmatmul.mubr.msk.f32.gmra.mxu0 %vm656_vm5, %v2437_v21 }
0x102e   :  { %4894 = vmatprep.mubr.msk.f32.mxu0 %vm5257_vm2, %v5256_v31 }
0x104d   :  { %v2663_v44 = vpop.xlane.xlu1 %2662 }
0x104e   :  { %5209 = vrcp.f32 %v2663_v44 }
0x1051   :  { %v2669_v53 = vpop.xlane.xlu1 %2668  ;;  %v2666_v48 = vpop.xlane.xlu0 %2665 }
0x1052   :  { %5211 = vrcp.f32 %v2666_v48 }
0x1053   :  { %5213 = vrcp.f32 %v2669_v53 }
0x1055   :  { %v2907_v28 = vpop.xlane.xlu0 %2906  ;;  %v2904_v43 = vpop.xlane.xlu1 %2903 }
0x1056   :  { %5215 = vrcp.f32 %v2904_v43 }
0x1057   :  { %5217 = vrcp.f32 %v2907_v28 }
0x1059   :  { %v2918_v35 = vpop.permute.xlu0 %2917  ;;  %v3163_v62 = vpop.permute.xlu1 %3162 }
0x105b   :  { %v5210_v52 = vpop.eup %5209 }
0x105c   :  { %v2671_v46 = vmul.f32 %v5210_v52, %v6296_v49 }
0x105d   :  { %v3161_v38 = vpop.permute.xlu0 %3160 }
0x105e   :  { %4895 = vmatmul.mubr.msk.f32.vlgmr.msra.gmra.mxu0 %vm656_vm5, %v2671_v46 }
0x105f   :  { %4919 = vmatpush3.msra.mxu0 %v2922_v63  ;;  %4897 = vmatprep.mubr.msk.f32.mxu0 %vm5257_vm2, %v5256_v31  ;;  %v5212_v15 = vpop.eup %5211 }
0x1060   :  { %4920 = vmatprep.subr.mxu0 %v5256_v31  ;;  %v2673_v27 = vmul.f32 %v5212_v15, %v6298_v12  ;;  %v5214_v24 = vpop.eup %5213 }
0x1061   :  { %4921 = vmatpush3.msra.mxu0 %v2920_v3  ;;  %v3018_v40 = vpop.permute.xlu0 %3017  ;;  %v2675_v42 = vmul.f32 %v5214_v24, %v6302_v45 }
0x1062   :  { %4922 = vmatprep.subr.mxu0 %v5256_v31  ;;  %4943 = vmatmul.mubr.msk.f32.gmra.mxu1 %vm557_vm3, %v3018_v40 }
0x1063   :  { %4898 = vmatmul.mubr.msk.f32.gmra.mxu0 %vm656_vm5, %v2673_v27  ;;  %4945 = vmatprep.mubr.msk.f32.mxu1 %vm5257_vm2, %v5256_v31  ;;  %v5216_v59 = vpop.eup %5215 }
0x1064   :  { %4923 = vmatpush3.msra.mxu0 %v2918_v35  ;;  %4900 = vmatprep.mubr.msk.f32.mxu0 %vm5257_vm2, %v5256_v31  ;;  %v2912_v56 = vmul.f32 %v5216_v59, %v6304_v54  ;;  %v5218_v61 = vpop.eup %5217 }
0x1065   :  { %4948 = vmatprep.subr.mxu0 %v5256_v31  ;;  %v2914_v2 = vmul.f32 %v5218_v61, %v6310_v13 }
0x1067   :  { %4901 = vmatmul.mubr.msk.f32.gmra.mxu0 %vm656_vm5, %v2675_v42 }
0x1068   :  { %4924 = vmatprep.mubr.msk.f32.mxu0 %vm5257_vm2, %v5256_v31 }
0x106b   :  { %4925 = vmatmul.mubr.msk.f32.vlgmr.msra.gmra.mxu0 %vm656_vm5, %v2912_v56 }
0x106c   :  { %4949 = vmatpush3.msra.mxu0 %v3163_v62  ;;  %4927 = vmatprep.mubr.msk.f32.mxu0 %vm5257_vm2, %v5256_v31 }
0x106d   :  { %4950 = vmatprep.subr.mxu0 %v5256_v31 }
0x106e   :  { %4951 = vmatpush3.msra.mxu0 %v3161_v38 }
0x106f   :  { %4928 = vmatmul.mubr.msk.f32.gmra.mxu0 %vm656_vm5, %v2914_v2  ;;  %4952 = vmatprep.subr.mxu0 %v5256_v31 }
0x1070   :  { %4930 = vmatprep.mubr.msk.f32.mxu0 %vm5257_vm2, %v5256_v31 }
0x108a   :  { %v2910_v0 = vpop.xlane.xlu1 %2909 }
0x108b   :  { %5219 = vrcp.f32 %v2910_v0 }
0x108e   :  { %v3145_v58 = vpop.xlane.xlu1 %3144 }
0x108f   :  { %5221 = vrcp.f32 %v3145_v58 }
0x1092   :  { %v3159_v60 = vpop.permute.xlu1 %3158 }
0x1093   :  { %4953 = vmatpush3.msra.mxu0 %v3159_v60 }
0x1096   :  { %v3020_v8 = vpop.permute.xlu1 %3019 }
0x1097   :  { %4946 = vmatmul.mubr.msk.f32.gmra.mxu1 %vm557_vm3, %v3020_v8  ;;  %v6429_v8 = vld [vmem:[%s6647_s4 + $0xc] ss:$0 sm:$0xff] }
0x1098   :  { %v5220_v50 = vpop.eup %5219 }
0x1099   :  { %v2916_v49 = vmul.f32 %v5220_v50, %v6326_v36 }
0x109b   :  { %4931 = vmatmul.mubr.msk.f32.gmra.mxu0 %vm656_vm5, %v2916_v49 }
0x109c   :  { %v5222_v12 = vpop.eup %5221  ;;  %4954 = vmatprep.mubr.msk.f32.mxu0 %vm5257_vm2, %v5256_v31 }
0x109d   :  { %v3153_v23 = vmul.f32 %v5222_v12, %v6330_v47 }
0x109f   :  { %4955 = vmatmul.mubr.msk.f32.vlgmr.msra.gmra.mxu0 %vm656_vm5, %v3153_v23 }
0x10a0   :  { %4957 = vmatprep.mubr.msk.f32.mxu0 %vm5257_vm2, %v5256_v31 }
0x10e5   :  { %v2522_v45 = vpop.f32.mrf.mxu0 }
0x10e7   :  { %v4866_v54 = vpop.f32.mrf.mxu0 }
0x10e9   :  { %v2527_v14 = vpop.f32.mrf.mxu0 }
0x10eb   :  { %v4869_v51 = vpop.f32.mrf.mxu0 }
0x10ed   :  { %v2532_v13 = vpop.f32.mrf.mxu0 }
0x10ef   :  { %v4872_v57 = vpop.f32.mrf.mxu0 }
0x111e   :  { %v2760_v16 = vpop.f32.mrf.mxu0 }
0x1120   :  { %v4896_v55 = vpop.f32.mrf.mxu0 }
0x1122   :  { %v3110_v17 = vpop.f32.mrf.mxu1 }
0x1123   :  { %v6404_v36 = vpop.f32.mrf.mxu0  ;;  %v3120_v63 = vmul.f32 0.25, %v3110_v17 }
0x1124   :  { %v4944_v34 = vpop.f32.mrf.mxu1 }
0x1125   :  { %v4899_v47 = vpop.f32.mrf.mxu0  ;;  %v3123_v44 = vadd.f32 %v3120_v63, %v5669_v11  ;;  %v4281_v63 = vld [vmem:[%s6646_s3 + $0xe0] sm:$0xff] }
0x1127   :  { %v6406_v9 = vpop.f32.mrf.mxu0  ;;  %v3128_v53 = vsel %vm656_vm5, %v3123_v44, -inf }
0x1129   :  { %v4902_v37 = vpop.f32.mrf.mxu0 }
0x112b   :  { %v3001_v1 = vpop.f32.mrf.mxu0 }
0x112c   :  { %3262 = vrot.lane.b32.xlu0 %v3001_v1, %s5263_s1 }
0x112d   :  { %v4926_v6 = vpop.f32.mrf.mxu0 }
0x112f   :  { %v3006_v41 = vpop.f32.mrf.mxu0 }
0x1130   :  { %3264 = vrot.lane.b32.xlu1 %v3006_v41, %s5263_s1 }
0x1131   :  { %v4929_v33 = vpop.f32.mrf.mxu0 }
0x1157   :  { %v3115_v22 = vpop.f32.mrf.mxu1 }
0x1158   :  { %v3121_v48 = vmul.f32 0.25, %v3115_v22 }
0x1159   :  { %v4947_v18 = vpop.f32.mrf.mxu1 }
0x115a   :  { %v3124_v28 = vadd.f32 %v3121_v48, %v5669_v11 }
0x115b   :  { %v3011_v7 = vpop.f32.mrf.mxu0 }
0x115c   :  { %3266 = vrot.lane.b32.xlu0 %v3011_v7, %s5263_s1  ;;  %v3131_v43 = vsel %vm656_vm5, %v3124_v28, -inf }
0x115d   :  { %v4932_v4 = vpop.f32.mrf.mxu0 }
0x115f   :  { %v3242_v21 = vpop.f32.mrf.mxu0 }
0x1160   :  { %3268 = vrot.lane.b32.xlu1 %v3242_v21, %s5263_s1  ;;  %v4283_v21 = vld [vmem:[%s6646_s3 + $0xf0] sm:$0xff] }
0x1161   :  { %v4956_v3 = vpop.f32.mrf.mxu0 }
0x1162   :  { %v4282_v3 = vld [vmem:[%s6646_s3 + $0xe8] sm:$0xff] }
0x117b   :  { %3129 = vmax.xlane.f32.xlu0 %v3128_v53 }
0x1184   :  { %3132 = vmax.xlane.f32.xlu1 %v3131_v43 }
0x119e   :  { %v3263_v35 = vpop.permute.xlu0 %3262 }
0x119f   :  { %v3280_v52 = vsel %vm557_vm3, %v2522_v45, %v3263_v35 }
0x11a0   :  { %4971 = vmatprep.mubr.msk.f32.mxu1 %vm331_vm1, %v3280_v52 }
0x11a2   :  { %v3265_v46 = vpop.permute.xlu1 %3264 }
0x11a3   :  { %v3281_v38 = vsel %vm557_vm3, %v2527_v14, %v3265_v46 }
0x11a4   :  { %4972 = vmatmul.mubr.msk.f32.vlgmr.msra.gmra.mxu1 %vm331_vm1, %v3281_v38 }
0x11ce   :  { %v3267_v15 = vpop.permute.xlu0 %3266 }
0x11cf   :  { %v3282_v40 = vsel %vm557_vm3, %v2532_v13, %v3267_v15 }
0x11d0   :  { %4974 = vmatprep.mubr.msk.f32.mxu1 %vm331_vm1, %v3282_v40 }
0x11d2   :  { %v3269_v27 = vpop.permute.xlu1 %3268 }
0x11d3   :  { %v3283_v11 = vsel %vm557_vm3, %v2760_v16, %v3269_v27 }
0x11d4   :  { %4975 = vmatmul.mubr.msk.f32.gmra.mxu1 %vm331_vm1, %v3283_v11 }
0x1204   :  { %v3130_v24 = vpop.xlane.xlu0 %3129 }
0x1205   :  { %v3135_v42 = vsub.f32 %v3123_v44, %v3130_v24 }
0x1207   :  { %v3139_v59 = vmul.f32 1.442695, %v3135_v42 }
0x1209   :  { %5223 = vpow2.f32 %v3139_v59 }
0x120d   :  { %v3133_v56 = vpop.xlane.xlu1 %3132 }
0x120e   :  { %v3136_v61 = vsub.f32 %v3124_v28, %v3133_v56 }
0x1210   :  { %v3141_v62 = vmul.f32 1.442695, %v3136_v61 }
0x1212   :  { %5225 = vpow2.f32 %v3141_v62 }
0x1216   :  { %v5224_v2 = vpop.eup %5223 }
0x1217   :  { %v3146_v0 = vsel %vm656_vm5, %v5224_v2, 0.0 }
0x1218   :  { %3147 = vadd.xlane.f32.xlu0 %v3146_v0 }
0x121f   :  { %v5226_v58 = vpop.eup %5225 }
0x1220   :  { %v3149_v60 = vsel %vm656_vm5, %v5226_v58, 0.0 }
0x1221   :  { %3150 = vadd.xlane.f32.xlu0 %v3149_v60 }
0x1264   :  { %v4973_v50 = vpop.f32.mrf.mxu1 }
0x1265   :  { %v3380_v49 = vadd.f32 %v4973_v50, %v6429_v8 }
0x1266   :  { %v3374_v12 = vpop.f32.mrf.mxu1 }
0x1267   :  { %v3404_v23 = vadd.f32 %v3380_v49, %v6024_v19  ;;  %v3375_v45 = vadd.f32 %v6429_v8, %v3374_v12 }
0x1269   :  { %v6435_v54 = vadd.f32 %v3375_v45, %v6027_v20  ;;  %v3412_v14 = vsel %vm331_vm1, %v3404_v23, 0.0 }
0x126a   :  { %3413 = vadd.xlane.f32.xlu1 %v3412_v14 }
0x126b   :  { %v3409_v51 = vsel %vm331_vm1, %v6435_v54, 0.0 }
0x126c   :  { %3410 = vadd.xlane.f32.xlu0 %v3409_v51 }
0x1294   :  { %v4976_v13 = vpop.f32.mrf.mxu1 }
0x1295   :  { %v3390_v57 = vadd.f32 %v4976_v13, %v6429_v8 }
0x1296   :  { %v3384_v26 = vpop.f32.mrf.mxu1 }
0x1297   :  { %v6442_v10 = vadd.f32 %v3390_v57, %v6034_v32  ;;  %v3385_v19 = vadd.f32 %v6429_v8, %v3384_v26 }
0x1299   :  { %v3405_v16 = vadd.f32 %v3385_v19, %v6037_v5  ;;  %v3418_v20 = vsel %vm331_vm1, %v6442_v10, 0.0 }
0x129a   :  { %3419 = vadd.xlane.f32.xlu1 %v3418_v20 }
0x129b   :  { %v3415_v29 = vsel %vm331_vm1, %v3405_v16, 0.0 }
0x129c   :  { %3416 = vadd.xlane.f32.xlu0 %v3415_v29 }
0x12a1   :  { %v3148_v55 = vpop.xlane.xlu0 %3147 }
0x12a2   :  { %5227 = vrcp.f32 %v3148_v55 }
0x12aa   :  { %v3151_v30 = vpop.xlane.xlu0 %3150 }
0x12ab   :  { %5229 = vrcp.f32 %v3151_v30 }
0x12af   :  { %v5228_v17 = vpop.eup %5227 }
0x12b0   :  { %v3155_v34 = vmul.f32 %v5228_v17, %v5224_v2 }
0x12b2   :  { %4958 = vmatmul.mubr.msk.f32.gmra.mxu0 %vm656_vm5, %v3155_v34 }
0x12b3   :  { %4960 = vmatprep.mubr.msk.f32.mxu0 %vm5257_vm2, %v5256_v31  ;;  %v4284_v31 = vld [vmem:[%s6646_s3 + $0xf8] sm:$0xff] }
0x12b4   :  { %4980 = vmatprep.subr.mxu0 %v4284_v31 }
0x12b5   :  { %4981 = vmatpush3.msra.mxu0 %v4284_v31  ;;  %v4285_v31 = vld [vmem:[%s6646_s3 + $0x100] sm:$0xff] }
0x12b6   :  { %4982 = vmatprep.subr.mxu0 %v4283_v21 }
0x12b7   :  { %4983 = vmatpush3.msra.mxu0 %v4283_v21  ;;  %v6528_v21 = vld [vmem:[%s6647_s4 + $0xe] ss:$0 sm:$0xff] }
0x12b8   :  { %v5230_v32 = vpop.eup %5229  ;;  %4984 = vmatprep.subr.mxu0 %v4282_v3 }
0x12b9   :  { %v3157_v5 = vmul.f32 %v5230_v32, %v5226_v58  ;;  %4985 = vmatpush3.msra.mxu0 %v4282_v3  ;;  %v6476_v58 = vld [vmem:[%s6647_s4 + $0xa] ss:$0 sm:$0xff] }
0x12ba   :  { %4986 = vmatprep.subr.mxu0 %v4281_v63 }
0x12bb   :  { %4961 = vmatmul.mubr.msk.f32.gmra.mxu0 %vm656_vm5, %v3157_v5 }
0x12bc   :  { %4987 = vmatpush3.msra.mxu0 %v4281_v63 }
0x12f3   :  { %v3414_v47 = vpop.xlane.xlu1 %3413 }
0x12f4   :  { %v3428_v37 = vmul.f32 0.03125, %v3414_v47 }
0x12f5   :  { %v3411_v1 = vpop.xlane.xlu0 %3410 }
0x12f6   :  { %v3434_v6 = vsub.f32 %v3404_v23, %v3428_v37  ;;  %v3427_v41 = vmul.f32 0.03125, %v3411_v1  ;;  %v6482_v23 = vld [vmem:[%s6647_s4 + $0xb] ss:$0 sm:$0xff] }
0x12f8   :  { %v3433_v33 = vsub.f32 %v6435_v54, %v3427_v41  ;;  %v3440_v22 = vmul.f32 %v3434_v6, %v3434_v6 }
0x12fa   :  { %v3448_v18 = vsel %vm331_vm1, %v3440_v22, 0.0  ;;  %v3439_v7 = vmul.f32 %v3433_v33, %v3433_v33  ;;  %v4291_v22 = vld [vmem:[%s6646_s3 + $0x130] sm:$0xff] }
0x12fb   :  { %3449 = vadd.xlane.f32.xlu1 %v3448_v18  ;;  %v4288_v18 = vld [vmem:[%s6646_s3 + $0x118] sm:$0xff] }
0x12fc   :  { %v3445_v4 = vsel %vm331_vm1, %v3439_v7, 0.0  ;;  %v4287_v7 = vld [vmem:[%s6646_s3 + $0x110] sm:$0xff] }
0x12fd   :  { %3446 = vadd.xlane.f32.xlu0 %v3445_v4  ;;  %v4286_v4 = vld [vmem:[%s6646_s3 + $0x108] sm:$0xff] }
0x1323   :  { %v3420_v44 = vpop.xlane.xlu1 %3419 }
0x1324   :  { %v3430_v53 = vmul.f32 0.03125, %v3420_v44 }
0x1325   :  { %v3417_v48 = vpop.xlane.xlu0 %3416 }
0x1326   :  { %v3436_v28 = vsub.f32 %v6442_v10, %v3430_v53  ;;  %v3429_v43 = vmul.f32 0.03125, %v3417_v48 }
0x1328   :  { %v3435_v35 = vsub.f32 %v3405_v16, %v3429_v43  ;;  %v3442_v52 = vmul.f32 %v3436_v28, %v3436_v28 }
0x132a   :  { %v3454_v46 = vsel %vm331_vm1, %v3442_v52, 0.0  ;;  %v3441_v38 = vmul.f32 %v3435_v35, %v3435_v35 }
0x132b   :  { %3455 = vadd.xlane.f32.xlu1 %v3454_v46 }
0x132c   :  { %v3451_v15 = vsel %vm331_vm1, %v3441_v38, 0.0 }
0x132d   :  { %3452 = vadd.xlane.f32.xlu0 %v3451_v15 }
0x1372   :  { %v3247_v40 = vpop.f32.mrf.mxu0 }
0x1373   :  { %3270 = vrot.lane.b32.xlu0 %v3247_v40, %s5263_s1 }
0x1374   :  { %v4959_v27 = vpop.f32.mrf.mxu0 }
0x137b   :  { %v3252_v11 = vpop.f32.mrf.mxu0 }
0x137c   :  { %3272 = vrot.lane.b32.xlu1 %v3252_v11, %s5263_s1 }
0x137d   :  { %v4962_v24 = vpop.f32.mrf.mxu0 }
0x1384   :  { %v3450_v42 = vpop.xlane.xlu1 %3449 }
0x1385   :  { %v3464_v59 = vmul.f32 0.03125, %v3450_v42 }
0x1386   :  { %v3447_v56 = vpop.xlane.xlu0 %3446 }
0x1387   :  { %v3470_v61 = vadd.f32 1e-05, %v3464_v59  ;;  %v3463_v62 = vmul.f32 0.03125, %v3447_v56 }
0x1389   :  { %5231 = vrsqrt.f32 %v3470_v61  ;;  %v3469_v2 = vadd.f32 1e-05, %v3463_v62 }
0x138b   :  { %5233 = vrsqrt.f32 %v3469_v2 }
0x1396   :  { %v5232_v0 = vpop.eup %5231 }
0x1397   :  { %v3482_v60 = vmul.f32 %v5232_v0, %v3434_v6 }
0x1398   :  { %v5234_v50 = vpop.eup %5233 }
0x1399   :  { %v3481_v49 = vmul.f32 %v5234_v50, %v3433_v33  ;;  %v3492_v12 = vmul.f32 %v6476_v58, %v3482_v60  ;;  %v4292_v33 = vld [vmem:[%s6646_s3 + $0x138] sm:$0xff] }
0x139a   :  { %4997 = vmatprep.subr.mxu1 %v4292_v33 }
0x139b   :  { %v3491_v45 = vmul.f32 %v6476_v58, %v3481_v49  ;;  %v3502_v51 = vadd.f32 %v6482_v23, %v3492_v12  ;;  %4998 = vmatpush3.msra.mxu1 %v4292_v33 }
0x139c   :  { %4999 = vmatprep.subr.mxu1 %v4291_v22 }
0x139d   :  { %v3501_v14 = vadd.f32 %v6482_v23, %v3491_v45  ;;  %5000 = vmatpush3.msra.mxu1 %v4291_v22 }
0x139f   :  { %4988 = vmatprep.mubr.msk.f32.mxu0 %vm331_vm1, %v3501_v14 }
0x13a0   :  { %4989 = vmatmul.mubr.msk.f32.vlgmr.msra.gmra.mxu0 %vm331_vm1, %v3502_v51 }
0x13b4   :  { %v3456_v13 = vpop.xlane.xlu1 %3455 }
0x13b5   :  { %v3466_v57 = vmul.f32 0.03125, %v3456_v13 }
0x13b6   :  { %v3453_v26 = vpop.xlane.xlu0 %3452 }
0x13b7   :  { %v3472_v19 = vadd.f32 1e-05, %v3466_v57  ;;  %v3465_v16 = vmul.f32 0.03125, %v3453_v26 }
0x13b9   :  { %5235 = vrsqrt.f32 %v3472_v19  ;;  %v3471_v20 = vadd.f32 1e-05, %v3465_v16 }
0x13bb   :  { %5237 = vrsqrt.f32 %v3471_v20 }
0x13c6   :  { %v5236_v29 = vpop.eup %5235 }
0x13c7   :  { %v3484_v55 = vmul.f32 %v5236_v29, %v3436_v28 }
0x13c8   :  { %v5238_v30 = vpop.eup %5237 }
0x13c9   :  { %v3483_v17 = vmul.f32 %v5238_v30, %v3435_v35  ;;  %v3494_v34 = vmul.f32 %v6476_v58, %v3484_v55 }
0x13cb   :  { %v3493_v32 = vmul.f32 %v6476_v58, %v3483_v17  ;;  %v3504_v47 = vadd.f32 %v6482_v23, %v3494_v34 }
0x13cd   :  { %v3503_v5 = vadd.f32 %v6482_v23, %v3493_v32 }
0x13cf   :  { %4991 = vmatprep.mubr.msk.f32.mxu0 %vm331_vm1, %v3503_v5 }
0x13d0   :  { %4992 = vmatmul.mubr.msk.f32.gmra.mxu0 %vm331_vm1, %v3504_v47 }
0x13e5   :  { %v3271_v37 = vpop.permute.xlu0 %3270 }
0x13e6   :  { %v3284_v1 = vsel %vm557_vm3, %v6404_v36, %v3271_v37  ;;  %v4290_v36 = vld [vmem:[%s6646_s3 + $0x128] sm:$0xff] }
0x13e7   :  { %4977 = vmatprep.mubr.msk.f32.mxu1 %vm331_vm1, %v3284_v1  ;;  %5001 = vmatprep.subr.mxu1 %v4290_v36 }
0x13e8   :  { %5002 = vmatpush3.msra.mxu1 %v4290_v36 }
0x13ee   :  { %v3273_v6 = vpop.permute.xlu1 %3272 }
0x13ef   :  { %v3285_v41 = vsel %vm557_vm3, %v6406_v9, %v3273_v6  ;;  %v4289_v9 = vld [vmem:[%s6646_s3 + $0x120] sm:$0xff] }
0x13f0   :  { %4978 = vmatmul.mubr.msk.f32.gmra.mxu1 %vm331_vm1, %v3285_v41  ;;  %5003 = vmatprep.subr.mxu1 %v4289_v9 }
0x13f1   :  { %5004 = vmatpush3.msra.mxu1 %v4289_v9 }
0x13f2   :  { %5005 = vmatprep.subr.mxu1 %v4288_v18 }
0x13f3   :  { %5006 = vmatpush3.msra.mxu1 %v4288_v18 }
0x13f4   :  { %5007 = vmatprep.subr.mxu1 %v4287_v7 }
0x13f5   :  { %5008 = vmatpush3.msra.mxu1 %v4287_v7 }
0x13f6   :  { %5009 = vmatprep.subr.mxu1 %v4286_v4 }
0x13f7   :  { %5010 = vmatpush3.msra.mxu1 %v4286_v4 }
0x13f8   :  { %5011 = vmatprep.subr.mxu1 %v4285_v31 }
0x13f9   :  { %5012 = vmatpush3.msra.mxu1 %v4285_v31 }
0x1460   :  { %v4990_v3 = vpop.f32.mrf.mxu0 }
0x1461   :  { %v3601_v63 = vadd.f32 %v4990_v3, %v6528_v21 }
0x1462   :  { %v3595_v44 = vpop.f32.mrf.mxu0 }
0x1463   :  { %v3625_v53 = vmul.f32 %v3601_v63, %v3601_v63  ;;  %v3596_v48 = vadd.f32 %v6528_v21, %v3595_v44 }
0x1465   :  { %v3631_v28 = vmul.f32 %v3625_v53, %v3601_v63  ;;  %v3624_v43 = vmul.f32 %v3596_v48, %v3596_v48 }
0x1467   :  { %v3637_v35 = vmul.f32 0.044715, %v3631_v28  ;;  %v3630_v52 = vmul.f32 %v3624_v43, %v3596_v48  ;;  %v3795_v28 = vld [vmem:[%s6648_s5 + $0x10] sm:$0xff]  ;;  %v3794_v43 = vld [vmem:[%s6648_s5 + $0x8] sm:$0xff] }
0x1469   :  { %v3643_v46 = vadd.f32 %v3637_v35, %v3601_v63  ;;  %v3636_v38 = vmul.f32 0.044715, %v3630_v52  ;;  %v3793_v35 = vld [vmem:[%s6648_s5] sm:$0xff] }
0x146b   :  { %v3649_v15 = vmul.f32 0.7978846, %v3643_v46  ;;  %v3642_v40 = vadd.f32 %v3636_v38, %v3596_v48 }
0x146d   :  { %5239 = vtanh.f32 %v3649_v15  ;;  %v3648_v27 = vmul.f32 0.7978846, %v3642_v40 }
0x146f   :  { %5241 = vtanh.f32 %v3648_v27 }
0x147a   :  { %v5240_v11 = vpop.eup %5239 }
0x147b   :  { %v3661_v24 = vadd.f32 1.0, %v5240_v11 }
0x147c   :  { %v5242_v42 = vpop.eup %5241 }
0x147d   :  { %v3660_v59 = vadd.f32 1.0, %v5242_v42  ;;  %v3667_v56 = vmul.f32 0.5, %v3661_v24 }
0x147f   :  { %v3666_v61 = vmul.f32 0.5, %v3660_v59  ;;  %v3673_v2 = vmul.f32 %v3667_v56, %v3601_v63 }
0x1481   :  { %v3672_v62 = vmul.f32 %v3666_v61, %v3596_v48  ;;  %v3796_v48 = vld [vmem:[%s6648_s5 + $0x18] sm:$0xff] }
0x1482   :  { %5022 = vmatprep.subr.mxu0 %v3796_v48 }
0x1483   :  { %5013 = vmatprep.mubr.msk.f32.mxu1 %vm50_vm0, %v3672_v62  ;;  %5023 = vmatpush3.msra.mxu0 %v3796_v48  ;;  %v4362_v62 = vld [vmem:[%s6647_s4 + $0xd] ss:$0 sm:$0xff]  ;;  %v3981_v48 = vld [vmem:[%s6648_s5 + $0x40] sm:$0xff] }
0x1484   :  { %5014 = vmatmul.mubr.msk.f32.vlgmr.msra.gmra.mxu1 %vm50_vm0, %v3673_v2  ;;  %5024 = vmatprep.subr.mxu0 %v3795_v28 }
0x1485   :  { %5025 = vmatpush3.msra.mxu0 %v3795_v28  ;;  %v4372_v28 = vld [vmem:[%s6648_s5 + $0x81] ss:$0 sm:$0xff] }
0x1486   :  { %5026 = vmatprep.subr.mxu0 %v3794_v43 }
0x1487   :  { %5027 = vmatpush3.msra.mxu0 %v3794_v43 }
0x1488   :  { %5028 = vmatprep.subr.mxu0 %v3793_v35 }
0x1489   :  { %5029 = vmatpush3.msra.mxu0 %v3793_v35 }
0x1490   :  { %v4993_v0 = vpop.f32.mrf.mxu0 }
0x1491   :  { %v3611_v60 = vadd.f32 %v4993_v0, %v6528_v21 }
0x1492   :  { %v3605_v50 = vpop.f32.mrf.mxu0 }
0x1493   :  { %v3627_v49 = vmul.f32 %v3611_v60, %v3611_v60  ;;  %v3606_v12 = vadd.f32 %v6528_v21, %v3605_v50 }
0x1495   :  { %v3633_v45 = vmul.f32 %v3627_v49, %v3611_v60  ;;  %v3626_v14 = vmul.f32 %v3606_v12, %v3606_v12 }
0x1497   :  { %v3639_v51 = vmul.f32 0.044715, %v3633_v45  ;;  %v3632_v13 = vmul.f32 %v3626_v14, %v3606_v12 }
0x1499   :  { %v3645_v57 = vadd.f32 %v3639_v51, %v3611_v60  ;;  %v3638_v26 = vmul.f32 0.044715, %v3632_v13 }
0x149b   :  { %v3651_v19 = vmul.f32 0.7978846, %v3645_v57  ;;  %v3644_v16 = vadd.f32 %v3638_v26, %v3606_v12 }
0x149d   :  { %5243 = vtanh.f32 %v3651_v19  ;;  %v3650_v20 = vmul.f32 0.7978846, %v3644_v16  ;;  %v4369_v19 = vld [vmem:[%s6648_s5 + $0x80] ss:$0 sm:$0xff] }
0x149f   :  { %5245 = vtanh.f32 %v3650_v20 }
0x14aa   :  { %v5244_v29 = vpop.eup %5243 }
0x14ab   :  { %v3663_v55 = vadd.f32 1.0, %v5244_v29 }
0x14ac   :  { %v5246_v30 = vpop.eup %5245 }
0x14ad   :  { %v3662_v17 = vadd.f32 1.0, %v5246_v30  ;;  %v3669_v34 = vmul.f32 0.5, %v3663_v55 }
0x14af   :  { %v3668_v32 = vmul.f32 0.5, %v3662_v17  ;;  %v3675_v6 = vmul.f32 %v3669_v34, %v3611_v60 }
0x14b0   :  { %v4979_v5 = vpop.f32.mrf.mxu1 }
0x14b1   :  { %v3400_v47 = vadd.f32 %v4979_v5, %v6429_v8  ;;  %v3674_v37 = vmul.f32 %v3668_v32, %v3606_v12 }
0x14b2   :  { %v3394_v1 = vpop.f32.mrf.mxu1 }
0x14b3   :  { %v3408_v41 = vadd.f32 %v3400_v47, %v6044_v39  ;;  %v3395_v33 = vadd.f32 %v6429_v8, %v3394_v1  ;;  %5016 = vmatprep.mubr.msk.f32.mxu1 %vm50_vm0, %v3674_v37 }
0x14b4   :  { %5017 = vmatmul.mubr.msk.f32.gmra.mxu1 %vm50_vm0, %v3675_v6 }
0x14b5   :  { %v3407_v22 = vadd.f32 %v3395_v33, %v6047_v25  ;;  %v3424_v36 = vsel %vm331_vm1, %v3408_v41, 0.0 }
0x14b6   :  { %3425 = vadd.xlane.f32.xlu0 %v3424_v36 }
0x14b7   :  { %v3421_v9 = vsel %vm331_vm1, %v3407_v22, 0.0 }
0x14b8   :  { %3422 = vadd.xlane.f32.xlu1 %v3421_v9 }
0x153f   :  { %v3426_v18 = vpop.xlane.xlu0 %3425 }
0x1540   :  { %v3432_v7 = vmul.f32 0.03125, %v3426_v18 }
0x1541   :  { %v3423_v4 = vpop.xlane.xlu1 %3422 }
0x1542   :  { %v3438_v31 = vsub.f32 %v3408_v41, %v3432_v7  ;;  %v3431_v3 = vmul.f32 0.03125, %v3423_v4 }
0x1544   :  { %v3437_v39 = vsub.f32 %v3407_v22, %v3431_v3  ;;  %v5015_v63 = vpop.f32.mrf.mxu1  ;;  %v3444_v8 = vmul.f32 %v3438_v31, %v3438_v31 }
0x1546   :  { %v3460_v44 = vsel %vm331_vm1, %v3444_v8, 0.0  ;;  %v3443_v53 = vmul.f32 %v3437_v39, %v3437_v39  ;;  %v3766_v52 = vpop.f32.mrf.mxu1 }
0x1547   :  { %3461 = vadd.xlane.f32.xlu1 %v3460_v44  ;;  %v3767_v60 = vadd.f32 %v4362_v62, %v3766_v52  ;;  %v3984_v44 = vld [vmem:[%s6648_s5 + $0x58] sm:$0xff] }
0x1548   :  { %v3457_v25 = vsel %vm331_vm1, %v3443_v53, 0.0  ;;  %5044 = vmatprep.subr.mxu1 %v3984_v44  ;;  %v3983_v53 = vld [vmem:[%s6648_s5 + $0x50] sm:$0xff] }
0x1549   :  { %3458 = vadd.xlane.f32.xlu0 %v3457_v25  ;;  %v3791_v14 = vadd.f32 %v3767_v60, %v6435_v54  ;;  %v3889_v54 = vld [vmem:[%s6648_s5 + $0x30] sm:$0xff]  ;;  %5045 = vmatpush3.msra.mxu1 %v3984_v44  ;;  %v3982_v25 = vld [vmem:[%s6648_s5 + $0x48] sm:$0xff] }
0x154a   :  { %5046 = vmatprep.subr.mxu1 %v3983_v53 }
0x154b   :  { %5047 = vmatpush3.msra.mxu1 %v3983_v53 }
0x154c   :  { %5048 = vmatprep.subr.mxu1 %v3982_v25 }
0x154d   :  { %5049 = vmatpush3.msra.mxu1 %v3982_v25 }
0x154e   :  { %5050 = vmatprep.subr.mxu1 %v3981_v48 }
0x154f   :  { %5051 = vmatpush3.msra.mxu1 %v3981_v48 }
0x1574   :  { %v5018_v46 = vpop.f32.mrf.mxu1 }
0x1575   :  { %v3780_v12 = vadd.f32 %v5018_v46, %v4362_v62  ;;  %v4375_v62 = vld [vmem:[%s6648_s5 + $0x82] ss:$0 sm:$0xff] }
0x1576   :  { %v3775_v38 = vpop.f32.mrf.mxu1 }
0x1577   :  { %v3792_v51 = vadd.f32 %v3780_v12, %v6442_v10  ;;  %v3887_v10 = vld [vmem:[%s6648_s5 + $0x20] sm:$0xff] }
0x15d0   :  { %v3462_v15 = vpop.xlane.xlu1 %3461 }
0x15d1   :  { %v3468_v40 = vmul.f32 0.03125, %v3462_v15 }
0x15d2   :  { %v3459_v27 = vpop.xlane.xlu0 %3458 }
0x15d3   :  { %v3474_v11 = vadd.f32 1e-05, %v3468_v40  ;;  %v3467_v24 = vmul.f32 0.03125, %v3459_v27 }
0x15d5   :  { %5247 = vrsqrt.f32 %v3474_v11  ;;  %v3473_v42 = vadd.f32 1e-05, %v3467_v24 }
0x15d7   :  { %5249 = vrsqrt.f32 %v3473_v42  ;;  %v4078_v42 = vld [vmem:[%s6648_s5 + $0x78] sm:$0xff] }
0x15e2   :  { %v5248_v59 = vpop.eup %5247 }
0x15e3   :  { %v3486_v56 = vmul.f32 %v5248_v59, %v3438_v31  ;;  %v4077_v59 = vld [vmem:[%s6648_s5 + $0x70] sm:$0xff] }
0x15e4   :  { %v5250_v61 = vpop.eup %5249 }
0x15e5   :  { %v3485_v2 = vmul.f32 %v5250_v61, %v3437_v39  ;;  %v3496_v0 = vmul.f32 %v6476_v58, %v3486_v56  ;;  %v4076_v56 = vld [vmem:[%s6648_s5 + $0x68] sm:$0xff]  ;;  %v4075_v61 = vld [vmem:[%s6648_s5 + $0x60] sm:$0xff] }
0x15e7   :  { %v3495_v50 = vmul.f32 %v6476_v58, %v3485_v2  ;;  %v3506_v45 = vadd.f32 %v6482_v23, %v3496_v0  ;;  %v3890_v58 = vld [vmem:[%s6648_s5 + $0x38] sm:$0xff] }
0x15e8   :  { %5033 = vmatprep.subr.mxu0 %v3890_v58 }
0x15e9   :  { %v3505_v49 = vadd.f32 %v6482_v23, %v3495_v50  ;;  %v3888_v23 = vld [vmem:[%s6648_s5 + $0x28] sm:$0xff] }
0x15eb   :  { %4994 = vmatprep.mubr.msk.f32.mxu0 %vm331_vm1, %v3505_v49 }
0x15ec   :  { %4995 = vmatmul.mubr.msk.f32.gmra.mxu0 %vm331_vm1, %v3506_v45 }
0x15ed   :  { %5030 = vmatprep.mubr.msk.f32.mxu0 %vm331_vm1, %v3791_v14 }
0x15f0   :  { %5031 = vmatmul.mubr.msk.f32.vlgmr.msra.gmra.mxu0 %vm331_vm1, %v3792_v51 }
0x15f1   :  { %5034 = vmatpush3.msra.mxu0 %v3890_v58 }
0x15f2   :  { %5035 = vmatprep.subr.mxu0 %v3889_v54 }
0x15f3   :  { %5036 = vmatpush3.msra.mxu0 %v3889_v54 }
0x15f4   :  { %5037 = vmatprep.subr.mxu0 %v3888_v23 }
0x15f5   :  { %5038 = vmatpush3.msra.mxu0 %v3888_v23 }
0x15f6   :  { %5039 = vmatprep.subr.mxu0 %v3887_v10 }
0x15f7   :  { %5040 = vmatpush3.msra.mxu0 %v3887_v10 }
0x15f8   :  { %5055 = vmatprep.subr.mxu0 %v4078_v42 }
0x16ac   :  { %v4996_v13 = vpop.f32.mrf.mxu0 }
0x16ad   :  { %v3621_v57 = vadd.f32 %v4996_v13, %v6528_v21 }
0x16ae   :  { %v3615_v26 = vpop.f32.mrf.mxu0 }
0x16af   :  { %v3629_v16 = vmul.f32 %v3621_v57, %v3621_v57  ;;  %v3616_v20 = vadd.f32 %v6528_v21, %v3615_v26 }
0x16b0   :  { %v5032_v29 = vpop.f32.mrf.mxu0 }
0x16b1   :  { %v3635_v55 = vmul.f32 %v3629_v16, %v3621_v57  ;;  %v3628_v30 = vmul.f32 %v3616_v20, %v3616_v20  ;;  %v3880_v17 = vadd.f32 %v5032_v29, %v4369_v19 }
0x16b2   :  { %v3874_v34 = vpop.f32.mrf.mxu0 }
0x16b3   :  { %v3641_v32 = vmul.f32 0.044715, %v3635_v55  ;;  %v3634_v5 = vmul.f32 %v3628_v30, %v3616_v20  ;;  %v3875_v47 = vadd.f32 %v4369_v19, %v3874_v34  ;;  %v3884_v37 = vmax.f32 %v3880_v17, 0.0  ;;  %v4382_v17 = vld [vmem:[%s6648_s5 + $0x85] ss:$0 sm:$0xff] }
0x16b5   :  { %v3647_v1 = vadd.f32 %v3641_v32, %v3621_v57  ;;  %v3640_v6 = vmul.f32 0.044715, %v3634_v5  ;;  %v3883_v41 = vmax.f32 %v3875_v47, 0.0  ;;  %v3886_v9 = vadd.f32 %v3884_v37, %v3792_v51  ;;  %v4378_v51 = vld [vmem:[%s6648_s5 + $0x83] ss:$0 sm:$0xff] }
0x16b7   :  { %v3653_v33 = vmul.f32 0.7978846, %v3647_v1  ;;  %v3646_v22 = vadd.f32 %v3640_v6, %v3616_v20  ;;  %v3885_v36 = vadd.f32 %v3883_v41, %v3791_v14 }
0x16b9   :  { %5251 = vtanh.f32 %v3653_v33  ;;  %v3652_v18 = vmul.f32 0.7978846, %v3646_v22  ;;  %5041 = vmatprep.mubr.msk.f32.mxu0 %vm331_vm1, %v3885_v36 }
0x16ba   :  { %5042 = vmatmul.mubr.msk.f32.vlgmr.msra.gmra.mxu0 %vm331_vm1, %v3886_v9 }
0x16bb   :  { %5253 = vtanh.f32 %v3652_v18  ;;  %5056 = vmatpush3.msra.mxu0 %v4078_v42 }
0x16bc   :  { %5057 = vmatprep.subr.mxu0 %v4077_v59 }
0x16bd   :  { %5058 = vmatpush3.msra.mxu0 %v4077_v59 }
0x16be   :  { %5059 = vmatprep.subr.mxu0 %v4076_v56 }
0x16bf   :  { %5060 = vmatpush3.msra.mxu0 %v4076_v56 }
0x16c0   :  { %5061 = vmatprep.subr.mxu0 %v4075_v61 }
0x16c1   :  { %5062 = vmatpush3.msra.mxu0 %v4075_v61 }
0x16c6   :  { %v5252_v21 = vpop.eup %5251 }
0x16c7   :  { %v3665_v7 = vadd.f32 1.0, %v5252_v21 }
0x16c8   :  { %v5254_v4 = vpop.eup %5253 }
0x16c9   :  { %v3664_v31 = vadd.f32 1.0, %v5254_v4  ;;  %v3671_v3 = vmul.f32 0.5, %v3665_v7 }
0x16cb   :  { %v3670_v39 = vmul.f32 0.5, %v3664_v31  ;;  %v3677_v8 = vmul.f32 %v3671_v3, %v3621_v57  ;;  %v4381_v57 = vld [vmem:[%s6648_s5 + $0x84] ss:$0 sm:$0xff] }
0x16cd   :  { %v3676_v63 = vmul.f32 %v3670_v39, %v3616_v20 }
0x16cf   :  { %5019 = vmatprep.mubr.msk.f32.mxu1 %vm50_vm0, %v3676_v63 }
0x16d0   :  { %5020 = vmatmul.mubr.msk.f32.gmra.mxu1 %vm50_vm0, %v3677_v8 }
0x177a   :  { %v5043_v43 = vpop.f32.mrf.mxu0 }
0x177b   :  { %v3974_v35 = vadd.f32 %v5043_v43, %v4372_v28 }
0x177c   :  { %v3968_v52 = vpop.f32.mrf.mxu0 }
0x177d   :  { %v3969_v46 = vadd.f32 %v4372_v28, %v3968_v52  ;;  %v3978_v38 = vmax.f32 %v3974_v35, 0.0 }
0x177f   :  { %v3977_v15 = vmax.f32 %v3969_v46, 0.0  ;;  %v3980_v27 = vadd.f32 %v3978_v38, %v3886_v9 }
0x1781   :  { %v3979_v40 = vadd.f32 %v3977_v15, %v3885_v36 }
0x1783   :  { %5052 = vmatprep.mubr.msk.f32.mxu1 %vm331_vm1, %v3979_v40 }
0x1784   :  { %5053 = vmatmul.mubr.msk.f32.vlgmr.msra.gmra.mxu1 %vm331_vm1, %v3980_v27 }
0x1790   :  { %v5021_v11 = vpop.f32.mrf.mxu1 }
0x1792   :  { %v3784_v24 = vpop.f32.mrf.mxu1 }
0x1844   :  { %v5054_v2 = vpop.f32.mrf.mxu1 }
0x1845   :  { %v4068_v0 = vadd.f32 %v5054_v2, %v4375_v62 }
0x1846   :  { %v4062_v60 = vpop.f32.mrf.mxu1 }
0x1847   :  { %v4063_v50 = vadd.f32 %v4375_v62, %v4062_v60  ;;  %v4072_v49 = vmax.f32 %v4068_v0, 0.0 }
0x1849   :  { %v4071_v12 = vmax.f32 %v4063_v50, 0.0  ;;  %v4074_v14 = vadd.f32 %v4072_v49, %v3980_v27 }
0x184b   :  { %v4073_v45 = vadd.f32 %v4071_v12, %v3979_v40 }
0x184d   :  { %5063 = vmatprep.mubr.msk.f32.mxu0 %vm331_vm1, %v4073_v45 }
0x184e   :  { %5064 = vmatmul.mubr.msk.f32.vlgmr.msra.gmra.mxu0 %vm331_vm1, %v4074_v14 }
0x190e   :  { %v5065_v58 = vpop.f32.mrf.mxu0 }
0x190f   :  { %v4162_v54 = vadd.f32 %v5065_v58, %v4378_v51 }
0x1910   :  { %v4156_v23 = vpop.f32.mrf.mxu0 }
0x1911   :  { %v4166_v10 = vmax.f32 %v4162_v54, 0.0  ;;  %v4157_v13 = vadd.f32 %v4378_v51, %v4156_v23 }
0x1913   :  { %v4168_v26 = vadd.f32 %v4166_v10, %v4074_v14  ;;  %v4165_v19 = vmax.f32 %v4157_v13, 0.0 }
0x1915   :  { %v4167_v16 = vadd.f32 %v4165_v19, %v4073_v45  ;;  %v4176_v20 = vmul.f32 %v4381_v57, %v4168_v26 }
0x1917   :  { %v4180_v29 = vsel %vm331_vm1, %v4176_v20, 0.0  ;;  %v4175_v55 = vmul.f32 %v4381_v57, %v4167_v16 }
0x1918   :  { %4181 = vadd.xlane.f32.xlu1 %v4180_v29 }
0x1919   :  { %v4177_v30 = vsel %vm331_vm1, %v4175_v55, 0.0 }
0x191a   :  { %4178 = vadd.xlane.f32.xlu0 %v4177_v30 }
0x19a1   :  { %v4182_v34 = vpop.xlane.xlu1 %4181 }
0x19a2   :  { %v4188_v32 = vadd.f32 %v4382_v17, %v4182_v34 }
0x19a3   :  { %v4179_v5 = vpop.xlane.xlu0 %4178 }
0x19a4   :  { %4191 = vst.msk [vmem:[%s6649_s6 + $0x8] sm:$0xff] %vm4189_vm6, %v4188_v32  ;;  %v4187_v47 = vadd.f32 %v4382_v17, %v4179_v5 }
0x19a6   :  { %4190 = vst.msk [vmem:[%s6649_s6] sm:$0xff] %vm4189_vm6, %v4187_v47 }

</bundles_post_ra>
